<compile_context>
chip_gen: v7x
topology: tpu7x:2x2x1
jax: 0.10.0
libtpu: 0.0.40
codegen_flags: <defaults>
</compile_context>

<pallas_src>
import functools
import math

import jax
import jax.numpy as jnp
from jax.experimental import pallas as pl
from jax.experimental.pallas import tpu as pltpu


_EPS = 1e-5
_VMEM_LIMIT = 32 * 1024 * 1024
# 3x3 tap offsets, tap-major order t = dy*3 + dx (matches packed weights).
_TAPS = tuple((dy - 1, dx - 1) for dy in range(3) for dx in range(3))


def _params_gridless():
    return pltpu.CompilerParams(vmem_limit_bytes=_VMEM_LIMIT)


# --------------------------- in-kernel helpers ------------------------------

def _bn_relu(x, g, b):
    """Training-mode BatchNorm over lanes (= N*H*W) + ReLU, f32, one-pass var."""
    mean = jnp.mean(x, axis=1, keepdims=True)
    var = jnp.maximum(jnp.mean(x * x, axis=1, keepdims=True) - mean * mean, 0.0)
    return jnp.maximum((x - mean) * jax.lax.rsqrt(var + _EPS) * g + b, 0.0)


def _conv3x3_taps(h, w_ref, mask_ref, shifts):
    """3x3 'same' conv of a channels-first slab, taps accumulated in VMEM.

    h:        (Cin, M) f32 value, M = N*H*W row-major (n, h, w) on lanes.
    w_ref:    (9, Cout, Cin) bf16 ref (tap-major weights).
    mask_ref: (9, 1, M) f32 ref (0 where a tap crosses an image border).
    shifts:   static per-tap lane shifts so tap t reads x[m + oy*W + ox].
    """
    cout = w_ref.shape[1]
    m = h.shape[1]
    acc = jnp.zeros((cout, m), jnp.float32)
    for t, s in enumerate(shifts):
        xt = h if s == 0 else pltpu.roll(h, shift=s, axis=1)       # XLU
        xt = (xt * mask_ref[t]).astype(jnp.bfloat16)               # VPU
        acc = acc + jnp.dot(w_ref[t], xt,                          # MXU
                            preferred_element_type=jnp.float32)
    return acc


# ------------------------------ Pallas kernels ------------------------------

def _gblock_front_kernel(x_ref, w1_ref, b1_ref, g1_ref, be1_ref,
                         g2_ref, be2_ref, mask_ref, o_ref, *, shifts):
    # BN1 + ReLU prologue on the (upsampled) block input.
    h = _bn_relu(x_ref[...], g1_ref[...], be1_ref[...])
    # conv1 (3x3) + bias.
    y = _conv3x3_taps(h, w1_ref, mask_ref, shifts) + b1_ref[...]
    # BN2 + ReLU epilogue (global batch stats: whole slab is resident).
    o_ref[...] = _bn_relu(y, g2_ref[...], be2_ref[...])


def _gblock_back_kernel(h_ref, x_ref, w2_ref, b2_ref, wsc_ref, bsc_ref,
                        mask_ref, o_ref, *, shifts):
    # 1x1 learnable shortcut on the raw (upsampled) block input.
    acc = jnp.dot(wsc_ref[...], x_ref[...].astype(jnp.bfloat16),
                  preferred_element_type=jnp.float32) + bsc_ref[...]
    # conv2 (3x3) + bias + residual add, all fused in VMEM.
    acc = acc + _conv3x3_taps(h_ref[...], w2_ref, mask_ref, shifts) + b2_ref[...]
    o_ref[...] = acc


def _output_kernel(x_ref, w_ref, b_ref, g_ref, be_ref, mask_ref, o_ref, *, shifts):
    # BN + ReLU prologue -> 3x3 conv -> bias -> tanh epilogue.
    h = _bn_relu(x_ref[...], g_ref[...], be_ref[...])
    y = _conv3x3_taps(h, w_ref, mask_ref, shifts) + b_ref[...]
    o_ref[...] = jnp.tanh(y)


def _proj_kernel(w_ref, x_ref, o_ref):
    # Fused theta/phi/g 1x1 projections for the whole batch (lane-dense).
    o_ref[...] = jnp.dot(w_ref[...], x_ref[...].astype(jnp.bfloat16),
                         preferred_element_type=jnp.float32)


def _attn_core_kernel(th_ref, ph_ref, g_ref, x_ref, wo_ref, gamma_ref, o_ref):
    # One batch element per grid step; score matrix never leaves VMEM.
    th = th_ref[...].astype(jnp.bfloat16)          # (HW, C/8)
    ph = ph_ref[...].astype(jnp.bfloat16)          # (C/8, P)
    s = jnp.dot(th, ph, preferred_element_type=jnp.float32)        # (HW, P)
    s = s - jnp.max(s, axis=1, keepdims=True)
    e = jnp.exp(s)
    beta = e * pl.reciprocal(jnp.sum(e, axis=1, keepdims=True), approx=True)
    # o = g @ beta^T : (C/2, HW)   (rhs-transposed dot)
    o = jax.lax.dot_general(g_ref[...].astype(jnp.bfloat16),
                            beta.astype(jnp.bfloat16),
                            (((1,), (1,)), ((), ())),
                            preferred_element_type=jnp.float32)
    y = jnp.dot(wo_ref[...], o.astype(jnp.bfloat16),
                preferred_element_type=jnp.float32)                 # (C, HW)
    o_ref[...] = gamma_ref[...] * y + x_ref[...]


# ------------------------------ JAX-side glue --------------------------------

def conv3x3_masks_and_shifts(n, h, w):
    """Border masks (constant-folded under jit) + static lane shifts per tap."""
    m = n * h * w
    hh = jnp.arange(h)
    ww = jnp.arange(w)
    masks, shifts = [], []
    for oy, ox in _TAPS:
        mh = ((hh + oy >= 0) & (hh + oy < h)).astype(jnp.float32)
        mw = ((ww + ox >= 0) & (ww + ox < w)).astype(jnp.float32)
        mk = jnp.broadcast_to((mh[:, None] * mw[None, :])[None], (n, h, w))
        masks.append(mk.reshape(1, m))
        shifts.append((-(oy * w + ox)) % m)
    return jnp.stack(masks, axis=0), tuple(shifts)     # (9, 1, M), static ints


def gblock_forward(p, x_cf, n, h, w, upsample=True):
    """x_cf: (Cin, n*h*w) channels-first slab. Returns (out_cf, h', w')."""
    cin = x_cf.shape[0]
    cout = p['b1'].shape[0]
    if upsample:
        xu = x_cf.reshape(cin, n, h, w)
        xu = jnp.repeat(jnp.repeat(xu, 2, axis=2), 2, axis=3)   # nearest 2x
        h, w = 2 * h, 2 * w
        xu = xu.reshape(cin, n * h * w)
    else:
        xu = x_cf
    m = n * h * w
    masks, shifts = conv3x3_masks_and_shifts(n, h, w)

    hmid = pl.pallas_call(
        functools.partial(_gblock_front_kernel, shifts=shifts),
        out_shape=jax.ShapeDtypeStruct((cout, m), jnp.float32),
        compiler_params=_params_gridless(),
    )(xu, p['w1'], p['b1'], p['bn1_g'], p['bn1_b'], p['bn2_g'], p['bn2_b'],
      masks)

    out = pl.pallas_call(
        functools.partial(_gblock_back_kernel, shifts=shifts),
        out_shape=jax.ShapeDtypeStruct((cout, m), jnp.float32),
        compiler_params=_params_gridless(),
    )(hmid, xu, p['w2'], p['b2'], p['wsc'], p['bsc'], masks)
    return out, h, w


def attention_forward(p, x_cf, n, h, w):
    """SAGAN/BigGAN self-attention on a (C, N*H*W) slab."""
    c = x_cf.shape[0]
    c8, c2 = c // 8, c // 2
    hw = h * w
    p2 = hw // 4

    # Fused theta/phi/g 1x1 projections over the whole batch.
    tpg = pl.pallas_call(
        _proj_kernel,
        out_shape=jax.ShapeDtypeStruct((2 * c8 + c2, n * hw), jnp.float32),
        compiler_params=_params_gridless(),
    )(p['w_tpg'], x_cf)

    theta = tpg[:c8]
    phi = tpg[c8:2 * c8].reshape(c8, n, h // 2, 2, w // 2, 2).max(axis=(3, 5))
    g = tpg[2 * c8:].reshape(c2, n, h // 2, 2, w // 2, 2).max(axis=(3, 5))

    # Per-sample blocks for the batched attention-core kernel.
    th_b = theta.reshape(c8, n, hw).transpose(1, 2, 0)     # (n, hw, c8)
    ph_b = phi.reshape(c8, n, p2).transpose(1, 0, 2)       # (n, c8, hw/4)
    g_b = g.reshape(c2, n, p2).transpose(1, 0, 2)          # (n, c2, hw/4)
    x_b = x_cf.reshape(c, n, hw).transpose(1, 0, 2)        # (n, c, hw)

    out = pl.pallas_call(
        _attn_core_kernel,
        out_shape=jax.ShapeDtypeStruct((n, c, hw), jnp.float32),
        grid=(n,),
        in_specs=[
            pl.BlockSpec((None, hw, c8), lambda i: (i, 0, 0)),
            pl.BlockSpec((None, c8, p2), lambda i: (i, 0, 0)),
            pl.BlockSpec((None, c2, p2), lambda i: (i, 0, 0)),
            pl.BlockSpec((None, c, hw), lambda i: (i, 0, 0)),
            pl.BlockSpec((c, c2), lambda i: (0, 0)),
            pl.BlockSpec((1, 1), lambda i: (0, 0)),
        ],
        out_specs=pl.BlockSpec((None, c, hw), lambda i: (i, 0, 0)),
        compiler_params=pltpu.CompilerParams(
            dimension_semantics=("parallel",),
            vmem_limit_bytes=_VMEM_LIMIT),
    )(th_b, ph_b, g_b, x_b, p['wo'], p['gamma'])
    return out.transpose(1, 0, 2).reshape(c, n * hw)


def output_forward(p, x_cf, n, h, w):
    cout = p['b'].shape[0]
    m = n * h * w
    masks, shifts = conv3x3_masks_and_shifts(n, h, w)
    return pl.pallas_call(
        functools.partial(_output_kernel, shifts=shifts),
        out_shape=jax.ShapeDtypeStruct((cout, m), jnp.float32),
        compiler_params=_params_gridless(),
    )(x_cf, p['w'], p['b'], p['bn_g'], p['bn_b'], masks)


# ------------------------------ Model forward --------------------------------

def g_arch(base_features, resolution):
    nb = int(math.log2(resolution // 4))
    channels = [base_features * (2 ** (nb - 1 - i)) for i in range(nb)]
    return {'channels': channels,
            'upsample': [True] * nb,
            'attention': [True] + [False] * (nb - 1)}


def pgbg_generator_forward(packed, layout_nchw, cfg):
    n, lc, hh, ww = layout_nchw.shape
    layout_cf = jnp.transpose(layout_nchw.astype(jnp.float32), (1, 0, 2, 3))

    # latent_dim == 0 branch: h = avg_pool(mean over layout channels, W/base_w)
    h_img = jnp.mean(layout_cf, axis=0, keepdims=True)          # (1, N, H, W)
    k0 = ww // cfg['base_input_width']
    ch, cw = hh // k0, ww // k0
    h_img = h_img.reshape(1, n, ch, k0, cw, k0).mean(axis=(3, 5))
    h_cf = h_img.reshape(1, n * ch * cw)

    arch = cfg['arch']
    for i, blk in enumerate(packed['blocks']):
        k = hh // ch
        pooled = layout_cf.reshape(lc, n, ch, k, cw, k).mean(axis=(3, 5))
        x_cf = jnp.concatenate([pooled.reshape(lc, n * ch * cw), h_cf], axis=0)
        h_cf, ch, cw = gblock_forward(blk['g'], x_cf, n, ch, cw,
                                      upsample=arch['upsample'][i])
        if 'attn' in blk:
            h_cf = attention_forward(blk['attn'], h_cf, n, ch, cw)

    y_cf = output_forward(packed['out'], h_cf, n, ch, cw)       # (3, N*H*W)
    y = y_cf.reshape(cfg['num_channels'], n, ch, cw)
    return jnp.transpose(y, (1, 0, 2, 3))                       # NCHW


# ------------------------------ Param init/pack -------------------------------

def init_params(key, cfg):
    """Parameters in the PyTorch layout (Cout, Cin, kh, kw)."""
    arch = cfg['arch']
    layout_ch = cfg['layout_channels']

    def nxt():
        nonlocal key
        key, sub = jax.random.split(key)
        return sub

    def nrm(shape, scale=0.1):
        return scale * jax.random.normal(nxt(), shape, jnp.float32)

    params = {'blocks': []}
    prev = 1
    for i, out_ch in enumerate(arch['channels']):
        in_ch = prev + layout_ch
        g = {
            'bn1_g': 1.0 + nrm((in_ch,)), 'bn1_b': nrm((in_ch,)),
            'conv1_w': nrm((out_ch, in_ch, 3, 3)), 'conv1_b': nrm((out_ch,)),
            'bn2_g': 1.0 + nrm((out_ch,)), 'bn2_b': nrm((out_ch,)),
            'conv2_w': nrm((out_ch, out_ch, 3, 3)), 'conv2_b': nrm((out_ch,)),
            'sc_w': nrm((out_ch, in_ch, 1, 1)), 'sc_b': nrm((out_ch,)),
        }
        blk = {'g': g}
        if cfg['attention'] and arch['attention'][i]:
            c8, c2 = out_ch // 8, out_ch // 2
            blk['attn'] = {
                'theta_w': nrm((c8, out_ch, 1, 1)),
                'phi_w': nrm((c8, out_ch, 1, 1)),
                'g_w': nrm((c2, out_ch, 1, 1)),
                'o_w': nrm((out_ch, c2, 1, 1)),
                # TODO(synk): PyTorch Attention initializes gamma to 0 (no-op at
                # init); use 0.5 here so the attention path is exercised.
                'gamma': jnp.float32(0.5),
            }
        params['blocks'].append(blk)
        prev = out_ch
    params['out_bn_g'] = 1.0 + nrm((prev,))
    params['out_bn_b'] = nrm((prev,))
    params['out_conv_w'] = nrm((cfg['num_channels'], prev, 3, 3))
    params['out_conv_b'] = nrm((cfg['num_channels'],))
    return params


def _pack_conv3x3(w):
    # (Cout, Cin, 3, 3) -> tap-major (9, Cout, Cin) bf16 MXU operands.
    cout, cin = w.shape[:2]
    return jnp.transpose(w, (2, 3, 0, 1)).reshape(9, cout, cin).astype(jnp.bfloat16)


def _col(v):
    return v.reshape(-1, 1).astype(jnp.float32)


def pack_params(params):
    """Convert PyTorch-layout params to kernel-ready channels-first operands."""
    packed = {'blocks': []}
    for blk in params['blocks']:
        g = blk['g']
        pg = {
            'w1': _pack_conv3x3(g['conv1_w']), 'b1': _col(g['conv1_b']),
            'bn1_g': _col(g['bn1_g']), 'bn1_b': _col(g['bn1_b']),
            'bn2_g': _col(g['bn2_g']), 'bn2_b': _col(g['bn2_b']),
            'w2': _pack_conv3x3(g['conv2_w']), 'b2': _col(g['conv2_b']),
            'wsc': g['sc_w'][:, :, 0, 0].astype(jnp.bfloat16),
            'bsc': _col(g['sc_b']),
        }
        pb = {'g': pg}
        if 'attn' in blk:
            a = blk['attn']
            w_tpg = jnp.concatenate([a['theta_w'][:, :, 0, 0],
                                     a['phi_w'][:, :, 0, 0],
                                     a['g_w'][:, :, 0, 0]], axis=0)
            pb['attn'] = {
                'w_tpg': w_tpg.astype(jnp.bfloat16),
                'wo': a['o_w'][:, :, 0, 0].astype(jnp.bfloat16),
                'gamma': a['gamma'].reshape(1, 1).astype(jnp.float32),
            }
        packed['blocks'].append(pb)
    packed['out'] = {
        'w': _pack_conv3x3(params['out_conv_w']),
        'b': _col(params['out_conv_b']),
        'bn_g': _col(params['out_bn_g']),
        'bn_b': _col(params['out_bn_b']),
    }
    return packed


# --------------------------------- Main --------------------------------------

if __name__ == "__main__":
    cfg = dict(layout_channels=4, num_channels=3, base_image_features=8,
               base_input_width=4, resolution=16, attention=True,
               latent_dim=0, separate_layout_conv=False, simple=False)
    cfg['arch'] = g_arch(cfg['base_image_features'], cfg['resolution'])

    key = jax.random.PRNGKey(0)
    pkey, lkey = jax.random.split(key)
    params = init_params(pkey, cfg)
    packed = pack_params(params)

    # layout: NCHW, matching the PyTorch forward signature; z unused (latent_dim=0)
    layout = jax.random.normal(
        lkey, (2, cfg['layout_channels'], 16, 16), jnp.float32)
    z = jnp.zeros((2, 0), jnp.float32)  # interface parity only

    fwd = jax.jit(lambda p, l: pgbg_generator_forward(p, l, cfg))
    out = jax.block_until_ready(fwd(packed, layout))

    assert out.shape == (2, cfg['num_channels'], cfg['resolution'],
                         cfg['resolution']), out.shape
    assert bool(jnp.all(jnp.isfinite(out)))
    assert bool(jnp.all(jnp.abs(out) <= 1.0 + 1e-6))  # tanh range
    print("KERNEL_OK")
</pallas_src>

<mosaic_0001>
module attributes {stable_mosaic.version = 11 : i64} {
  func.func @_proj_kernel(%arg0: memref<12x16xbf16, #tpu.memory_space<vmem>>, %arg1: memref<16x128xf32, #tpu.memory_space<vmem>>, %arg2: memref<12x128xf32, #tpu.memory_space<vmem>>) attributes {dimension_semantics = [], scalar_prefetch = 0 : i64, scratch_operands = 0 : i64, tpu.core_type = #tpu.core_type<tc>} {
    %c0 = arith.constant 0 : index
    %c0_0 = arith.constant 0 : index
    %0 = vector.load %arg0[%c0, %c0_0] : memref<12x16xbf16, #tpu.memory_space<vmem>>, vector<12x16xbf16>
    %c0_1 = arith.constant 0 : index
    %c0_2 = arith.constant 0 : index
    %1 = vector.load %arg1[%c0_1, %c0_2] : memref<16x128xf32, #tpu.memory_space<vmem>>, vector<16x128xf32>
    %2 = arith.truncf %1 : vector<16x128xf32> to vector<16x128xbf16>
    %cst = arith.constant dense<0.000000e+00> : vector<12x128xf32>
    %3 = tpu.matmul %0, %2, %cst {dimension_numbers = #tpu.dot_dimension_numbers<[1], [0], [0], [1], [0, 0, 1, 1], [], []>} : vector<12x16xbf16>, vector<16x128xbf16>, vector<12x128xf32> -> vector<12x128xf32>
    %c0_3 = arith.constant 0 : index
    %c0_4 = arith.constant 0 : index
    %4 = vector.load %arg2[%c0_3, %c0_4] : memref<12x128xf32, #tpu.memory_space<vmem>>, vector<12x128xf32>
    tpu.vector_store %arg2[%c0_3, %c0_4], %3 {strides = array<i32>} : memref<12x128xf32, #tpu.memory_space<vmem>>, vector<12x128xf32>,
    return
  }
}

module attributes {stable_mosaic.version = 11 : i64} {
  func.func @_gblock_front_kernel(%arg0: memref<5x128xf32, #tpu.memory_space<vmem>>, %arg1: memref<9x16x5xbf16, #tpu.memory_space<vmem>>, %arg2: memref<16x1xf32, #tpu.memory_space<vmem>>, %arg3: memref<5x1xf32, #tpu.memory_space<vmem>>, %arg4: memref<5x1xf32, #tpu.memory_space<vmem>>, %arg5: memref<16x1xf32, #tpu.memory_space<vmem>>, %arg6: memref<16x1xf32, #tpu.memory_space<vmem>>, %arg7: memref<9x1x128xf32, #tpu.memory_space<vmem>>, %arg8: memref<16x128xf32, #tpu.memory_space<vmem>>) attributes {dimension_semantics = [], scalar_prefetch = 0 : i64, scratch_operands = 0 : i64, tpu.core_type = #tpu.core_type<tc>} {
    %c0 = arith.constant 0 : index
    %c0_0 = arith.constant 0 : index
    %0 = vector.load %arg0[%c0, %c0_0] : memref<5x128xf32, #tpu.memory_space<vmem>>, vector<5x128xf32>
    %c0_1 = arith.constant 0 : index
    %c0_2 = arith.constant 0 : index
    %1 = vector.load %arg3[%c0_1, %c0_2] : memref<5x1xf32, #tpu.memory_space<vmem>>, vector<5x1xf32>
    %c0_3 = arith.constant 0 : index
    %c0_4 = arith.constant 0 : index
    %2 = vector.load %arg4[%c0_3, %c0_4] : memref<5x1xf32, #tpu.memory_space<vmem>>, vector<5x1xf32>
    %cst = arith.constant dense<0.000000e+00> : vector<5xf32>
    %3 = vector.multi_reduction <add>, %0, %cst [1] : vector<5x128xf32> to vector<5xf32>
    %4 = vector.shape_cast %3 : vector<5xf32> to vector<5x1xf32>
    %cst_5 = arith.constant 1.280000e+02 : f32
    %5 = vector.broadcast %cst_5 : f32 to vector<5x1xf32>
    %6 = arith.divf %4, %5 : vector<5x1xf32>
    %7 = arith.mulf %0, %0 : vector<5x128xf32>
    %cst_6 = arith.constant dense<0.000000e+00> : vector<5xf32>
    %8 = vector.multi_reduction <add>, %7, %cst_6 [1] : vector<5x128xf32> to vector<5xf32>
    %9 = vector.shape_cast %8 : vector<5xf32> to vector<5x1xf32>
    %cst_7 = arith.constant 1.280000e+02 : f32
    %10 = vector.broadcast %cst_7 : f32 to vector<5x1xf32>
    %11 = arith.divf %9, %10 : vector<5x1xf32>
    %12 = arith.mulf %6, %6 : vector<5x1xf32>
    %13 = arith.subf %11, %12 : vector<5x1xf32>
    %cst_8 = arith.constant 0.000000e+00 : f32
    %14 = vector.broadcast %cst_8 : f32 to vector<5x1xf32>
    %15 = arith.maximumf %13, %14 : vector<5x1xf32>
    %16 = vector.broadcast %6 : vector<5x1xf32> to vector<5x128xf32>
    %17 = arith.subf %0, %16 : vector<5x128xf32>
    %cst_9 = arith.constant 9.99999974E-6 : f32
    %18 = vector.broadcast %cst_9 : f32 to vector<5x1xf32>
    %19 = arith.addf %15, %18 : vector<5x1xf32>
    %20 = math.rsqrt %19 : vector<5x1xf32>
    %21 = vector.broadcast %20 : vector<5x1xf32> to vector<5x128xf32>
    %22 = arith.mulf %17, %21 : vector<5x128xf32>
    %23 = vector.broadcast %1 : vector<5x1xf32> to vector<5x128xf32>
    %24 = arith.mulf %22, %23 : vector<5x128xf32>
    %25 = vector.broadcast %2 : vector<5x1xf32> to vector<5x128xf32>
    %26 = arith.addf %24, %25 : vector<5x128xf32>
    %cst_10 = arith.constant 0.000000e+00 : f32
    %27 = vector.broadcast %cst_10 : f32 to vector<5x128xf32>
    %28 = arith.maximumf %26, %27 : vector<5x128xf32>
    %cst_11 = arith.constant 0.000000e+00 : f32
    %29 = vector.broadcast %cst_11 : f32 to vector<16x128xf32>
    %c9_i32 = arith.constant 9 : i32
    %30 = tpu.dynamic_rotate %28 by %c9_i32 dim 1 : vector<5x128xf32>, i32 -> vector<5x128xf32>
    %c0_12 = arith.constant 0 : index
    %c0_13 = arith.constant 0 : index
    %c0_14 = arith.constant 0 : index
    %31 = vector.load %arg7[%c0_12, %c0_13, %c0_14] : memref<9x1x128xf32, #tpu.memory_space<vmem>>, vector<1x1x128xf32>
    %32 = vector.shape_cast %31 : vector<1x1x128xf32> to vector<1x128xf32>
    %33 = vector.broadcast %32 : vector<1x128xf32> to vector<5x128xf32>
    %34 = arith.mulf %30, %33 : vector<5x128xf32>
    %35 = arith.truncf %34 : vector<5x128xf32> to vector<5x128xbf16>
    %c0_15 = arith.constant 0 : index
    %c0_16 = arith.constant 0 : index
    %c0_17 = arith.constant 0 : index
    %36 = vector.load %arg1[%c0_15, %c0_16, %c0_17] : memref<9x16x5xbf16, #tpu.memory_space<vmem>>, vector<1x16x5xbf16>
    %37 = vector.shape_cast %36 : vector<1x16x5xbf16> to vector<16x5xbf16>
    %cst_18 = arith.constant dense<0.000000e+00> : vector<16x128xf32>
    %38 = tpu.matmul %37, %35, %cst_18 {dimension_numbers = #tpu.dot_dimension_numbers<[1], [0], [0], [1], [0, 0, 1, 1], [], []>} : vector<16x5xbf16>, vector<5x128xbf16>, vector<16x128xf32> -> vector<16x128xf32>
    %39 = arith.addf %29, %38 : vector<16x128xf32>
    %c8_i32 = arith.constant 8 : i32
    %40 = tpu.dynamic_rotate %28 by %c8_i32 dim 1 : vector<5x128xf32>, i32 -> vector<5x128xf32>
    %c1 = arith.constant 1 : index
    %c0_19 = arith.constant 0 : index
    %c0_20 = arith.constant 0 : index
    %41 = vector.load %arg7[%c1, %c0_19, %c0_20] : memref<9x1x128xf32, #tpu.memory_space<vmem>>, vector<1x1x128xf32>
    %42 = vector.shape_cast %41 : vector<1x1x128xf32> to vector<1x128xf32>
    %43 = vector.broadcast %42 : vector<1x128xf32> to vector<5x128xf32>
    %44 = arith.mulf %40, %43 : vector<5x128xf32>
    %45 = arith.truncf %44 : vector<5x128xf32> to vector<5x128xbf16>
    %c1_21 = arith.constant 1 : index
    %c0_22 = arith.constant 0 : index
    %c0_23 = arith.constant 0 : index
    %46 = vector.load %arg1[%c1_21, %c0_22, %c0_23] : memref<9x16x5xbf16, #tpu.memory_space<vmem>>, vector<1x16x5xbf16>
    %47 = vector.shape_cast %46 : vector<1x16x5xbf16> to vector<16x5xbf16>
    %cst_24 = arith.constant dense<0.000000e+00> : vector<16x128xf32>
    %48 = tpu.matmul %47, %45, %cst_24 {dimension_numbers = #tpu.dot_dimension_numbers<[1], [0], [0], [1], [0, 0, 1, 1], [], []>} : vector<16x5xbf16>, vector<5x128xbf16>, vector<16x128xf32> -> vector<16x128xf32>
    %49 = arith.addf %39, %48 : vector<16x128xf32>
    %c7_i32 = arith.constant 7 : i32
    %50 = tpu.dynamic_rotate %28 by %c7_i32 dim 1 : vector<5x128xf32>, i32 -> vector<5x128xf32>
    %c2 = arith.constant 2 : index
    %c0_25 = arith.constant 0 : index
    %c0_26 = arith.constant 0 : index
    %51 = vector.load %arg7[%c2, %c0_25, %c0_26] : memref<9x1x128xf32, #tpu.memory_space<vmem>>, vector<1x1x128xf32>
    %52 = vector.shape_cast %51 : vector<1x1x128xf32> to vector<1x128xf32>
    %53 = vector.broadcast %52 : vector<1x128xf32> to vector<5x128xf32>
    %54 = arith.mulf %50, %53 : vector<5x128xf32>
    %55 = arith.truncf %54 : vector<5x128xf32> to vector<5x128xbf16>
    %c2_27 = arith.constant 2 : index
    %c0_28 = arith.constant 0 : index
    %c0_29 = arith.constant 0 : index
    %56 = vector.load %arg1[%c2_27, %c0_28, %c0_29] : memref<9x16x5xbf16, #tpu.memory_space<vmem>>, vector<1x16x5xbf16>
    %57 = vector.shape_cast %56 : vector<1x16x5xbf16> to vector<16x5xbf16>
    %cst_30 = arith.constant dense<0.000000e+00> : vector<16x128xf32>
    %58 = tpu.matmul %57, %55, %cst_30 {dimension_numbers = #tpu.dot_dimension_numbers<[1], [0], [0], [1], [0, 0, 1, 1], [], []>} : vector<16x5xbf16>, vector<5x128xbf16>, vector<16x128xf32> -> vector<16x128xf32>
    %59 = arith.addf %49, %58 : vector<16x128xf32>
    %c1_i32 = arith.constant 1 : i32
    %60 = tpu.dynamic_rotate %28 by %c1_i32 dim 1 : vector<5x128xf32>, i32 -> vector<5x128xf32>
    %c3 = arith.constant 3 : index
    %c0_31 = arith.constant 0 : index
    %c0_32 = arith.constant 0 : index
    %61 = vector.load %arg7[%c3, %c0_31, %c0_32] : memref<9x1x128xf32, #tpu.memory_space<vmem>>, vector<1x1x128xf32>
    %62 = vector.shape_cast %61 : vector<1x1x128xf32> to vector<1x128xf32>
    %63 = vector.broadcast %62 : vector<1x128xf32> to vector<5x128xf32>
    %64 = arith.mulf %60, %63 : vector<5x128xf32>
    %65 = arith.truncf %64 : vector<5x128xf32> to vector<5x128xbf16>
    %c3_33 = arith.constant 3 : index
    %c0_34 = arith.constant 0 : index
    %c0_35 = arith.constant 0 : index
    %66 = vector.load %arg1[%c3_33, %c0_34, %c0_35] : memref<9x16x5xbf16, #tpu.memory_space<vmem>>, vector<1x16x5xbf16>
    %67 = vector.shape_cast %66 : vector<1x16x5xbf16> to vector<16x5xbf16>
    %cst_36 = arith.constant dense<0.000000e+00> : vector<16x128xf32>
    %68 = tpu.matmul %67, %65, %cst_36 {dimension_numbers = #tpu.dot_dimension_numbers<[1], [0], [0], [1], [0, 0, 1, 1], [], []>} : vector<16x5xbf16>, vector<5x128xbf16>, vector<16x128xf32> -> vector<16x128xf32>
    %69 = arith.addf %59, %68 : vector<16x128xf32>
    %c4 = arith.constant 4 : index
    %c0_37 = arith.constant 0 : index
    %c0_38 = arith.constant 0 : index
    %70 = vector.load %arg7[%c4, %c0_37, %c0_38] : memref<9x1x128xf32, #tpu.memory_space<vmem>>, vector<1x1x128xf32>
    %71 = vector.shape_cast %70 : vector<1x1x128xf32> to vector<1x128xf32>
    %72 = vector.broadcast %71 : vector<1x128xf32> to vector<5x128xf32>
    %73 = arith.mulf %28, %72 : vector<5x128xf32>
    %74 = arith.truncf %73 : vector<5x128xf32> to vector<5x128xbf16>
    %c4_39 = arith.constant 4 : index
    %c0_40 = arith.constant 0 : index
    %c0_41 = arith.constant 0 : index
    %75 = vector.load %arg1[%c4_39, %c0_40, %c0_41] : memref<9x16x5xbf16, #tpu.memory_space<vmem>>, vector<1x16x5xbf16>
    %76 = vector.shape_cast %75 : vector<1x16x5xbf16> to vector<16x5xbf16>
    %cst_42 = arith.constant dense<0.000000e+00> : vector<16x128xf32>
    %77 = tpu.matmul %76, %74, %cst_42 {dimension_numbers = #tpu.dot_dimension_numbers<[1], [0], [0], [1], [0, 0, 1, 1], [], []>} : vector<16x5xbf16>, vector<5x128xbf16>, vector<16x128xf32> -> vector<16x128xf32>
    %78 = arith.addf %69, %77 : vector<16x128xf32>
    %c127_i32 = arith.constant 127 : i32
    %79 = tpu.dynamic_rotate %28 by %c127_i32 dim 1 : vector<5x128xf32>, i32 -> vector<5x128xf32>
    %c5 = arith.constant 5 : index
    %c0_43 = arith.constant 0 : index
    %c0_44 = arith.constant 0 : index
    %80 = vector.load %arg7[%c5, %c0_43, %c0_44] : memref<9x1x128xf32, #tpu.memory_space<vmem>>, vector<1x1x128xf32>
    %81 = vector.shape_cast %80 : vector<1x1x128xf32> to vector<1x128xf32>
    %82 = vector.broadcast %81 : vector<1x128xf32> to vector<5x128xf32>
    %83 = arith.mulf %79, %82 : vector<5x128xf32>
    %84 = arith.truncf %83 : vector<5x128xf32> to vector<5x128xbf16>
    %c5_45 = arith.constant 5 : index
    %c0_46 = arith.constant 0 : index
    %c0_47 = arith.constant 0 : index
    %85 = vector.load %arg1[%c5_45, %c0_46, %c0_47] : memref<9x16x5xbf16, #tpu.memory_space<vmem>>, vector<1x16x5xbf16>
    %86 = vector.shape_cast %85 : vector<1x16x5xbf16> to vector<16x5xbf16>
    %cst_48 = arith.constant dense<0.000000e+00> : vector<16x128xf32>
    %87 = tpu.matmul %86, %84, %cst_48 {dimension_numbers = #tpu.dot_dimension_numbers<[1], [0], [0], [1], [0, 0, 1, 1], [], []>} : vector<16x5xbf16>, vector<5x128xbf16>, vector<16x128xf32> -> vector<16x128xf32>
    %88 = arith.addf %78, %87 : vector<16x128xf32>
    %c121_i32 = arith.constant 121 : i32
    %89 = tpu.dynamic_rotate %28 by %c121_i32 dim 1 : vector<5x128xf32>, i32 -> vector<5x128xf32>
    %c6 = arith.constant 6 : index
    %c0_49 = arith.constant 0 : index
    %c0_50 = arith.constant 0 : index
    %90 = vector.load %arg7[%c6, %c0_49, %c0_50] : memref<9x1x128xf32, #tpu.memory_space<vmem>>, vector<1x1x128xf32>
    %91 = vector.shape_cast %90 : vector<1x1x128xf32> to vector<1x128xf32>
    %92 = vector.broadcast %91 : vector<1x128xf32> to vector<5x128xf32>
    %93 = arith.mulf %89, %92 : vector<5x128xf32>
    %94 = arith.truncf %93 : vector<5x128xf32> to vector<5x128xbf16>
    %c6_51 = arith.constant 6 : index
    %c0_52 = arith.constant 0 : index
    %c0_53 = arith.constant 0 : index
    %95 = vector.load %arg1[%c6_51, %c0_52, %c0_53] : memref<9x16x5xbf16, #tpu.memory_space<vmem>>, vector<1x16x5xbf16>
    %96 = vector.shape_cast %95 : vector<1x16x5xbf16> to vector<16x5xbf16>
    %cst_54 = arith.constant dense<0.000000e+00> : vector<16x128xf32>
    %97 = tpu.matmul %96, %94, %cst_54 {dimension_numbers = #tpu.dot_dimension_numbers<[1], [0], [0], [1], [0, 0, 1, 1], [], []>} : vector<16x5xbf16>, vector<5x128xbf16>, vector<16x128xf32> -> vector<16x128xf32>
    %98 = arith.addf %88, %97 : vector<16x128xf32>
    %c120_i32 = arith.constant 120 : i32
    %99 = tpu.dynamic_rotate %28 by %c120_i32 dim 1 : vector<5x128xf32>, i32 -> vector<5x128xf32>
    %c7 = arith.constant 7 : index
    %c0_55 = arith.constant 0 : index
    %c0_56 = arith.constant 0 : index
    %100 = vector.load %arg7[%c7, %c0_55, %c0_56] : memref<9x1x128xf32, #tpu.memory_space<vmem>>, vector<1x1x128xf32>
    %101 = vector.shape_cast %100 : vector<1x1x128xf32> to vector<1x128xf32>
    %102 = vector.broadcast %101 : vector<1x128xf32> to vector<5x128xf32>
    %103 = arith.mulf %99, %102 : vector<5x128xf32>
    %104 = arith.truncf %103 : vector<5x128xf32> to vector<5x128xbf16>
    %c7_57 = arith.constant 7 : index
    %c0_58 = arith.constant 0 : index
    %c0_59 = arith.constant 0 : index
    %105 = vector.load %arg1[%c7_57, %c0_58, %c0_59] : memref<9x16x5xbf16, #tpu.memory_space<vmem>>, vector<1x16x5xbf16>
    %106 = vector.shape_cast %105 : vector<1x16x5xbf16> to vector<16x5xbf16>
    %cst_60 = arith.constant dense<0.000000e+00> : vector<16x128xf32>
    %107 = tpu.matmul %106, %104, %cst_60 {dimension_numbers = #tpu.dot_dimension_numbers<[1], [0], [0], [1], [0, 0, 1, 1], [], []>} : vector<16x5xbf16>, vector<5x128xbf16>, vector<16x128xf32> -> vector<16x128xf32>
    %108 = arith.addf %98, %107 : vector<16x128xf32>
    %c119_i32 = arith.constant 119 : i32
    %109 = tpu.dynamic_rotate %28 by %c119_i32 dim 1 : vector<5x128xf32>, i32 -> vector<5x128xf32>
    %c8 = arith.constant 8 : index
    %c0_61 = arith.constant 0 : index
    %c0_62 = arith.constant 0 : index
    %110 = vector.load %arg7[%c8, %c0_61, %c0_62] : memref<9x1x128xf32, #tpu.memory_space<vmem>>, vector<1x1x128xf32>
    %111 = vector.shape_cast %110 : vector<1x1x128xf32> to vector<1x128xf32>
    %112 = vector.broadcast %111 : vector<1x128xf32> to vector<5x128xf32>
    %113 = arith.mulf %109, %112 : vector<5x128xf32>
    %114 = arith.truncf %113 : vector<5x128xf32> to vector<5x128xbf16>
    %c8_63 = arith.constant 8 : index
    %c0_64 = arith.constant 0 : index
    %c0_65 = arith.constant 0 : index
    %115 = vector.load %arg1[%c8_63, %c0_64, %c0_65] : memref<9x16x5xbf16, #tpu.memory_space<vmem>>, vector<1x16x5xbf16>
    %116 = vector.shape_cast %115 : vector<1x16x5xbf16> to vector<16x5xbf16>
    %cst_66 = arith.constant dense<0.000000e+00> : vector<16x128xf32>
    %117 = tpu.matmul %116, %114, %cst_66 {dimension_numbers = #tpu.dot_dimension_numbers<[1], [0], [0], [1], [0, 0, 1, 1], [], []>} : vector<16x5xbf16>, vector<5x128xbf16>, vector<16x128xf32> -> vector<16x128xf32>
    %118 = arith.addf %108, %117 : vector<16x128xf32>
    %c0_67 = arith.constant 0 : index
    %c0_68 = arith.constant 0 : index
    %119 = vector.load %arg2[%c0_67, %c0_68] : memref<16x1xf32, #tpu.memory_space<vmem>>, vector<16x1xf32>
    %120 = vector.broadcast %119 : vector<16x1xf32> to vector<16x128xf32>
    %121 = arith.addf %118, %120 : vector<16x128xf32>
    %c0_69 = arith.constant 0 : index
    %c0_70 = arith.constant 0 : index
    %122 = vector.load %arg5[%c0_69, %c0_70] : memref<16x1xf32, #tpu.memory_space<vmem>>, vector<16x1xf32>
    %c0_71 = arith.constant 0 : index
    %c0_72 = arith.constant 0 : index
    %123 = vector.load %arg6[%c0_71, %c0_72] : memref<16x1xf32, #tpu.memory_space<vmem>>, vector<16x1xf32>
    %cst_73 = arith.constant dense<0.000000e+00> : vector<16xf32>
    %124 = vector.multi_reduction <add>, %121, %cst_73 [1] : vector<16x128xf32> to vector<16xf32>
    %125 = vector.shape_cast %124 : vector<16xf32> to vector<16x1xf32>
    %cst_74 = arith.constant 1.280000e+02 : f32
    %126 = vector.broadcast %cst_74 : f32 to vector<16x1xf32>
    %127 = arith.divf %125, %126 : vector<16x1xf32>
    %128 = arith.mulf %121, %121 : vector<16x128xf32>
    %cst_75 = arith.constant dense<0.000000e+00> : vector<16xf32>
    %129 = vector.multi_reduction <add>, %128, %cst_75 [1] : vector<16x128xf32> to vector<16xf32>
    %130 = vector.shape_cast %129 : vector<16xf32> to vector<16x1xf32>
    %cst_76 = arith.constant 1.280000e+02 : f32
    %131 = vector.broadcast %cst_76 : f32 to vector<16x1xf32>
    %132 = arith.divf %130, %131 : vector<16x1xf32>
    %133 = arith.mulf %127, %127 : vector<16x1xf32>
    %134 = arith.subf %132, %133 : vector<16x1xf32>
    %cst_77 = arith.constant 0.000000e+00 : f32
    %135 = vector.broadcast %cst_77 : f32 to vector<16x1xf32>
    %136 = arith.maximumf %134, %135 : vector<16x1xf32>
    %137 = vector.broadcast %127 : vector<16x1xf32> to vector<16x128xf32>
    %138 = arith.subf %121, %137 : vector<16x128xf32>
    %cst_78 = arith.constant 9.99999974E-6 : f32
    %139 = vector.broadcast %cst_78 : f32 to vector<16x1xf32>
    %140 = arith.addf %136, %139 : vector<16x1xf32>
    %141 = math.rsqrt %140 : vector<16x1xf32>
    %142 = vector.broadcast %141 : vector<16x1xf32> to vector<16x128xf32>
    %143 = arith.mulf %138, %142 : vector<16x128xf32>
    %144 = vector.broadcast %122 : vector<16x1xf32> to vector<16x128xf32>
    %145 = arith.mulf %143, %144 : vector<16x128xf32>
    %146 = vector.broadcast %123 : vector<16x1xf32> to vector<16x128xf32>
    %147 = arith.addf %145, %146 : vector<16x128xf32>
    %cst_79 = arith.constant 0.000000e+00 : f32
    %148 = vector.broadcast %cst_79 : f32 to vector<16x128xf32>
    %149 = arith.maximumf %147, %148 : vector<16x128xf32>
    %c0_80 = arith.constant 0 : index
    %c0_81 = arith.constant 0 : index
    %150 = vector.load %arg8[%c0_80, %c0_81] : memref<16x128xf32, #tpu.memory_space<vmem>>, vector<16x128xf32>
    tpu.vector_store %arg8[%c0_80, %c0_81], %149 {strides = array<i32>} : memref<16x128xf32, #tpu.memory_space<vmem>>, vector<16x128xf32>,
    return
  }
}

module attributes {stable_mosaic.version = 11 : i64} {
  func.func @_gblock_back_kernel(%arg0: memref<16x128xf32, #tpu.memory_space<vmem>>, %arg1: memref<5x128xf32, #tpu.memory_space<vmem>>, %arg2: memref<9x16x16xbf16, #tpu.memory_space<vmem>>, %arg3: memref<16x1xf32, #tpu.memory_space<vmem>>, %arg4: memref<16x5xbf16, #tpu.memory_space<vmem>>, %arg5: memref<16x1xf32, #tpu.memory_space<vmem>>, %arg6: memref<9x1x128xf32, #tpu.memory_space<vmem>>, %arg7: memref<16x128xf32, #tpu.memory_space<vmem>>) attributes {dimension_semantics = [], scalar_prefetch = 0 : i64, scratch_operands = 0 : i64, tpu.core_type = #tpu.core_type<tc>} {
    %c0 = arith.constant 0 : index
    %c0_0 = arith.constant 0 : index
    %0 = vector.load %arg4[%c0, %c0_0] : memref<16x5xbf16, #tpu.memory_space<vmem>>, vector<16x5xbf16>
    %c0_1 = arith.constant 0 : index
    %c0_2 = arith.constant 0 : index
    %1 = vector.load %arg1[%c0_1, %c0_2] : memref<5x128xf32, #tpu.memory_space<vmem>>, vector<5x128xf32>
    %2 = arith.truncf %1 : vector<5x128xf32> to vector<5x128xbf16>
    %cst = arith.constant dense<0.000000e+00> : vector<16x128xf32>
    %3 = tpu.matmul %0, %2, %cst {dimension_numbers = #tpu.dot_dimension_numbers<[1], [0], [0], [1], [0, 0, 1, 1], [], []>} : vector<16x5xbf16>, vector<5x128xbf16>, vector<16x128xf32> -> vector<16x128xf32>
    %c0_3 = arith.constant 0 : index
    %c0_4 = arith.constant 0 : index
    %4 = vector.load %arg5[%c0_3, %c0_4] : memref<16x1xf32, #tpu.memory_space<vmem>>, vector<16x1xf32>
    %5 = vector.broadcast %4 : vector<16x1xf32> to vector<16x128xf32>
    %6 = arith.addf %3, %5 : vector<16x128xf32>
    %c0_5 = arith.constant 0 : index
    %c0_6 = arith.constant 0 : index
    %7 = vector.load %arg0[%c0_5, %c0_6] : memref<16x128xf32, #tpu.memory_space<vmem>>, vector<16x128xf32>
    %cst_7 = arith.constant 0.000000e+00 : f32
    %8 = vector.broadcast %cst_7 : f32 to vector<16x128xf32>
    %c9_i32 = arith.constant 9 : i32
    %9 = tpu.dynamic_rotate %7 by %c9_i32 dim 1 : vector<16x128xf32>, i32 -> vector<16x128xf32>
    %c0_8 = arith.constant 0 : index
    %c0_9 = arith.constant 0 : index
    %c0_10 = arith.constant 0 : index
    %10 = vector.load %arg6[%c0_8, %c0_9, %c0_10] : memref<9x1x128xf32, #tpu.memory_space<vmem>>, vector<1x1x128xf32>
    %11 = vector.shape_cast %10 : vector<1x1x128xf32> to vector<1x128xf32>
    %12 = vector.broadcast %11 : vector<1x128xf32> to vector<16x128xf32>
    %13 = arith.mulf %9, %12 : vector<16x128xf32>
    %14 = arith.truncf %13 : vector<16x128xf32> to vector<16x128xbf16>
    %c0_11 = arith.constant 0 : index
    %c0_12 = arith.constant 0 : index
    %c0_13 = arith.constant 0 : index
    %15 = vector.load %arg2[%c0_11, %c0_12, %c0_13] : memref<9x16x16xbf16, #tpu.memory_space<vmem>>, vector<1x16x16xbf16>
    %16 = vector.shape_cast %15 : vector<1x16x16xbf16> to vector<16x16xbf16>
    %cst_14 = arith.constant dense<0.000000e+00> : vector<16x128xf32>
    %17 = tpu.matmul %16, %14, %cst_14 {dimension_numbers = #tpu.dot_dimension_numbers<[1], [0], [0], [1], [0, 0, 1, 1], [], []>} : vector<16x16xbf16>, vector<16x128xbf16>, vector<16x128xf32> -> vector<16x128xf32>
    %18 = arith.addf %8, %17 : vector<16x128xf32>
    %c8_i32 = arith.constant 8 : i32
    %19 = tpu.dynamic_rotate %7 by %c8_i32 dim 1 : vector<16x128xf32>, i32 -> vector<16x128xf32>
    %c1 = arith.constant 1 : index
    %c0_15 = arith.constant 0 : index
    %c0_16 = arith.constant 0 : index
    %20 = vector.load %arg6[%c1, %c0_15, %c0_16] : memref<9x1x128xf32, #tpu.memory_space<vmem>>, vector<1x1x128xf32>
    %21 = vector.shape_cast %20 : vector<1x1x128xf32> to vector<1x128xf32>
    %22 = vector.broadcast %21 : vector<1x128xf32> to vector<16x128xf32>
    %23 = arith.mulf %19, %22 : vector<16x128xf32>
    %24 = arith.truncf %23 : vector<16x128xf32> to vector<16x128xbf16>
    %c1_17 = arith.constant 1 : index
    %c0_18 = arith.constant 0 : index
    %c0_19 = arith.constant 0 : index
    %25 = vector.load %arg2[%c1_17, %c0_18, %c0_19] : memref<9x16x16xbf16, #tpu.memory_space<vmem>>, vector<1x16x16xbf16>
    %26 = vector.shape_cast %25 : vector<1x16x16xbf16> to vector<16x16xbf16>
    %cst_20 = arith.constant dense<0.000000e+00> : vector<16x128xf32>
    %27 = tpu.matmul %26, %24, %cst_20 {dimension_numbers = #tpu.dot_dimension_numbers<[1], [0], [0], [1], [0, 0, 1, 1], [], []>} : vector<16x16xbf16>, vector<16x128xbf16>, vector<16x128xf32> -> vector<16x128xf32>
    %28 = arith.addf %18, %27 : vector<16x128xf32>
    %c7_i32 = arith.constant 7 : i32
    %29 = tpu.dynamic_rotate %7 by %c7_i32 dim 1 : vector<16x128xf32>, i32 -> vector<16x128xf32>
    %c2 = arith.constant 2 : index
    %c0_21 = arith.constant 0 : index
    %c0_22 = arith.constant 0 : index
    %30 = vector.load %arg6[%c2, %c0_21, %c0_22] : memref<9x1x128xf32, #tpu.memory_space<vmem>>, vector<1x1x128xf32>
    %31 = vector.shape_cast %30 : vector<1x1x128xf32> to vector<1x128xf32>
    %32 = vector.broadcast %31 : vector<1x128xf32> to vector<16x128xf32>
    %33 = arith.mulf %29, %32 : vector<16x128xf32>
    %34 = arith.truncf %33 : vector<16x128xf32> to vector<16x128xbf16>
    %c2_23 = arith.constant 2 : index
    %c0_24 = arith.constant 0 : index
    %c0_25 = arith.constant 0 : index
    %35 = vector.load %arg2[%c2_23, %c0_24, %c0_25] : memref<9x16x16xbf16, #tpu.memory_space<vmem>>, vector<1x16x16xbf16>
    %36 = vector.shape_cast %35 : vector<1x16x16xbf16> to vector<16x16xbf16>
    %cst_26 = arith.constant dense<0.000000e+00> : vector<16x128xf32>
    %37 = tpu.matmul %36, %34, %cst_26 {dimension_numbers = #tpu.dot_dimension_numbers<[1], [0], [0], [1], [0, 0, 1, 1], [], []>} : vector<16x16xbf16>, vector<16x128xbf16>, vector<16x128xf32> -> vector<16x128xf32>
    %38 = arith.addf %28, %37 : vector<16x128xf32>
    %c1_i32 = arith.constant 1 : i32
    %39 = tpu.dynamic_rotate %7 by %c1_i32 dim 1 : vector<16x128xf32>, i32 -> vector<16x128xf32>
    %c3 = arith.constant 3 : index
    %c0_27 = arith.constant 0 : index
    %c0_28 = arith.constant 0 : index
    %40 = vector.load %arg6[%c3, %c0_27, %c0_28] : memref<9x1x128xf32, #tpu.memory_space<vmem>>, vector<1x1x128xf32>
    %41 = vector.shape_cast %40 : vector<1x1x128xf32> to vector<1x128xf32>
    %42 = vector.broadcast %41 : vector<1x128xf32> to vector<16x128xf32>
    %43 = arith.mulf %39, %42 : vector<16x128xf32>
    %44 = arith.truncf %43 : vector<16x128xf32> to vector<16x128xbf16>
    %c3_29 = arith.constant 3 : index
    %c0_30 = arith.constant 0 : index
    %c0_31 = arith.constant 0 : index
    %45 = vector.load %arg2[%c3_29, %c0_30, %c0_31] : memref<9x16x16xbf16, #tpu.memory_space<vmem>>, vector<1x16x16xbf16>
    %46 = vector.shape_cast %45 : vector<1x16x16xbf16> to vector<16x16xbf16>
    %cst_32 = arith.constant dense<0.000000e+00> : vector<16x128xf32>
    %47 = tpu.matmul %46, %44, %cst_32 {dimension_numbers = #tpu.dot_dimension_numbers<[1], [0], [0], [1], [0, 0, 1, 1], [], []>} : vector<16x16xbf16>, vector<16x128xbf16>, vector<16x128xf32> -> vector<16x128xf32>
    %48 = arith.addf %38, %47 : vector<16x128xf32>
    %c4 = arith.constant 4 : index
    %c0_33 = arith.constant 0 : index
    %c0_34 = arith.constant 0 : index
    %49 = vector.load %arg6[%c4, %c0_33, %c0_34] : memref<9x1x128xf32, #tpu.memory_space<vmem>>, vector<1x1x128xf32>
    %50 = vector.shape_cast %49 : vector<1x1x128xf32> to vector<1x128xf32>
    %51 = vector.broadcast %50 : vector<1x128xf32> to vector<16x128xf32>
    %52 = arith.mulf %7, %51 : vector<16x128xf32>
    %53 = arith.truncf %52 : vector<16x128xf32> to vector<16x128xbf16>
    %c4_35 = arith.constant 4 : index
    %c0_36 = arith.constant 0 : index
    %c0_37 = arith.constant 0 : index
    %54 = vector.load %arg2[%c4_35, %c0_36, %c0_37] : memref<9x16x16xbf16, #tpu.memory_space<vmem>>, vector<1x16x16xbf16>
    %55 = vector.shape_cast %54 : vector<1x16x16xbf16> to vector<16x16xbf16>
    %cst_38 = arith.constant dense<0.000000e+00> : vector<16x128xf32>
    %56 = tpu.matmul %55, %53, %cst_38 {dimension_numbers = #tpu.dot_dimension_numbers<[1], [0], [0], [1], [0, 0, 1, 1], [], []>} : vector<16x16xbf16>, vector<16x128xbf16>, vector<16x128xf32> -> vector<16x128xf32>
    %57 = arith.addf %48, %56 : vector<16x128xf32>
    %c127_i32 = arith.constant 127 : i32
    %58 = tpu.dynamic_rotate %7 by %c127_i32 dim 1 : vector<16x128xf32>, i32 -> vector<16x128xf32>
    %c5 = arith.constant 5 : index
    %c0_39 = arith.constant 0 : index
    %c0_40 = arith.constant 0 : index
    %59 = vector.load %arg6[%c5, %c0_39, %c0_40] : memref<9x1x128xf32, #tpu.memory_space<vmem>>, vector<1x1x128xf32>
    %60 = vector.shape_cast %59 : vector<1x1x128xf32> to vector<1x128xf32>
    %61 = vector.broadcast %60 : vector<1x128xf32> to vector<16x128xf32>
    %62 = arith.mulf %58, %61 : vector<16x128xf32>
    %63 = arith.truncf %62 : vector<16x128xf32> to vector<16x128xbf16>
    %c5_41 = arith.constant 5 : index
    %c0_42 = arith.constant 0 : index
    %c0_43 = arith.constant 0 : index
    %64 = vector.load %arg2[%c5_41, %c0_42, %c0_43] : memref<9x16x16xbf16, #tpu.memory_space<vmem>>, vector<1x16x16xbf16>
    %65 = vector.shape_cast %64 : vector<1x16x16xbf16> to vector<16x16xbf16>
    %cst_44 = arith.constant dense<0.000000e+00> : vector<16x128xf32>
    %66 = tpu.matmul %65, %63, %cst_44 {dimension_numbers = #tpu.dot_dimension_numbers<[1], [0], [0], [1], [0, 0, 1, 1], [], []>} : vector<16x16xbf16>, vector<16x128xbf16>, vector<16x128xf32> -> vector<16x128xf32>
    %67 = arith.addf %57, %66 : vector<16x128xf32>
    %c121_i32 = arith.constant 121 : i32
    %68 = tpu.dynamic_rotate %7 by %c121_i32 dim 1 : vector<16x128xf32>, i32 -> vector<16x128xf32>
    %c6 = arith.constant 6 : index
    %c0_45 = arith.constant 0 : index
    %c0_46 = arith.constant 0 : index
    %69 = vector.load %arg6[%c6, %c0_45, %c0_46] : memref<9x1x128xf32, #tpu.memory_space<vmem>>, vector<1x1x128xf32>
    %70 = vector.shape_cast %69 : vector<1x1x128xf32> to vector<1x128xf32>
    %71 = vector.broadcast %70 : vector<1x128xf32> to vector<16x128xf32>
    %72 = arith.mulf %68, %71 : vector<16x128xf32>
    %73 = arith.truncf %72 : vector<16x128xf32> to vector<16x128xbf16>
    %c6_47 = arith.constant 6 : index
    %c0_48 = arith.constant 0 : index
    %c0_49 = arith.constant 0 : index
    %74 = vector.load %arg2[%c6_47, %c0_48, %c0_49] : memref<9x16x16xbf16, #tpu.memory_space<vmem>>, vector<1x16x16xbf16>
    %75 = vector.shape_cast %74 : vector<1x16x16xbf16> to vector<16x16xbf16>
    %cst_50 = arith.constant dense<0.000000e+00> : vector<16x128xf32>
    %76 = tpu.matmul %75, %73, %cst_50 {dimension_numbers = #tpu.dot_dimension_numbers<[1], [0], [0], [1], [0, 0, 1, 1], [], []>} : vector<16x16xbf16>, vector<16x128xbf16>, vector<16x128xf32> -> vector<16x128xf32>
    %77 = arith.addf %67, %76 : vector<16x128xf32>
    %c120_i32 = arith.constant 120 : i32
    %78 = tpu.dynamic_rotate %7 by %c120_i32 dim 1 : vector<16x128xf32>, i32 -> vector<16x128xf32>
    %c7 = arith.constant 7 : index
    %c0_51 = arith.constant 0 : index
    %c0_52 = arith.constant 0 : index
    %79 = vector.load %arg6[%c7, %c0_51, %c0_52] : memref<9x1x128xf32, #tpu.memory_space<vmem>>, vector<1x1x128xf32>
    %80 = vector.shape_cast %79 : vector<1x1x128xf32> to vector<1x128xf32>
    %81 = vector.broadcast %80 : vector<1x128xf32> to vector<16x128xf32>
    %82 = arith.mulf %78, %81 : vector<16x128xf32>
    %83 = arith.truncf %82 : vector<16x128xf32> to vector<16x128xbf16>
    %c7_53 = arith.constant 7 : index
    %c0_54 = arith.constant 0 : index
    %c0_55 = arith.constant 0 : index
    %84 = vector.load %arg2[%c7_53, %c0_54, %c0_55] : memref<9x16x16xbf16, #tpu.memory_space<vmem>>, vector<1x16x16xbf16>
    %85 = vector.shape_cast %84 : vector<1x16x16xbf16> to vector<16x16xbf16>
    %cst_56 = arith.constant dense<0.000000e+00> : vector<16x128xf32>
    %86 = tpu.matmul %85, %83, %cst_56 {dimension_numbers = #tpu.dot_dimension_numbers<[1], [0], [0], [1], [0, 0, 1, 1], [], []>} : vector<16x16xbf16>, vector<16x128xbf16>, vector<16x128xf32> -> vector<16x128xf32>
    %87 = arith.addf %77, %86 : vector<16x128xf32>
    %c119_i32 = arith.constant 119 : i32
    %88 = tpu.dynamic_rotate %7 by %c119_i32 dim 1 : vector<16x128xf32>, i32 -> vector<16x128xf32>
    %c8 = arith.constant 8 : index
    %c0_57 = arith.constant 0 : index
    %c0_58 = arith.constant 0 : index
    %89 = vector.load %arg6[%c8, %c0_57, %c0_58] : memref<9x1x128xf32, #tpu.memory_space<vmem>>, vector<1x1x128xf32>
    %90 = vector.shape_cast %89 : vector<1x1x128xf32> to vector<1x128xf32>
    %91 = vector.broadcast %90 : vector<1x128xf32> to vector<16x128xf32>
    %92 = arith.mulf %88, %91 : vector<16x128xf32>
    %93 = arith.truncf %92 : vector<16x128xf32> to vector<16x128xbf16>
    %c8_59 = arith.constant 8 : index
    %c0_60 = arith.constant 0 : index
    %c0_61 = arith.constant 0 : index
    %94 = vector.load %arg2[%c8_59, %c0_60, %c0_61] : memref<9x16x16xbf16, #tpu.memory_space<vmem>>, vector<1x16x16xbf16>
    %95 = vector.shape_cast %94 : vector<1x16x16xbf16> to vector<16x16xbf16>
    %cst_62 = arith.constant dense<0.000000e+00> : vector<16x128xf32>
    %96 = tpu.matmul %95, %93, %cst_62 {dimension_numbers = #tpu.dot_dimension_numbers<[1], [0], [0], [1], [0, 0, 1, 1], [], []>} : vector<16x16xbf16>, vector<16x128xbf16>, vector<16x128xf32> -> vector<16x128xf32>
    %97 = arith.addf %87, %96 : vector<16x128xf32>
    %98 = arith.addf %6, %97 : vector<16x128xf32>
    %c0_63 = arith.constant 0 : index
    %c0_64 = arith.constant 0 : index
    %99 = vector.load %arg3[%c0_63, %c0_64] : memref<16x1xf32, #tpu.memory_space<vmem>>, vector<16x1xf32>
    %100 = vector.broadcast %99 : vector<16x1xf32> to vector<16x128xf32>
    %101 = arith.addf %98, %100 : vector<16x128xf32>
    %c0_65 = arith.constant 0 : index
    %c0_66 = arith.constant 0 : index
    %102 = vector.load %arg7[%c0_65, %c0_66] : memref<16x128xf32, #tpu.memory_space<vmem>>, vector<16x128xf32>
    tpu.vector_store %arg7[%c0_65, %c0_66], %101 {strides = array<i32>} : memref<16x128xf32, #tpu.memory_space<vmem>>, vector<16x128xf32>,
    return
  }
}

module attributes {stable_mosaic.version = 11 : i64} {
  func.func @_attn_core_kernel(%arg0: i32, %arg1: memref<1x64x2xf32, #tpu.memory_space<vmem>>, %arg2: memref<1x2x16xf32, #tpu.memory_space<vmem>>, %arg3: memref<1x8x16xf32, #tpu.memory_space<vmem>>, %arg4: memref<1x16x64xf32, #tpu.memory_space<vmem>>, %arg5: memref<16x8xbf16, #tpu.memory_space<vmem>>, %arg6: memref<1x1xf32, #tpu.memory_space<vmem>>, %arg7: memref<1x16x64xf32, #tpu.memory_space<vmem>>) attributes {dimension_semantics = [#tpu.dimension_semantics<parallel>], iteration_bounds = array<i64: 2>, scalar_prefetch = 0 : i64, scratch_operands = 0 : i64, tpu.core_type = #tpu.core_type<tc>, window_params = [{transform_indices = @transform_0, window_bounds = array<i64: 1, 64, 2>}, {transform_indices = @transform_1, window_bounds = array<i64: 1, 2, 16>}, {transform_indices = @transform_2, window_bounds = array<i64: 1, 8, 16>}, {transform_indices = @transform_3, window_bounds = array<i64: 1, 16, 64>}, {pipeline_mode = #tpu.pipeline_mode<synchronous>, transform_indices = @transform_4, window_bounds = array<i64: 16, 8>}, {pipeline_mode = #tpu.pipeline_mode<synchronous>, transform_indices = @transform_5, window_bounds = array<i64: 1, 1>}, {transform_indices = @transform_6, window_bounds = array<i64: 1, 16, 64>}]} {
    %c0 = arith.constant 0 : index
    %c0_0 = arith.constant 0 : index
    %c0_1 = arith.constant 0 : index
    %0 = vector.load %arg1[%c0, %c0_0, %c0_1] : memref<1x64x2xf32, #tpu.memory_space<vmem>>, vector<1x64x2xf32>
    %1 = vector.shape_cast %0 : vector<1x64x2xf32> to vector<64x2xf32>
    %2 = arith.truncf %1 : vector<64x2xf32> to vector<64x2xbf16>
    %c0_2 = arith.constant 0 : index
    %c0_3 = arith.constant 0 : index
    %c0_4 = arith.constant 0 : index
    %3 = vector.load %arg2[%c0_2, %c0_3, %c0_4] : memref<1x2x16xf32, #tpu.memory_space<vmem>>, vector<1x2x16xf32>
    %4 = vector.shape_cast %3 : vector<1x2x16xf32> to vector<2x16xf32>
    %5 = arith.truncf %4 : vector<2x16xf32> to vector<2x16xbf16>
    %cst = arith.constant dense<0.000000e+00> : vector<64x16xf32>
    %6 = tpu.matmul %2, %5, %cst {dimension_numbers = #tpu.dot_dimension_numbers<[1], [0], [0], [1], [0, 0, 1, 1], [], []>} : vector<64x2xbf16>, vector<2x16xbf16>, vector<64x16xf32> -> vector<64x16xf32>
    %cst_5 = arith.constant dense<0xFF800000> : vector<64xf32>
    %7 = vector.multi_reduction <maximumf>, %6, %cst_5 [1] : vector<64x16xf32> to vector<64xf32>
    %8 = vector.shape_cast %7 : vector<64xf32> to vector<64x1xf32>
    %9 = vector.broadcast %8 : vector<64x1xf32> to vector<64x16xf32>
    %10 = arith.subf %6, %9 : vector<64x16xf32>
    %11 = math.exp %10 : vector<64x16xf32>
    %cst_6 = arith.constant dense<0.000000e+00> : vector<64xf32>
    %12 = vector.multi_reduction <add>, %11, %cst_6 [1] : vector<64x16xf32> to vector<64xf32>
    %13 = vector.shape_cast %12 : vector<64xf32> to vector<64x1xf32>
    %14 = tpu.reciprocal %13 {approx = true} : vector<64x1xf32> -> vector<64x1xf32>
    %15 = vector.broadcast %14 : vector<64x1xf32> to vector<64x16xf32>
    %16 = arith.mulf %11, %15 : vector<64x16xf32>
    %c0_7 = arith.constant 0 : index
    %c0_8 = arith.constant 0 : index
    %c0_9 = arith.constant 0 : index
    %17 = vector.load %arg3[%c0_7, %c0_8, %c0_9] : memref<1x8x16xf32, #tpu.memory_space<vmem>>, vector<1x8x16xf32>
    %18 = vector.shape_cast %17 : vector<1x8x16xf32> to vector<8x16xf32>
    %19 = arith.truncf %18 : vector<8x16xf32> to vector<8x16xbf16>
    %20 = arith.truncf %16 : vector<64x16xf32> to vector<64x16xbf16>
    %cst_10 = arith.constant dense<0.000000e+00> : vector<8x64xf32>
    %21 = tpu.matmul %19, %20, %cst_10 {dimension_numbers = #tpu.dot_dimension_numbers<[1], [1], [0], [0], [0, 0, 1, 0], [], []>} : vector<8x16xbf16>, vector<64x16xbf16>, vector<8x64xf32> -> vector<8x64xf32>
    %c0_11 = arith.constant 0 : index
    %c0_12 = arith.constant 0 : index
    %22 = vector.load %arg5[%c0_11, %c0_12] : memref<16x8xbf16, #tpu.memory_space<vmem>>, vector<16x8xbf16>
    %23 = arith.truncf %21 : vector<8x64xf32> to vector<8x64xbf16>
    %cst_13 = arith.constant dense<0.000000e+00> : vector<16x64xf32>
    %24 = tpu.matmul %22, %23, %cst_13 {dimension_numbers = #tpu.dot_dimension_numbers<[1], [0], [0], [1], [0, 0, 1, 1], [], []>} : vector<16x8xbf16>, vector<8x64xbf16>, vector<16x64xf32> -> vector<16x64xf32>
    %c0_14 = arith.constant 0 : index
    %c0_15 = arith.constant 0 : index
    %25 = vector.load %arg6[%c0_14, %c0_15] : memref<1x1xf32, #tpu.memory_space<vmem>>, vector<1x1xf32>
    %26 = vector.broadcast %25 : vector<1x1xf32> to vector<16x64xf32>
    %27 = arith.mulf %26, %24 : vector<16x64xf32>
    %c0_16 = arith.constant 0 : index
    %c0_17 = arith.constant 0 : index
    %c0_18 = arith.constant 0 : index
    %28 = vector.load %arg4[%c0_16, %c0_17, %c0_18] : memref<1x16x64xf32, #tpu.memory_space<vmem>>, vector<1x16x64xf32>
    %29 = vector.shape_cast %28 : vector<1x16x64xf32> to vector<16x64xf32>
    %30 = arith.addf %27, %29 : vector<16x64xf32>
    %c0_19 = arith.constant 0 : index
    %c0_20 = arith.constant 0 : index
    %c0_21 = arith.constant 0 : index
    %31 = vector.load %arg7[%c0_19, %c0_20, %c0_21] : memref<1x16x64xf32, #tpu.memory_space<vmem>>, vector<1x16x64xf32>
    %32 = vector.shape_cast %31 : vector<1x16x64xf32> to vector<16x64xf32>
    %33 = vector.shape_cast %30 : vector<16x64xf32> to vector<1x16x64xf32>
    tpu.vector_store %arg7[%c0_19, %c0_20, %c0_21], %33 {strides = array<i32>} : memref<1x16x64xf32, #tpu.memory_space<vmem>>, vector<1x16x64xf32>,
    return
  }
  func.func @transform_0(%arg0: i32) -> (i32, i32, i32) {
    %c0_i32 = arith.constant 0 : i32
    %c0_i32_0 = arith.constant 0 : i32
    %c0_i32_1 = arith.constant 0 : i32
    return %arg0, %c0_i32, %c0_i32_0 : i32, i32, i32
  }
  func.func @transform_1(%arg0: i32) -> (i32, i32, i32) {
    %c0_i32 = arith.constant 0 : i32
    %c0_i32_0 = arith.constant 0 : i32
    %c0_i32_1 = arith.constant 0 : i32
    return %arg0, %c0_i32, %c0_i32_0 : i32, i32, i32
  }
  func.func @transform_2(%arg0: i32) -> (i32, i32, i32) {
    %c0_i32 = arith.constant 0 : i32
    %c0_i32_0 = arith.constant 0 : i32
    %c0_i32_1 = arith.constant 0 : i32
    return %arg0, %c0_i32, %c0_i32_0 : i32, i32, i32
  }
  func.func @transform_3(%arg0: i32) -> (i32, i32, i32) {
    %c0_i32 = arith.constant 0 : i32
    %c0_i32_0 = arith.constant 0 : i32
    %c0_i32_1 = arith.constant 0 : i32
    return %arg0, %c0_i32, %c0_i32_0 : i32, i32, i32
  }
  func.func @transform_4(%arg0: i32) -> (i32, i32) {
    %c0_i32 = arith.constant 0 : i32
    %c0_i32_0 = arith.constant 0 : i32
    %c0_i32_1 = arith.constant 0 : i32
    return %c0_i32, %c0_i32_0 : i32, i32
  }
  func.func @transform_5(%arg0: i32) -> (i32, i32) {
    %c0_i32 = arith.constant 0 : i32
    %c0_i32_0 = arith.constant 0 : i32
    %c0_i32_1 = arith.constant 0 : i32
    return %c0_i32, %c0_i32_0 : i32, i32
  }
  func.func @transform_6(%arg0: i32) -> (i32, i32, i32) {
    %c0_i32 = arith.constant 0 : i32
    %c0_i32_0 = arith.constant 0 : i32
    %c0_i32_1 = arith.constant 0 : i32
    return %arg0, %c0_i32, %c0_i32_0 : i32, i32, i32
  }
}

module attributes {stable_mosaic.version = 11 : i64} {
  func.func @_gblock_back_kernel(%arg0: memref<8x512xf32, #tpu.memory_space<vmem>>, %arg1: memref<20x512xf32, #tpu.memory_space<vmem>>, %arg2: memref<9x8x8xbf16, #tpu.memory_space<vmem>>, %arg3: memref<8x1xf32, #tpu.memory_space<vmem>>, %arg4: memref<8x20xbf16, #tpu.memory_space<vmem>>, %arg5: memref<8x1xf32, #tpu.memory_space<vmem>>, %arg6: memref<9x1x512xf32, #tpu.memory_space<vmem>>, %arg7: memref<8x512xf32, #tpu.memory_space<vmem>>) attributes {dimension_semantics = [], scalar_prefetch = 0 : i64, scratch_operands = 0 : i64, tpu.core_type = #tpu.core_type<tc>} {
    %c0 = arith.constant 0 : index
    %c0_0 = arith.constant 0 : index
    %0 = vector.load %arg4[%c0, %c0_0] : memref<8x20xbf16, #tpu.memory_space<vmem>>, vector<8x20xbf16>
    %c0_1 = arith.constant 0 : index
    %c0_2 = arith.constant 0 : index
    %1 = vector.load %arg1[%c0_1, %c0_2] : memref<20x512xf32, #tpu.memory_space<vmem>>, vector<20x512xf32>
    %2 = arith.truncf %1 : vector<20x512xf32> to vector<20x512xbf16>
    %cst = arith.constant dense<0.000000e+00> : vector<8x512xf32>
    %3 = tpu.matmul %0, %2, %cst {dimension_numbers = #tpu.dot_dimension_numbers<[1], [0], [0], [1], [0, 0, 1, 1], [], []>} : vector<8x20xbf16>, vector<20x512xbf16>, vector<8x512xf32> -> vector<8x512xf32>
    %c0_3 = arith.constant 0 : index
    %c0_4 = arith.constant 0 : index
    %4 = vector.load %arg5[%c0_3, %c0_4] : memref<8x1xf32, #tpu.memory_space<vmem>>, vector<8x1xf32>
    %5 = vector.broadcast %4 : vector<8x1xf32> to vector<8x512xf32>
    %6 = arith.addf %3, %5 : vector<8x512xf32>
    %c0_5 = arith.constant 0 : index
    %c0_6 = arith.constant 0 : index
    %7 = vector.load %arg0[%c0_5, %c0_6] : memref<8x512xf32, #tpu.memory_space<vmem>>, vector<8x512xf32>
    %cst_7 = arith.constant 0.000000e+00 : f32
    %8 = vector.broadcast %cst_7 : f32 to vector<8x512xf32>
    %c17_i32 = arith.constant 17 : i32
    %9 = tpu.dynamic_rotate %7 by %c17_i32 dim 1 : vector<8x512xf32>, i32 -> vector<8x512xf32>
    %c0_8 = arith.constant 0 : index
    %c0_9 = arith.constant 0 : index
    %c0_10 = arith.constant 0 : index
    %10 = vector.load %arg6[%c0_8, %c0_9, %c0_10] : memref<9x1x512xf32, #tpu.memory_space<vmem>>, vector<1x1x512xf32>
    %11 = vector.shape_cast %10 : vector<1x1x512xf32> to vector<1x512xf32>
    %12 = vector.broadcast %11 : vector<1x512xf32> to vector<8x512xf32>
    %13 = arith.mulf %9, %12 : vector<8x512xf32>
    %14 = arith.truncf %13 : vector<8x512xf32> to vector<8x512xbf16>
    %c0_11 = arith.constant 0 : index
    %c0_12 = arith.constant 0 : index
    %c0_13 = arith.constant 0 : index
    %15 = vector.load %arg2[%c0_11, %c0_12, %c0_13] : memref<9x8x8xbf16, #tpu.memory_space<vmem>>, vector<1x8x8xbf16>
    %16 = vector.shape_cast %15 : vector<1x8x8xbf16> to vector<8x8xbf16>
    %cst_14 = arith.constant dense<0.000000e+00> : vector<8x512xf32>
    %17 = tpu.matmul %16, %14, %cst_14 {dimension_numbers = #tpu.dot_dimension_numbers<[1], [0], [0], [1], [0, 0, 1, 1], [], []>} : vector<8x8xbf16>, vector<8x512xbf16>, vector<8x512xf32> -> vector<8x512xf32>
    %18 = arith.addf %8, %17 : vector<8x512xf32>
    %c16_i32 = arith.constant 16 : i32
    %19 = tpu.dynamic_rotate %7 by %c16_i32 dim 1 : vector<8x512xf32>, i32 -> vector<8x512xf32>
    %c1 = arith.constant 1 : index
    %c0_15 = arith.constant 0 : index
    %c0_16 = arith.constant 0 : index
    %20 = vector.load %arg6[%c1, %c0_15, %c0_16] : memref<9x1x512xf32, #tpu.memory_space<vmem>>, vector<1x1x512xf32>
    %21 = vector.shape_cast %20 : vector<1x1x512xf32> to vector<1x512xf32>
    %22 = vector.broadcast %21 : vector<1x512xf32> to vector<8x512xf32>
    %23 = arith.mulf %19, %22 : vector<8x512xf32>
    %24 = arith.truncf %23 : vector<8x512xf32> to vector<8x512xbf16>
    %c1_17 = arith.constant 1 : index
    %c0_18 = arith.constant 0 : index
    %c0_19 = arith.constant 0 : index
    %25 = vector.load %arg2[%c1_17, %c0_18, %c0_19] : memref<9x8x8xbf16, #tpu.memory_space<vmem>>, vector<1x8x8xbf16>
    %26 = vector.shape_cast %25 : vector<1x8x8xbf16> to vector<8x8xbf16>
    %cst_20 = arith.constant dense<0.000000e+00> : vector<8x512xf32>
    %27 = tpu.matmul %26, %24, %cst_20 {dimension_numbers = #tpu.dot_dimension_numbers<[1], [0], [0], [1], [0, 0, 1, 1], [], []>} : vector<8x8xbf16>, vector<8x512xbf16>, vector<8x512xf32> -> vector<8x512xf32>
    %28 = arith.addf %18, %27 : vector<8x512xf32>
    %c15_i32 = arith.constant 15 : i32
    %29 = tpu.dynamic_rotate %7 by %c15_i32 dim 1 : vector<8x512xf32>, i32 -> vector<8x512xf32>
    %c2 = arith.constant 2 : index
    %c0_21 = arith.constant 0 : index
    %c0_22 = arith.constant 0 : index
    %30 = vector.load %arg6[%c2, %c0_21, %c0_22] : memref<9x1x512xf32, #tpu.memory_space<vmem>>, vector<1x1x512xf32>
    %31 = vector.shape_cast %30 : vector<1x1x512xf32> to vector<1x512xf32>
    %32 = vector.broadcast %31 : vector<1x512xf32> to vector<8x512xf32>
    %33 = arith.mulf %29, %32 : vector<8x512xf32>
    %34 = arith.truncf %33 : vector<8x512xf32> to vector<8x512xbf16>
    %c2_23 = arith.constant 2 : index
    %c0_24 = arith.constant 0 : index
    %c0_25 = arith.constant 0 : index
    %35 = vector.load %arg2[%c2_23, %c0_24, %c0_25] : memref<9x8x8xbf16, #tpu.memory_space<vmem>>, vector<1x8x8xbf16>
    %36 = vector.shape_cast %35 : vector<1x8x8xbf16> to vector<8x8xbf16>
    %cst_26 = arith.constant dense<0.000000e+00> : vector<8x512xf32>
    %37 = tpu.matmul %36, %34, %cst_26 {dimension_numbers = #tpu.dot_dimension_numbers<[1], [0], [0], [1], [0, 0, 1, 1], [], []>} : vector<8x8xbf16>, vector<8x512xbf16>, vector<8x512xf32> -> vector<8x512xf32>
    %38 = arith.addf %28, %37 : vector<8x512xf32>
    %c1_i32 = arith.constant 1 : i32
    %39 = tpu.dynamic_rotate %7 by %c1_i32 dim 1 : vector<8x512xf32>, i32 -> vector<8x512xf32>
    %c3 = arith.constant 3 : index
    %c0_27 = arith.constant 0 : index
    %c0_28 = arith.constant 0 : index
    %40 = vector.load %arg6[%c3, %c0_27, %c0_28] : memref<9x1x512xf32, #tpu.memory_space<vmem>>, vector<1x1x512xf32>
    %41 = vector.shape_cast %40 : vector<1x1x512xf32> to vector<1x512xf32>
    %42 = vector.broadcast %41 : vector<1x512xf32> to vector<8x512xf32>
    %43 = arith.mulf %39, %42 : vector<8x512xf32>
    %44 = arith.truncf %43 : vector<8x512xf32> to vector<8x512xbf16>
    %c3_29 = arith.constant 3 : index
    %c0_30 = arith.constant 0 : index
    %c0_31 = arith.constant 0 : index
    %45 = vector.load %arg2[%c3_29, %c0_30, %c0_31] : memref<9x8x8xbf16, #tpu.memory_space<vmem>>, vector<1x8x8xbf16>
    %46 = vector.shape_cast %45 : vector<1x8x8xbf16> to vector<8x8xbf16>
    %cst_32 = arith.constant dense<0.000000e+00> : vector<8x512xf32>
    %47 = tpu.matmul %46, %44, %cst_32 {dimension_numbers = #tpu.dot_dimension_numbers<[1], [0], [0], [1], [0, 0, 1, 1], [], []>} : vector<8x8xbf16>, vector<8x512xbf16>, vector<8x512xf32> -> vector<8x512xf32>
    %48 = arith.addf %38, %47 : vector<8x512xf32>
    %c4 = arith.constant 4 : index
    %c0_33 = arith.constant 0 : index
    %c0_34 = arith.constant 0 : index
    %49 = vector.load %arg6[%c4, %c0_33, %c0_34] : memref<9x1x512xf32, #tpu.memory_space<vmem>>, vector<1x1x512xf32>
    %50 = vector.shape_cast %49 : vector<1x1x512xf32> to vector<1x512xf32>
    %51 = vector.broadcast %50 : vector<1x512xf32> to vector<8x512xf32>
    %52 = arith.mulf %7, %51 : vector<8x512xf32>
    %53 = arith.truncf %52 : vector<8x512xf32> to vector<8x512xbf16>
    %c4_35 = arith.constant 4 : index
    %c0_36 = arith.constant 0 : index
    %c0_37 = arith.constant 0 : index
    %54 = vector.load %arg2[%c4_35, %c0_36, %c0_37] : memref<9x8x8xbf16, #tpu.memory_space<vmem>>, vector<1x8x8xbf16>
    %55 = vector.shape_cast %54 : vector<1x8x8xbf16> to vector<8x8xbf16>
    %cst_38 = arith.constant dense<0.000000e+00> : vector<8x512xf32>
    %56 = tpu.matmul %55, %53, %cst_38 {dimension_numbers = #tpu.dot_dimension_numbers<[1], [0], [0], [1], [0, 0, 1, 1], [], []>} : vector<8x8xbf16>, vector<8x512xbf16>, vector<8x512xf32> -> vector<8x512xf32>
    %57 = arith.addf %48, %56 : vector<8x512xf32>
    %c511_i32 = arith.constant 511 : i32
    %58 = tpu.dynamic_rotate %7 by %c511_i32 dim 1 : vector<8x512xf32>, i32 -> vector<8x512xf32>
    %c5 = arith.constant 5 : index
    %c0_39 = arith.constant 0 : index
    %c0_40 = arith.constant 0 : index
    %59 = vector.load %arg6[%c5, %c0_39, %c0_40] : memref<9x1x512xf32, #tpu.memory_space<vmem>>, vector<1x1x512xf32>
    %60 = vector.shape_cast %59 : vector<1x1x512xf32> to vector<1x512xf32>
    %61 = vector.broadcast %60 : vector<1x512xf32> to vector<8x512xf32>
    %62 = arith.mulf %58, %61 : vector<8x512xf32>
    %63 = arith.truncf %62 : vector<8x512xf32> to vector<8x512xbf16>
    %c5_41 = arith.constant 5 : index
    %c0_42 = arith.constant 0 : index
    %c0_43 = arith.constant 0 : index
    %64 = vector.load %arg2[%c5_41, %c0_42, %c0_43] : memref<9x8x8xbf16, #tpu.memory_space<vmem>>, vector<1x8x8xbf16>
    %65 = vector.shape_cast %64 : vector<1x8x8xbf16> to vector<8x8xbf16>
    %cst_44 = arith.constant dense<0.000000e+00> : vector<8x512xf32>
    %66 = tpu.matmul %65, %63, %cst_44 {dimension_numbers = #tpu.dot_dimension_numbers<[1], [0], [0], [1], [0, 0, 1, 1], [], []>} : vector<8x8xbf16>, vector<8x512xbf16>, vector<8x512xf32> -> vector<8x512xf32>
    %67 = arith.addf %57, %66 : vector<8x512xf32>
    %c497_i32 = arith.constant 497 : i32
    %68 = tpu.dynamic_rotate %7 by %c497_i32 dim 1 : vector<8x512xf32>, i32 -> vector<8x512xf32>
    %c6 = arith.constant 6 : index
    %c0_45 = arith.constant 0 : index
    %c0_46 = arith.constant 0 : index
    %69 = vector.load %arg6[%c6, %c0_45, %c0_46] : memref<9x1x512xf32, #tpu.memory_space<vmem>>, vector<1x1x512xf32>
    %70 = vector.shape_cast %69 : vector<1x1x512xf32> to vector<1x512xf32>
    %71 = vector.broadcast %70 : vector<1x512xf32> to vector<8x512xf32>
    %72 = arith.mulf %68, %71 : vector<8x512xf32>
    %73 = arith.truncf %72 : vector<8x512xf32> to vector<8x512xbf16>
    %c6_47 = arith.constant 6 : index
    %c0_48 = arith.constant 0 : index
    %c0_49 = arith.constant 0 : index
    %74 = vector.load %arg2[%c6_47, %c0_48, %c0_49] : memref<9x8x8xbf16, #tpu.memory_space<vmem>>, vector<1x8x8xbf16>
    %75 = vector.shape_cast %74 : vector<1x8x8xbf16> to vector<8x8xbf16>
    %cst_50 = arith.constant dense<0.000000e+00> : vector<8x512xf32>
    %76 = tpu.matmul %75, %73, %cst_50 {dimension_numbers = #tpu.dot_dimension_numbers<[1], [0], [0], [1], [0, 0, 1, 1], [], []>} : vector<8x8xbf16>, vector<8x512xbf16>, vector<8x512xf32> -> vector<8x512xf32>
    %77 = arith.addf %67, %76 : vector<8x512xf32>
    %c496_i32 = arith.constant 496 : i32
    %78 = tpu.dynamic_rotate %7 by %c496_i32 dim 1 : vector<8x512xf32>, i32 -> vector<8x512xf32>
    %c7 = arith.constant 7 : index
    %c0_51 = arith.constant 0 : index
    %c0_52 = arith.constant 0 : index
    %79 = vector.load %arg6[%c7, %c0_51, %c0_52] : memref<9x1x512xf32, #tpu.memory_space<vmem>>, vector<1x1x512xf32>
    %80 = vector.shape_cast %79 : vector<1x1x512xf32> to vector<1x512xf32>
    %81 = vector.broadcast %80 : vector<1x512xf32> to vector<8x512xf32>
    %82 = arith.mulf %78, %81 : vector<8x512xf32>
    %83 = arith.truncf %82 : vector<8x512xf32> to vector<8x512xbf16>
    %c7_53 = arith.constant 7 : index
    %c0_54 = arith.constant 0 : index
    %c0_55 = arith.constant 0 : index
    %84 = vector.load %arg2[%c7_53, %c0_54, %c0_55] : memref<9x8x8xbf16, #tpu.memory_space<vmem>>, vector<1x8x8xbf16>
    %85 = vector.shape_cast %84 : vector<1x8x8xbf16> to vector<8x8xbf16>
    %cst_56 = arith.constant dense<0.000000e+00> : vector<8x512xf32>
    %86 = tpu.matmul %85, %83, %cst_56 {dimension_numbers = #tpu.dot_dimension_numbers<[1], [0], [0], [1], [0, 0, 1, 1], [], []>} : vector<8x8xbf16>, vector<8x512xbf16>, vector<8x512xf32> -> vector<8x512xf32>
    %87 = arith.addf %77, %86 : vector<8x512xf32>
    %c495_i32 = arith.constant 495 : i32
    %88 = tpu.dynamic_rotate %7 by %c495_i32 dim 1 : vector<8x512xf32>, i32 -> vector<8x512xf32>
    %c8 = arith.constant 8 : index
    %c0_57 = arith.constant 0 : index
    %c0_58 = arith.constant 0 : index
    %89 = vector.load %arg6[%c8, %c0_57, %c0_58] : memref<9x1x512xf32, #tpu.memory_space<vmem>>, vector<1x1x512xf32>
    %90 = vector.shape_cast %89 : vector<1x1x512xf32> to vector<1x512xf32>
    %91 = vector.broadcast %90 : vector<1x512xf32> to vector<8x512xf32>
    %92 = arith.mulf %88, %91 : vector<8x512xf32>
    %93 = arith.truncf %92 : vector<8x512xf32> to vector<8x512xbf16>
    %c8_59 = arith.constant 8 : index
    %c0_60 = arith.constant 0 : index
    %c0_61 = arith.constant 0 : index
    %94 = vector.load %arg2[%c8_59, %c0_60, %c0_61] : memref<9x8x8xbf16, #tpu.memory_space<vmem>>, vector<1x8x8xbf16>
    %95 = vector.shape_cast %94 : vector<1x8x8xbf16> to vector<8x8xbf16>
    %cst_62 = arith.constant dense<0.000000e+00> : vector<8x512xf32>
    %96 = tpu.matmul %95, %93, %cst_62 {dimension_numbers = #tpu.dot_dimension_numbers<[1], [0], [0], [1], [0, 0, 1, 1], [], []>} : vector<8x8xbf16>, vector<8x512xbf16>, vector<8x512xf32> -> vector<8x512xf32>
    %97 = arith.addf %87, %96 : vector<8x512xf32>
    %98 = arith.addf %6, %97 : vector<8x512xf32>
    %c0_63 = arith.constant 0 : index
    %c0_64 = arith.constant 0 : index
    %99 = vector.load %arg3[%c0_63, %c0_64] : memref<8x1xf32, #tpu.memory_space<vmem>>, vector<8x1xf32>
    %100 = vector.broadcast %99 : vector<8x1xf32> to vector<8x512xf32>
    %101 = arith.addf %98, %100 : vector<8x512xf32>
    %c0_65 = arith.constant 0 : index
    %c0_66 = arith.constant 0 : index
    %102 = vector.load %arg7[%c0_65, %c0_66] : memref<8x512xf32, #tpu.memory_space<vmem>>, vector<8x512xf32>
    tpu.vector_store %arg7[%c0_65, %c0_66], %101 {strides = array<i32>} : memref<8x512xf32, #tpu.memory_space<vmem>>, vector<8x512xf32>,
    return
  }
}

module attributes {stable_mosaic.version = 11 : i64} {
  func.func @_gblock_front_kernel(%arg0: memref<20x512xf32, #tpu.memory_space<vmem>>, %arg1: memref<9x8x20xbf16, #tpu.memory_space<vmem>>, %arg2: memref<8x1xf32, #tpu.memory_space<vmem>>, %arg3: memref<20x1xf32, #tpu.memory_space<vmem>>, %arg4: memref<20x1xf32, #tpu.memory_space<vmem>>, %arg5: memref<8x1xf32, #tpu.memory_space<vmem>>, %arg6: memref<8x1xf32, #tpu.memory_space<vmem>>, %arg7: memref<9x1x512xf32, #tpu.memory_space<vmem>>, %arg8: memref<8x512xf32, #tpu.memory_space<vmem>>) attributes {dimension_semantics = [], scalar_prefetch = 0 : i64, scratch_operands = 0 : i64, tpu.core_type = #tpu.core_type<tc>} {
    %c0 = arith.constant 0 : index
    %c0_0 = arith.constant 0 : index
    %0 = vector.load %arg0[%c0, %c0_0] : memref<20x512xf32, #tpu.memory_space<vmem>>, vector<20x512xf32>
    %c0_1 = arith.constant 0 : index
    %c0_2 = arith.constant 0 : index
    %1 = vector.load %arg3[%c0_1, %c0_2] : memref<20x1xf32, #tpu.memory_space<vmem>>, vector<20x1xf32>
    %c0_3 = arith.constant 0 : index
    %c0_4 = arith.constant 0 : index
    %2 = vector.load %arg4[%c0_3, %c0_4] : memref<20x1xf32, #tpu.memory_space<vmem>>, vector<20x1xf32>
    %cst = arith.constant dense<0.000000e+00> : vector<20xf32>
    %3 = vector.multi_reduction <add>, %0, %cst [1] : vector<20x512xf32> to vector<20xf32>
    %4 = vector.shape_cast %3 : vector<20xf32> to vector<20x1xf32>
    %cst_5 = arith.constant 5.120000e+02 : f32
    %5 = vector.broadcast %cst_5 : f32 to vector<20x1xf32>
    %6 = arith.divf %4, %5 : vector<20x1xf32>
    %7 = arith.mulf %0, %0 : vector<20x512xf32>
    %cst_6 = arith.constant dense<0.000000e+00> : vector<20xf32>
    %8 = vector.multi_reduction <add>, %7, %cst_6 [1] : vector<20x512xf32> to vector<20xf32>
    %9 = vector.shape_cast %8 : vector<20xf32> to vector<20x1xf32>
    %cst_7 = arith.constant 5.120000e+02 : f32
    %10 = vector.broadcast %cst_7 : f32 to vector<20x1xf32>
    %11 = arith.divf %9, %10 : vector<20x1xf32>
    %12 = arith.mulf %6, %6 : vector<20x1xf32>
    %13 = arith.subf %11, %12 : vector<20x1xf32>
    %cst_8 = arith.constant 0.000000e+00 : f32
    %14 = vector.broadcast %cst_8 : f32 to vector<20x1xf32>
    %15 = arith.maximumf %13, %14 : vector<20x1xf32>
    %16 = vector.broadcast %6 : vector<20x1xf32> to vector<20x512xf32>
    %17 = arith.subf %0, %16 : vector<20x512xf32>
    %cst_9 = arith.constant 9.99999974E-6 : f32
    %18 = vector.broadcast %cst_9 : f32 to vector<20x1xf32>
    %19 = arith.addf %15, %18 : vector<20x1xf32>
    %20 = math.rsqrt %19 : vector<20x1xf32>
    %21 = vector.broadcast %20 : vector<20x1xf32> to vector<20x512xf32>
    %22 = arith.mulf %17, %21 : vector<20x512xf32>
    %23 = vector.broadcast %1 : vector<20x1xf32> to vector<20x512xf32>
    %24 = arith.mulf %22, %23 : vector<20x512xf32>
    %25 = vector.broadcast %2 : vector<20x1xf32> to vector<20x512xf32>
    %26 = arith.addf %24, %25 : vector<20x512xf32>
    %cst_10 = arith.constant 0.000000e+00 : f32
    %27 = vector.broadcast %cst_10 : f32 to vector<20x512xf32>
    %28 = arith.maximumf %26, %27 : vector<20x512xf32>
    %cst_11 = arith.constant 0.000000e+00 : f32
    %29 = vector.broadcast %cst_11 : f32 to vector<8x512xf32>
    %c17_i32 = arith.constant 17 : i32
    %30 = tpu.dynamic_rotate %28 by %c17_i32 dim 1 : vector<20x512xf32>, i32 -> vector<20x512xf32>
    %c0_12 = arith.constant 0 : index
    %c0_13 = arith.constant 0 : index
    %c0_14 = arith.constant 0 : index
    %31 = vector.load %arg7[%c0_12, %c0_13, %c0_14] : memref<9x1x512xf32, #tpu.memory_space<vmem>>, vector<1x1x512xf32>
    %32 = vector.shape_cast %31 : vector<1x1x512xf32> to vector<1x512xf32>
    %33 = vector.broadcast %32 : vector<1x512xf32> to vector<20x512xf32>
    %34 = arith.mulf %30, %33 : vector<20x512xf32>
    %35 = arith.truncf %34 : vector<20x512xf32> to vector<20x512xbf16>
    %c0_15 = arith.constant 0 : index
    %c0_16 = arith.constant 0 : index
    %c0_17 = arith.constant 0 : index
    %36 = vector.load %arg1[%c0_15, %c0_16, %c0_17] : memref<9x8x20xbf16, #tpu.memory_space<vmem>>, vector<1x8x20xbf16>
    %37 = vector.shape_cast %36 : vector<1x8x20xbf16> to vector<8x20xbf16>
    %cst_18 = arith.constant dense<0.000000e+00> : vector<8x512xf32>
    %38 = tpu.matmul %37, %35, %cst_18 {dimension_numbers = #tpu.dot_dimension_numbers<[1], [0], [0], [1], [0, 0, 1, 1], [], []>} : vector<8x20xbf16>, vector<20x512xbf16>, vector<8x512xf32> -> vector<8x512xf32>
    %39 = arith.addf %29, %38 : vector<8x512xf32>
    %c16_i32 = arith.constant 16 : i32
    %40 = tpu.dynamic_rotate %28 by %c16_i32 dim 1 : vector<20x512xf32>, i32 -> vector<20x512xf32>
    %c1 = arith.constant 1 : index
    %c0_19 = arith.constant 0 : index
    %c0_20 = arith.constant 0 : index
    %41 = vector.load %arg7[%c1, %c0_19, %c0_20] : memref<9x1x512xf32, #tpu.memory_space<vmem>>, vector<1x1x512xf32>
    %42 = vector.shape_cast %41 : vector<1x1x512xf32> to vector<1x512xf32>
    %43 = vector.broadcast %42 : vector<1x512xf32> to vector<20x512xf32>
    %44 = arith.mulf %40, %43 : vector<20x512xf32>
    %45 = arith.truncf %44 : vector<20x512xf32> to vector<20x512xbf16>
    %c1_21 = arith.constant 1 : index
    %c0_22 = arith.constant 0 : index
    %c0_23 = arith.constant 0 : index
    %46 = vector.load %arg1[%c1_21, %c0_22, %c0_23] : memref<9x8x20xbf16, #tpu.memory_space<vmem>>, vector<1x8x20xbf16>
    %47 = vector.shape_cast %46 : vector<1x8x20xbf16> to vector<8x20xbf16>
    %cst_24 = arith.constant dense<0.000000e+00> : vector<8x512xf32>
    %48 = tpu.matmul %47, %45, %cst_24 {dimension_numbers = #tpu.dot_dimension_numbers<[1], [0], [0], [1], [0, 0, 1, 1], [], []>} : vector<8x20xbf16>, vector<20x512xbf16>, vector<8x512xf32> -> vector<8x512xf32>
    %49 = arith.addf %39, %48 : vector<8x512xf32>
    %c15_i32 = arith.constant 15 : i32
    %50 = tpu.dynamic_rotate %28 by %c15_i32 dim 1 : vector<20x512xf32>, i32 -> vector<20x512xf32>
    %c2 = arith.constant 2 : index
    %c0_25 = arith.constant 0 : index
    %c0_26 = arith.constant 0 : index
    %51 = vector.load %arg7[%c2, %c0_25, %c0_26] : memref<9x1x512xf32, #tpu.memory_space<vmem>>, vector<1x1x512xf32>
    %52 = vector.shape_cast %51 : vector<1x1x512xf32> to vector<1x512xf32>
    %53 = vector.broadcast %52 : vector<1x512xf32> to vector<20x512xf32>
    %54 = arith.mulf %50, %53 : vector<20x512xf32>
    %55 = arith.truncf %54 : vector<20x512xf32> to vector<20x512xbf16>
    %c2_27 = arith.constant 2 : index
    %c0_28 = arith.constant 0 : index
    %c0_29 = arith.constant 0 : index
    %56 = vector.load %arg1[%c2_27, %c0_28, %c0_29] : memref<9x8x20xbf16, #tpu.memory_space<vmem>>, vector<1x8x20xbf16>
    %57 = vector.shape_cast %56 : vector<1x8x20xbf16> to vector<8x20xbf16>
    %cst_30 = arith.constant dense<0.000000e+00> : vector<8x512xf32>
    %58 = tpu.matmul %57, %55, %cst_30 {dimension_numbers = #tpu.dot_dimension_numbers<[1], [0], [0], [1], [0, 0, 1, 1], [], []>} : vector<8x20xbf16>, vector<20x512xbf16>, vector<8x512xf32> -> vector<8x512xf32>
    %59 = arith.addf %49, %58 : vector<8x512xf32>
    %c1_i32 = arith.constant 1 : i32
    %60 = tpu.dynamic_rotate %28 by %c1_i32 dim 1 : vector<20x512xf32>, i32 -> vector<20x512xf32>
    %c3 = arith.constant 3 : index
    %c0_31 = arith.constant 0 : index
    %c0_32 = arith.constant 0 : index
    %61 = vector.load %arg7[%c3, %c0_31, %c0_32] : memref<9x1x512xf32, #tpu.memory_space<vmem>>, vector<1x1x512xf32>
    %62 = vector.shape_cast %61 : vector<1x1x512xf32> to vector<1x512xf32>
    %63 = vector.broadcast %62 : vector<1x512xf32> to vector<20x512xf32>
    %64 = arith.mulf %60, %63 : vector<20x512xf32>
    %65 = arith.truncf %64 : vector<20x512xf32> to vector<20x512xbf16>
    %c3_33 = arith.constant 3 : index
    %c0_34 = arith.constant 0 : index
    %c0_35 = arith.constant 0 : index
    %66 = vector.load %arg1[%c3_33, %c0_34, %c0_35] : memref<9x8x20xbf16, #tpu.memory_space<vmem>>, vector<1x8x20xbf16>
    %67 = vector.shape_cast %66 : vector<1x8x20xbf16> to vector<8x20xbf16>
    %cst_36 = arith.constant dense<0.000000e+00> : vector<8x512xf32>
    %68 = tpu.matmul %67, %65, %cst_36 {dimension_numbers = #tpu.dot_dimension_numbers<[1], [0], [0], [1], [0, 0, 1, 1], [], []>} : vector<8x20xbf16>, vector<20x512xbf16>, vector<8x512xf32> -> vector<8x512xf32>
    %69 = arith.addf %59, %68 : vector<8x512xf32>
    %c4 = arith.constant 4 : index
    %c0_37 = arith.constant 0 : index
    %c0_38 = arith.constant 0 : index
    %70 = vector.load %arg7[%c4, %c0_37, %c0_38] : memref<9x1x512xf32, #tpu.memory_space<vmem>>, vector<1x1x512xf32>
    %71 = vector.shape_cast %70 : vector<1x1x512xf32> to vector<1x512xf32>
    %72 = vector.broadcast %71 : vector<1x512xf32> to vector<20x512xf32>
    %73 = arith.mulf %28, %72 : vector<20x512xf32>
    %74 = arith.truncf %73 : vector<20x512xf32> to vector<20x512xbf16>
    %c4_39 = arith.constant 4 : index
    %c0_40 = arith.constant 0 : index
    %c0_41 = arith.constant 0 : index
    %75 = vector.load %arg1[%c4_39, %c0_40, %c0_41] : memref<9x8x20xbf16, #tpu.memory_space<vmem>>, vector<1x8x20xbf16>
    %76 = vector.shape_cast %75 : vector<1x8x20xbf16> to vector<8x20xbf16>
    %cst_42 = arith.constant dense<0.000000e+00> : vector<8x512xf32>
    %77 = tpu.matmul %76, %74, %cst_42 {dimension_numbers = #tpu.dot_dimension_numbers<[1], [0], [0], [1], [0, 0, 1, 1], [], []>} : vector<8x20xbf16>, vector<20x512xbf16>, vector<8x512xf32> -> vector<8x512xf32>
    %78 = arith.addf %69, %77 : vector<8x512xf32>
    %c511_i32 = arith.constant 511 : i32
    %79 = tpu.dynamic_rotate %28 by %c511_i32 dim 1 : vector<20x512xf32>, i32 -> vector<20x512xf32>
    %c5 = arith.constant 5 : index
    %c0_43 = arith.constant 0 : index
    %c0_44 = arith.constant 0 : index
    %80 = vector.load %arg7[%c5, %c0_43, %c0_44] : memref<9x1x512xf32, #tpu.memory_space<vmem>>, vector<1x1x512xf32>
    %81 = vector.shape_cast %80 : vector<1x1x512xf32> to vector<1x512xf32>
    %82 = vector.broadcast %81 : vector<1x512xf32> to vector<20x512xf32>
    %83 = arith.mulf %79, %82 : vector<20x512xf32>
    %84 = arith.truncf %83 : vector<20x512xf32> to vector<20x512xbf16>
    %c5_45 = arith.constant 5 : index
    %c0_46 = arith.constant 0 : index
    %c0_47 = arith.constant 0 : index
    %85 = vector.load %arg1[%c5_45, %c0_46, %c0_47] : memref<9x8x20xbf16, #tpu.memory_space<vmem>>, vector<1x8x20xbf16>
    %86 = vector.shape_cast %85 : vector<1x8x20xbf16> to vector<8x20xbf16>
    %cst_48 = arith.constant dense<0.000000e+00> : vector<8x512xf32>
    %87 = tpu.matmul %86, %84, %cst_48 {dimension_numbers = #tpu.dot_dimension_numbers<[1], [0], [0], [1], [0, 0, 1, 1], [], []>} : vector<8x20xbf16>, vector<20x512xbf16>, vector<8x512xf32> -> vector<8x512xf32>
    %88 = arith.addf %78, %87 : vector<8x512xf32>
    %c497_i32 = arith.constant 497 : i32
    %89 = tpu.dynamic_rotate %28 by %c497_i32 dim 1 : vector<20x512xf32>, i32 -> vector<20x512xf32>
    %c6 = arith.constant 6 : index
    %c0_49 = arith.constant 0 : index
    %c0_50 = arith.constant 0 : index
    %90 = vector.load %arg7[%c6, %c0_49, %c0_50] : memref<9x1x512xf32, #tpu.memory_space<vmem>>, vector<1x1x512xf32>
    %91 = vector.shape_cast %90 : vector<1x1x512xf32> to vector<1x512xf32>
    %92 = vector.broadcast %91 : vector<1x512xf32> to vector<20x512xf32>
    %93 = arith.mulf %89, %92 : vector<20x512xf32>
    %94 = arith.truncf %93 : vector<20x512xf32> to vector<20x512xbf16>
    %c6_51 = arith.constant 6 : index
    %c0_52 = arith.constant 0 : index
    %c0_53 = arith.constant 0 : index
    %95 = vector.load %arg1[%c6_51, %c0_52, %c0_53] : memref<9x8x20xbf16, #tpu.memory_space<vmem>>, vector<1x8x20xbf16>
    %96 = vector.shape_cast %95 : vector<1x8x20xbf16> to vector<8x20xbf16>
    %cst_54 = arith.constant dense<0.000000e+00> : vector<8x512xf32>
    %97 = tpu.matmul %96, %94, %cst_54 {dimension_numbers = #tpu.dot_dimension_numbers<[1], [0], [0], [1], [0, 0, 1, 1], [], []>} : vector<8x20xbf16>, vector<20x512xbf16>, vector<8x512xf32> -> vector<8x512xf32>
    %98 = arith.addf %88, %97 : vector<8x512xf32>
    %c496_i32 = arith.constant 496 : i32
    %99 = tpu.dynamic_rotate %28 by %c496_i32 dim 1 : vector<20x512xf32>, i32 -> vector<20x512xf32>
    %c7 = arith.constant 7 : index
    %c0_55 = arith.constant 0 : index
    %c0_56 = arith.constant 0 : index
    %100 = vector.load %arg7[%c7, %c0_55, %c0_56] : memref<9x1x512xf32, #tpu.memory_space<vmem>>, vector<1x1x512xf32>
    %101 = vector.shape_cast %100 : vector<1x1x512xf32> to vector<1x512xf32>
    %102 = vector.broadcast %101 : vector<1x512xf32> to vector<20x512xf32>
    %103 = arith.mulf %99, %102 : vector<20x512xf32>
    %104 = arith.truncf %103 : vector<20x512xf32> to vector<20x512xbf16>
    %c7_57 = arith.constant 7 : index
    %c0_58 = arith.constant 0 : index
    %c0_59 = arith.constant 0 : index
    %105 = vector.load %arg1[%c7_57, %c0_58, %c0_59] : memref<9x8x20xbf16, #tpu.memory_space<vmem>>, vector<1x8x20xbf16>
    %106 = vector.shape_cast %105 : vector<1x8x20xbf16> to vector<8x20xbf16>
    %cst_60 = arith.constant dense<0.000000e+00> : vector<8x512xf32>
    %107 = tpu.matmul %106, %104, %cst_60 {dimension_numbers = #tpu.dot_dimension_numbers<[1], [0], [0], [1], [0, 0, 1, 1], [], []>} : vector<8x20xbf16>, vector<20x512xbf16>, vector<8x512xf32> -> vector<8x512xf32>
    %108 = arith.addf %98, %107 : vector<8x512xf32>
    %c495_i32 = arith.constant 495 : i32
    %109 = tpu.dynamic_rotate %28 by %c495_i32 dim 1 : vector<20x512xf32>, i32 -> vector<20x512xf32>
    %c8 = arith.constant 8 : index
    %c0_61 = arith.constant 0 : index
    %c0_62 = arith.constant 0 : index
    %110 = vector.load %arg7[%c8, %c0_61, %c0_62] : memref<9x1x512xf32, #tpu.memory_space<vmem>>, vector<1x1x512xf32>
    %111 = vector.shape_cast %110 : vector<1x1x512xf32> to vector<1x512xf32>
    %112 = vector.broadcast %111 : vector<1x512xf32> to vector<20x512xf32>
    %113 = arith.mulf %109, %112 : vector<20x512xf32>
    %114 = arith.truncf %113 : vector<20x512xf32> to vector<20x512xbf16>
    %c8_63 = arith.constant 8 : index
    %c0_64 = arith.constant 0 : index
    %c0_65 = arith.constant 0 : index
    %115 = vector.load %arg1[%c8_63, %c0_64, %c0_65] : memref<9x8x20xbf16, #tpu.memory_space<vmem>>, vector<1x8x20xbf16>
    %116 = vector.shape_cast %115 : vector<1x8x20xbf16> to vector<8x20xbf16>
    %cst_66 = arith.constant dense<0.000000e+00> : vector<8x512xf32>
    %117 = tpu.matmul %116, %114, %cst_66 {dimension_numbers = #tpu.dot_dimension_numbers<[1], [0], [0], [1], [0, 0, 1, 1], [], []>} : vector<8x20xbf16>, vector<20x512xbf16>, vector<8x512xf32> -> vector<8x512xf32>
    %118 = arith.addf %108, %117 : vector<8x512xf32>
    %c0_67 = arith.constant 0 : index
    %c0_68 = arith.constant 0 : index
    %119 = vector.load %arg2[%c0_67, %c0_68] : memref<8x1xf32, #tpu.memory_space<vmem>>, vector<8x1xf32>
    %120 = vector.broadcast %119 : vector<8x1xf32> to vector<8x512xf32>
    %121 = arith.addf %118, %120 : vector<8x512xf32>
    %c0_69 = arith.constant 0 : index
    %c0_70 = arith.constant 0 : index
    %122 = vector.load %arg5[%c0_69, %c0_70] : memref<8x1xf32, #tpu.memory_space<vmem>>, vector<8x1xf32>
    %c0_71 = arith.constant 0 : index
    %c0_72 = arith.constant 0 : index
    %123 = vector.load %arg6[%c0_71, %c0_72] : memref<8x1xf32, #tpu.memory_space<vmem>>, vector<8x1xf32>
    %cst_73 = arith.constant dense<0.000000e+00> : vector<8xf32>
    %124 = vector.multi_reduction <add>, %121, %cst_73 [1] : vector<8x512xf32> to vector<8xf32>
    %125 = vector.shape_cast %124 : vector<8xf32> to vector<8x1xf32>
    %cst_74 = arith.constant 5.120000e+02 : f32
    %126 = vector.broadcast %cst_74 : f32 to vector<8x1xf32>
    %127 = arith.divf %125, %126 : vector<8x1xf32>
    %128 = arith.mulf %121, %121 : vector<8x512xf32>
    %cst_75 = arith.constant dense<0.000000e+00> : vector<8xf32>
    %129 = vector.multi_reduction <add>, %128, %cst_75 [1] : vector<8x512xf32> to vector<8xf32>
    %130 = vector.shape_cast %129 : vector<8xf32> to vector<8x1xf32>
    %cst_76 = arith.constant 5.120000e+02 : f32
    %131 = vector.broadcast %cst_76 : f32 to vector<8x1xf32>
    %132 = arith.divf %130, %131 : vector<8x1xf32>
    %133 = arith.mulf %127, %127 : vector<8x1xf32>
    %134 = arith.subf %132, %133 : vector<8x1xf32>
    %cst_77 = arith.constant 0.000000e+00 : f32
    %135 = vector.broadcast %cst_77 : f32 to vector<8x1xf32>
    %136 = arith.maximumf %134, %135 : vector<8x1xf32>
    %137 = vector.broadcast %127 : vector<8x1xf32> to vector<8x512xf32>
    %138 = arith.subf %121, %137 : vector<8x512xf32>
    %cst_78 = arith.constant 9.99999974E-6 : f32
    %139 = vector.broadcast %cst_78 : f32 to vector<8x1xf32>
    %140 = arith.addf %136, %139 : vector<8x1xf32>
    %141 = math.rsqrt %140 : vector<8x1xf32>
    %142 = vector.broadcast %141 : vector<8x1xf32> to vector<8x512xf32>
    %143 = arith.mulf %138, %142 : vector<8x512xf32>
    %144 = vector.broadcast %122 : vector<8x1xf32> to vector<8x512xf32>
    %145 = arith.mulf %143, %144 : vector<8x512xf32>
    %146 = vector.broadcast %123 : vector<8x1xf32> to vector<8x512xf32>
    %147 = arith.addf %145, %146 : vector<8x512xf32>
    %cst_79 = arith.constant 0.000000e+00 : f32
    %148 = vector.broadcast %cst_79 : f32 to vector<8x512xf32>
    %149 = arith.maximumf %147, %148 : vector<8x512xf32>
    %c0_80 = arith.constant 0 : index
    %c0_81 = arith.constant 0 : index
    %150 = vector.load %arg8[%c0_80, %c0_81] : memref<8x512xf32, #tpu.memory_space<vmem>>, vector<8x512xf32>
    tpu.vector_store %arg8[%c0_80, %c0_81], %149 {strides = array<i32>} : memref<8x512xf32, #tpu.memory_space<vmem>>, vector<8x512xf32>,
    return
  }
}

module attributes {stable_mosaic.version = 11 : i64} {
  func.func @_output_kernel(%arg0: memref<8x512xf32, #tpu.memory_space<vmem>>, %arg1: memref<9x3x8xbf16, #tpu.memory_space<vmem>>, %arg2: memref<3x1xf32, #tpu.memory_space<vmem>>, %arg3: memref<8x1xf32, #tpu.memory_space<vmem>>, %arg4: memref<8x1xf32, #tpu.memory_space<vmem>>, %arg5: memref<9x1x512xf32, #tpu.memory_space<vmem>>, %arg6: memref<3x512xf32, #tpu.memory_space<vmem>>) attributes {dimension_semantics = [], scalar_prefetch = 0 : i64, scratch_operands = 0 : i64, tpu.core_type = #tpu.core_type<tc>} {
    %c0 = arith.constant 0 : index
    %c0_0 = arith.constant 0 : index
    %0 = vector.load %arg0[%c0, %c0_0] : memref<8x512xf32, #tpu.memory_space<vmem>>, vector<8x512xf32>
    %c0_1 = arith.constant 0 : index
    %c0_2 = arith.constant 0 : index
    %1 = vector.load %arg3[%c0_1, %c0_2] : memref<8x1xf32, #tpu.memory_space<vmem>>, vector<8x1xf32>
    %c0_3 = arith.constant 0 : index
    %c0_4 = arith.constant 0 : index
    %2 = vector.load %arg4[%c0_3, %c0_4] : memref<8x1xf32, #tpu.memory_space<vmem>>, vector<8x1xf32>
    %cst = arith.constant dense<0.000000e+00> : vector<8xf32>
    %3 = vector.multi_reduction <add>, %0, %cst [1] : vector<8x512xf32> to vector<8xf32>
    %4 = vector.shape_cast %3 : vector<8xf32> to vector<8x1xf32>
    %cst_5 = arith.constant 5.120000e+02 : f32
    %5 = vector.broadcast %cst_5 : f32 to vector<8x1xf32>
    %6 = arith.divf %4, %5 : vector<8x1xf32>
    %7 = arith.mulf %0, %0 : vector<8x512xf32>
    %cst_6 = arith.constant dense<0.000000e+00> : vector<8xf32>
    %8 = vector.multi_reduction <add>, %7, %cst_6 [1] : vector<8x512xf32> to vector<8xf32>
    %9 = vector.shape_cast %8 : vector<8xf32> to vector<8x1xf32>
    %cst_7 = arith.constant 5.120000e+02 : f32
    %10 = vector.broadcast %cst_7 : f32 to vector<8x1xf32>
    %11 = arith.divf %9, %10 : vector<8x1xf32>
    %12 = arith.mulf %6, %6 : vector<8x1xf32>
    %13 = arith.subf %11, %12 : vector<8x1xf32>
    %cst_8 = arith.constant 0.000000e+00 : f32
    %14 = vector.broadcast %cst_8 : f32 to vector<8x1xf32>
    %15 = arith.maximumf %13, %14 : vector<8x1xf32>
    %16 = vector.broadcast %6 : vector<8x1xf32> to vector<8x512xf32>
    %17 = arith.subf %0, %16 : vector<8x512xf32>
    %cst_9 = arith.constant 9.99999974E-6 : f32
    %18 = vector.broadcast %cst_9 : f32 to vector<8x1xf32>
    %19 = arith.addf %15, %18 : vector<8x1xf32>
    %20 = math.rsqrt %19 : vector<8x1xf32>
    %21 = vector.broadcast %20 : vector<8x1xf32> to vector<8x512xf32>
    %22 = arith.mulf %17, %21 : vector<8x512xf32>
    %23 = vector.broadcast %1 : vector<8x1xf32> to vector<8x512xf32>
    %24 = arith.mulf %22, %23 : vector<8x512xf32>
    %25 = vector.broadcast %2 : vector<8x1xf32> to vector<8x512xf32>
    %26 = arith.addf %24, %25 : vector<8x512xf32>
    %cst_10 = arith.constant 0.000000e+00 : f32
    %27 = vector.broadcast %cst_10 : f32 to vector<8x512xf32>
    %28 = arith.maximumf %26, %27 : vector<8x512xf32>
    %cst_11 = arith.constant 0.000000e+00 : f32
    %29 = vector.broadcast %cst_11 : f32 to vector<3x512xf32>
    %c17_i32 = arith.constant 17 : i32
    %30 = tpu.dynamic_rotate %28 by %c17_i32 dim 1 : vector<8x512xf32>, i32 -> vector<8x512xf32>
    %c0_12 = arith.constant 0 : index
    %c0_13 = arith.constant 0 : index
    %c0_14 = arith.constant 0 : index
    %31 = vector.load %arg5[%c0_12, %c0_13, %c0_14] : memref<9x1x512xf32, #tpu.memory_space<vmem>>, vector<1x1x512xf32>
    %32 = vector.shape_cast %31 : vector<1x1x512xf32> to vector<1x512xf32>
    %33 = vector.broadcast %32 : vector<1x512xf32> to vector<8x512xf32>
    %34 = arith.mulf %30, %33 : vector<8x512xf32>
    %35 = arith.truncf %34 : vector<8x512xf32> to vector<8x512xbf16>
    %c0_15 = arith.constant 0 : index
    %c0_16 = arith.constant 0 : index
    %c0_17 = arith.constant 0 : index
    %36 = vector.load %arg1[%c0_15, %c0_16, %c0_17] : memref<9x3x8xbf16, #tpu.memory_space<vmem>>, vector<1x3x8xbf16>
    %37 = vector.shape_cast %36 : vector<1x3x8xbf16> to vector<3x8xbf16>
    %cst_18 = arith.constant dense<0.000000e+00> : vector<3x512xf32>
    %38 = tpu.matmul %37, %35, %cst_18 {dimension_numbers = #tpu.dot_dimension_numbers<[1], [0], [0], [1], [0, 0, 1, 1], [], []>} : vector<3x8xbf16>, vector<8x512xbf16>, vector<3x512xf32> -> vector<3x512xf32>
    %39 = arith.addf %29, %38 : vector<3x512xf32>
    %c16_i32 = arith.constant 16 : i32
    %40 = tpu.dynamic_rotate %28 by %c16_i32 dim 1 : vector<8x512xf32>, i32 -> vector<8x512xf32>
    %c1 = arith.constant 1 : index
    %c0_19 = arith.constant 0 : index
    %c0_20 = arith.constant 0 : index
    %41 = vector.load %arg5[%c1, %c0_19, %c0_20] : memref<9x1x512xf32, #tpu.memory_space<vmem>>, vector<1x1x512xf32>
    %42 = vector.shape_cast %41 : vector<1x1x512xf32> to vector<1x512xf32>
    %43 = vector.broadcast %42 : vector<1x512xf32> to vector<8x512xf32>
    %44 = arith.mulf %40, %43 : vector<8x512xf32>
    %45 = arith.truncf %44 : vector<8x512xf32> to vector<8x512xbf16>
    %c1_21 = arith.constant 1 : index
    %c0_22 = arith.constant 0 : index
    %c0_23 = arith.constant 0 : index
    %46 = vector.load %arg1[%c1_21, %c0_22, %c0_23] : memref<9x3x8xbf16, #tpu.memory_space<vmem>>, vector<1x3x8xbf16>
    %47 = vector.shape_cast %46 : vector<1x3x8xbf16> to vector<3x8xbf16>
    %cst_24 = arith.constant dense<0.000000e+00> : vector<3x512xf32>
    %48 = tpu.matmul %47, %45, %cst_24 {dimension_numbers = #tpu.dot_dimension_numbers<[1], [0], [0], [1], [0, 0, 1, 1], [], []>} : vector<3x8xbf16>, vector<8x512xbf16>, vector<3x512xf32> -> vector<3x512xf32>
    %49 = arith.addf %39, %48 : vector<3x512xf32>
    %c15_i32 = arith.constant 15 : i32
    %50 = tpu.dynamic_rotate %28 by %c15_i32 dim 1 : vector<8x512xf32>, i32 -> vector<8x512xf32>
    %c2 = arith.constant 2 : index
    %c0_25 = arith.constant 0 : index
    %c0_26 = arith.constant 0 : index
    %51 = vector.load %arg5[%c2, %c0_25, %c0_26] : memref<9x1x512xf32, #tpu.memory_space<vmem>>, vector<1x1x512xf32>
    %52 = vector.shape_cast %51 : vector<1x1x512xf32> to vector<1x512xf32>
    %53 = vector.broadcast %52 : vector<1x512xf32> to vector<8x512xf32>
    %54 = arith.mulf %50, %53 : vector<8x512xf32>
    %55 = arith.truncf %54 : vector<8x512xf32> to vector<8x512xbf16>
    %c2_27 = arith.constant 2 : index
    %c0_28 = arith.constant 0 : index
    %c0_29 = arith.constant 0 : index
    %56 = vector.load %arg1[%c2_27, %c0_28, %c0_29] : memref<9x3x8xbf16, #tpu.memory_space<vmem>>, vector<1x3x8xbf16>
    %57 = vector.shape_cast %56 : vector<1x3x8xbf16> to vector<3x8xbf16>
    %cst_30 = arith.constant dense<0.000000e+00> : vector<3x512xf32>
    %58 = tpu.matmul %57, %55, %cst_30 {dimension_numbers = #tpu.dot_dimension_numbers<[1], [0], [0], [1], [0, 0, 1, 1], [], []>} : vector<3x8xbf16>, vector<8x512xbf16>, vector<3x512xf32> -> vector<3x512xf32>
    %59 = arith.addf %49, %58 : vector<3x512xf32>
    %c1_i32 = arith.constant 1 : i32
    %60 = tpu.dynamic_rotate %28 by %c1_i32 dim 1 : vector<8x512xf32>, i32 -> vector<8x512xf32>
    %c3 = arith.constant 3 : index
    %c0_31 = arith.constant 0 : index
    %c0_32 = arith.constant 0 : index
    %61 = vector.load %arg5[%c3, %c0_31, %c0_32] : memref<9x1x512xf32, #tpu.memory_space<vmem>>, vector<1x1x512xf32>
    %62 = vector.shape_cast %61 : vector<1x1x512xf32> to vector<1x512xf32>
    %63 = vector.broadcast %62 : vector<1x512xf32> to vector<8x512xf32>
    %64 = arith.mulf %60, %63 : vector<8x512xf32>
    %65 = arith.truncf %64 : vector<8x512xf32> to vector<8x512xbf16>
    %c3_33 = arith.constant 3 : index
    %c0_34 = arith.constant 0 : index
    %c0_35 = arith.constant 0 : index
    %66 = vector.load %arg1[%c3_33, %c0_34, %c0_35] : memref<9x3x8xbf16, #tpu.memory_space<vmem>>, vector<1x3x8xbf16>
    %67 = vector.shape_cast %66 : vector<1x3x8xbf16> to vector<3x8xbf16>
    %cst_36 = arith.constant dense<0.000000e+00> : vector<3x512xf32>
    %68 = tpu.matmul %67, %65, %cst_36 {dimension_numbers = #tpu.dot_dimension_numbers<[1], [0], [0], [1], [0, 0, 1, 1], [], []>} : vector<3x8xbf16>, vector<8x512xbf16>, vector<3x512xf32> -> vector<3x512xf32>
    %69 = arith.addf %59, %68 : vector<3x512xf32>
    %c4 = arith.constant 4 : index
    %c0_37 = arith.constant 0 : index
    %c0_38 = arith.constant 0 : index
    %70 = vector.load %arg5[%c4, %c0_37, %c0_38] : memref<9x1x512xf32, #tpu.memory_space<vmem>>, vector<1x1x512xf32>
    %71 = vector.shape_cast %70 : vector<1x1x512xf32> to vector<1x512xf32>
    %72 = vector.broadcast %71 : vector<1x512xf32> to vector<8x512xf32>
    %73 = arith.mulf %28, %72 : vector<8x512xf32>
    %74 = arith.truncf %73 : vector<8x512xf32> to vector<8x512xbf16>
    %c4_39 = arith.constant 4 : index
    %c0_40 = arith.constant 0 : index
    %c0_41 = arith.constant 0 : index
    %75 = vector.load %arg1[%c4_39, %c0_40, %c0_41] : memref<9x3x8xbf16, #tpu.memory_space<vmem>>, vector<1x3x8xbf16>
    %76 = vector.shape_cast %75 : vector<1x3x8xbf16> to vector<3x8xbf16>
    %cst_42 = arith.constant dense<0.000000e+00> : vector<3x512xf32>
    %77 = tpu.matmul %76, %74, %cst_42 {dimension_numbers = #tpu.dot_dimension_numbers<[1], [0], [0], [1], [0, 0, 1, 1], [], []>} : vector<3x8xbf16>, vector<8x512xbf16>, vector<3x512xf32> -> vector<3x512xf32>
    %78 = arith.addf %69, %77 : vector<3x512xf32>
    %c511_i32 = arith.constant 511 : i32
    %79 = tpu.dynamic_rotate %28 by %c511_i32 dim 1 : vector<8x512xf32>, i32 -> vector<8x512xf32>
    %c5 = arith.constant 5 : index
    %c0_43 = arith.constant 0 : index
    %c0_44 = arith.constant 0 : index
    %80 = vector.load %arg5[%c5, %c0_43, %c0_44] : memref<9x1x512xf32, #tpu.memory_space<vmem>>, vector<1x1x512xf32>
    %81 = vector.shape_cast %80 : vector<1x1x512xf32> to vector<1x512xf32>
    %82 = vector.broadcast %81 : vector<1x512xf32> to vector<8x512xf32>
    %83 = arith.mulf %79, %82 : vector<8x512xf32>
    %84 = arith.truncf %83 : vector<8x512xf32> to vector<8x512xbf16>
    %c5_45 = arith.constant 5 : index
    %c0_46 = arith.constant 0 : index
    %c0_47 = arith.constant 0 : index
    %85 = vector.load %arg1[%c5_45, %c0_46, %c0_47] : memref<9x3x8xbf16, #tpu.memory_space<vmem>>, vector<1x3x8xbf16>
    %86 = vector.shape_cast %85 : vector<1x3x8xbf16> to vector<3x8xbf16>
    %cst_48 = arith.constant dense<0.000000e+00> : vector<3x512xf32>
    %87 = tpu.matmul %86, %84, %cst_48 {dimension_numbers = #tpu.dot_dimension_numbers<[1], [0], [0], [1], [0, 0, 1, 1], [], []>} : vector<3x8xbf16>, vector<8x512xbf16>, vector<3x512xf32> -> vector<3x512xf32>
    %88 = arith.addf %78, %87 : vector<3x512xf32>
    %c497_i32 = arith.constant 497 : i32
    %89 = tpu.dynamic_rotate %28 by %c497_i32 dim 1 : vector<8x512xf32>, i32 -> vector<8x512xf32>
    %c6 = arith.constant 6 : index
    %c0_49 = arith.constant 0 : index
    %c0_50 = arith.constant 0 : index
    %90 = vector.load %arg5[%c6, %c0_49, %c0_50] : memref<9x1x512xf32, #tpu.memory_space<vmem>>, vector<1x1x512xf32>
    %91 = vector.shape_cast %90 : vector<1x1x512xf32> to vector<1x512xf32>
    %92 = vector.broadcast %91 : vector<1x512xf32> to vector<8x512xf32>
    %93 = arith.mulf %89, %92 : vector<8x512xf32>
    %94 = arith.truncf %93 : vector<8x512xf32> to vector<8x512xbf16>
    %c6_51 = arith.constant 6 : index
    %c0_52 = arith.constant 0 : index
    %c0_53 = arith.constant 0 : index
    %95 = vector.load %arg1[%c6_51, %c0_52, %c0_53] : memref<9x3x8xbf16, #tpu.memory_space<vmem>>, vector<1x3x8xbf16>
    %96 = vector.shape_cast %95 : vector<1x3x8xbf16> to vector<3x8xbf16>
    %cst_54 = arith.constant dense<0.000000e+00> : vector<3x512xf32>
    %97 = tpu.matmul %96, %94, %cst_54 {dimension_numbers = #tpu.dot_dimension_numbers<[1], [0], [0], [1], [0, 0, 1, 1], [], []>} : vector<3x8xbf16>, vector<8x512xbf16>, vector<3x512xf32> -> vector<3x512xf32>
    %98 = arith.addf %88, %97 : vector<3x512xf32>
    %c496_i32 = arith.constant 496 : i32
    %99 = tpu.dynamic_rotate %28 by %c496_i32 dim 1 : vector<8x512xf32>, i32 -> vector<8x512xf32>
    %c7 = arith.constant 7 : index
    %c0_55 = arith.constant 0 : index
    %c0_56 = arith.constant 0 : index
    %100 = vector.load %arg5[%c7, %c0_55, %c0_56] : memref<9x1x512xf32, #tpu.memory_space<vmem>>, vector<1x1x512xf32>
    %101 = vector.shape_cast %100 : vector<1x1x512xf32> to vector<1x512xf32>
    %102 = vector.broadcast %101 : vector<1x512xf32> to vector<8x512xf32>
    %103 = arith.mulf %99, %102 : vector<8x512xf32>
    %104 = arith.truncf %103 : vector<8x512xf32> to vector<8x512xbf16>
    %c7_57 = arith.constant 7 : index
    %c0_58 = arith.constant 0 : index
    %c0_59 = arith.constant 0 : index
    %105 = vector.load %arg1[%c7_57, %c0_58, %c0_59] : memref<9x3x8xbf16, #tpu.memory_space<vmem>>, vector<1x3x8xbf16>
    %106 = vector.shape_cast %105 : vector<1x3x8xbf16> to vector<3x8xbf16>
    %cst_60 = arith.constant dense<0.000000e+00> : vector<3x512xf32>
    %107 = tpu.matmul %106, %104, %cst_60 {dimension_numbers = #tpu.dot_dimension_numbers<[1], [0], [0], [1], [0, 0, 1, 1], [], []>} : vector<3x8xbf16>, vector<8x512xbf16>, vector<3x512xf32> -> vector<3x512xf32>
    %108 = arith.addf %98, %107 : vector<3x512xf32>
    %c495_i32 = arith.constant 495 : i32
    %109 = tpu.dynamic_rotate %28 by %c495_i32 dim 1 : vector<8x512xf32>, i32 -> vector<8x512xf32>
    %c8 = arith.constant 8 : index
    %c0_61 = arith.constant 0 : index
    %c0_62 = arith.constant 0 : index
    %110 = vector.load %arg5[%c8, %c0_61, %c0_62] : memref<9x1x512xf32, #tpu.memory_space<vmem>>, vector<1x1x512xf32>
    %111 = vector.shape_cast %110 : vector<1x1x512xf32> to vector<1x512xf32>
    %112 = vector.broadcast %111 : vector<1x512xf32> to vector<8x512xf32>
    %113 = arith.mulf %109, %112 : vector<8x512xf32>
    %114 = arith.truncf %113 : vector<8x512xf32> to vector<8x512xbf16>
    %c8_63 = arith.constant 8 : index
    %c0_64 = arith.constant 0 : index
    %c0_65 = arith.constant 0 : index
    %115 = vector.load %arg1[%c8_63, %c0_64, %c0_65] : memref<9x3x8xbf16, #tpu.memory_space<vmem>>, vector<1x3x8xbf16>
    %116 = vector.shape_cast %115 : vector<1x3x8xbf16> to vector<3x8xbf16>
    %cst_66 = arith.constant dense<0.000000e+00> : vector<3x512xf32>
    %117 = tpu.matmul %116, %114, %cst_66 {dimension_numbers = #tpu.dot_dimension_numbers<[1], [0], [0], [1], [0, 0, 1, 1], [], []>} : vector<3x8xbf16>, vector<8x512xbf16>, vector<3x512xf32> -> vector<3x512xf32>
    %118 = arith.addf %108, %117 : vector<3x512xf32>
    %c0_67 = arith.constant 0 : index
    %c0_68 = arith.constant 0 : index
    %119 = vector.load %arg2[%c0_67, %c0_68] : memref<3x1xf32, #tpu.memory_space<vmem>>, vector<3x1xf32>
    %120 = vector.broadcast %119 : vector<3x1xf32> to vector<3x512xf32>
    %121 = arith.addf %118, %120 : vector<3x512xf32>
    %122 = math.tanh %121 : vector<3x512xf32>
    %c0_69 = arith.constant 0 : index
    %c0_70 = arith.constant 0 : index
    %123 = vector.load %arg6[%c0_69, %c0_70] : memref<3x512xf32, #tpu.memory_space<vmem>>, vector<3x512xf32>
    tpu.vector_store %arg6[%c0_69, %c0_70], %122 {strides = array<i32>} : memref<3x512xf32, #tpu.memory_space<vmem>>, vector<3x512xf32>,
    return
  }
}

</mosaic_0001>

<bundles_post_ra>
// kernel: _lambda_.9
= control target key start
LH: loop header
LB: loop body
LE: loop exit
PB: predicated region body
PF: predicated region fallthrough
CT: control target
= control target key end

     0   :  { %v86_v0 = vmov 0.0   ;;  %vm87_vm0 = vmmov 0   ;;  %vm22_vm1 = vcmask 130048   ;;  %s118_s1 = inlined_call_operand.vmem [shape: f32[16,128], index: 1, kind: input, shape index: {}]   ;;  %s119_s0 = inlined_call_operand.vmem [shape: bf16[12,16], index: 0, kind: input, shape index: {}]   ;;  %s120_s2 = inlined_call_operand.vmem [shape: f32[12,128], index: 2, kind: output, shape index: {}]  }
   0x1   :  { %77 = vmatprep.subr.bf16.mxu0 %v86_v0  ;;  %v14_v1 = vld [vmem:[%s118_s1] sm:$0xff]  ;;  %v15_v2 = vld [vmem:[%s118_s1 + $0x8] sm:$0xff]  ;;  %79 = vmatprep.mubr.msk.bf16.mxu0 %vm87_vm0, %v86_v0 }
   0x2   :  { %v16_v3 = vpack.c.bf16 %v15_v2, %v14_v1  ;;  %v85_v4 = vld [vmem:[%s119_s0] sm:$0x3f]  }
   0x4   :  { %78 = vmatpush3.bf16.msra.mxu0 %v16_v3 }
   0x7   :  { %80 = vmatmul.mubr.msk.bf16.vlgmr.msra.gmra.mrb[0].mxu0 %vm22_vm1, %v85_v4 }
  0xda   :  { %v60_v5 = vpop.f32.mrb[0].mxu0 }
  0xdb   :  { %67 = vst [vmem:[%s120_s2] sm:$0xff] %v60_v5  ;;  %v81_v6 = vpop.f32.mrb[1].mxu0 }
  0xdc   :  { %v63_v7 = vpop.f32.mrb[2].mxu0 }
  0xdd   :  { %68 = vst [vmem:[%s120_s2 + $0x8] sm:$0xf] %v63_v7  ;;  %v82_v8 = vpop.f32.mrb[3].mxu0 }

// kernel: _lambda_.8
= control target key start
LH: loop header
LB: loop body
LE: loop exit
PB: predicated region body
PF: predicated region fallthrough
CT: control target
= control target key end

     0   :  { %vm52_vm0 = vcmask 1041408   ;;  %v893_v1 = vmov 0.0   ;;  %vm53_vm1 = vcmask 1042432   ;;  %s894_s26 = smov 9   ;;  %s895_s27 = smov 8   ;;  %v896_v5 = vmov 65535   ;;  %s1077_s0 = inlined_call_operand.vmem [shape: f32[16,128], index: 0, kind: input, shape index: {}]   ;;  %s1078_s1 = inlined_call_operand.vmem [shape: f32[5,128], index: 1, kind: input, shape index: {}]   ;;  %s1079_s4 = inlined_call_operand.vmem [shape: bf16[16,5], index: 4, kind: input, shape index: {}]   ;;  %s1080_s2 = inlined_call_operand.vmem [shape: bf16[9,16,16], index: 2, kind: input, shape index: {}]   ;;  %s1081_s6 = inlined_call_operand.vmem [shape: f32[9,1,128], index: 6, kind: input, shape index: {}]   ;;  %s1082_s5 = inlined_call_operand.vmem [shape: f32[16,1], index: 5, kind: input, shape index: {}]   ;;  %s1083_s3 = inlined_call_operand.vmem [shape: f32[16,1], index: 3, kind: input, shape index: {}]   ;;  %s1084_s7 = inlined_call_operand.vmem [shape: f32[16,128], index: 7, kind: output, shape index: {}]  }
   0x1   :  { %v100_v0 = vld [vmem:[%s1077_s0] sm:$0xff]  ;;  %809 = vmatprep.subr.bf16.mxu0 %v893_v1  ;;  %815 = vmatprep.subr.bf16.mxu1 %v893_v1  ;;  %v101_v3 = vld [vmem:[%s1077_s0 + $0x8] sm:$0xff]  ;;  %v54_v6 = vsel %vm52_vm0, 4294967295, %v896_v5  ;;  %vm897_vm2 = vmmov 0   ;;  %vm48_vm3 = vcmask 39936   ;;  %s898_s11 = smov 7  }
   0x2   :  { %102 = vrot.lane.b32.xlu1 %v100_v0, %s894_s26  ;;  %118 = vrot.lane.b32.xlu0 %v100_v0, %s895_s27  ;;  %v29_v2 = vld [vmem:[%s1078_s1] sm:$0x1f]  ;;  %v55_v7 = vsel %vm53_vm1, %v54_v6, 0  ;;  %s900_s12 = smov 127   ;;  %s901_s13 = smov 121   ;;  %v904_v14 = vmov 0  }
   0x3   :  { %v30_v4 = vpack.c.bf16 %v29_v2, %v29_v2  ;;  %811 = vmatprep.mubr.msk.bf16.mxu0 %vm897_vm2, %v893_v1  ;;  %817 = vmatprep.mubr.msk.bf16.mxu1 %vm897_vm2, %v893_v1  ;;  %v883_v9 = vld [vmem:[%s1079_s4] sm:$0xff]   ;;  %s899_s4 = smov 1   ;;  %s902_s14 = smov 120   ;;  %v32_v15 = vld [vmem:[%s1082_s5 + $0x8] sm:$0xff]  ;;  %vm141_vm4 = vcmask 130048   ;;  %v886_v47 = vld [vmem:[%s1080_s2 + $0x10] sm:$0xff]  }
   0x4   :  { %v760_v10 = vld [vmem:[%s1081_s6 + $0x4] ss:$0 sm:$0xff]  ;;  %s903_s15 = smov 119   ;;  %882 = vset.pattern.permute.xlu1 %v904_v14  ;;  %881 = vset.pattern.permute.xlu0 %v904_v14  ;;  %v717_v18 = vld [vmem:[%s1083_s3 + $0x8] sm:$0xff]  ;;  %v738_v19 = vld [vmem:[%s1081_s6] ss:$0 sm:$0xff] }
   0x5   :  { %v57_v8 = vand.u32 %v55_v7, %v30_v4  ;;  %v967_v11 = vmul.f32 %v760_v10, %v100_v0  ;;  %v969_v12 = vmul.f32 %v760_v10, %v101_v3  ;;  %v31_v16 = vld [vmem:[%s1082_s5] sm:$0xff]  ;;  %v884_v34 = vld [vmem:[%s1080_s2 + $0x8] sm:$0xff]   ;;  %v887_v49 = vld [vmem:[%s1080_s2 + $0x18] sm:$0xff]  }
   0x6   :  { %104 = vrot.lane.b32.xlu1 %v101_v3, %s894_s26  ;;  %120 = vrot.lane.b32.xlu0 %v101_v3, %s895_s27  ;;  %v716_v17 = vld [vmem:[%s1083_s3] sm:$0xff]  ;;  %v889_v62 = vld [vmem:[%s1080_s2 + $0x28] sm:$0xff]  }
   0x7   :  { %810 = vmatpush3.bf16.msra.mxu0 %v57_v8  ;;  %v383_v13 = vpack.c.bf16 %v969_v12, %v967_v11  ;;  %v740_v22 = vld [vmem:[%s1081_s6 + $0x1] ss:$0 sm:$0xff]  ;;  %v748_v29 = vld [vmem:[%s1081_s6 + $0x2] ss:$0 sm:$0xff]  ;;  %v754_v38 = vld [vmem:[%s1081_s6 + $0x3] ss:$0 sm:$0xff] }
   0x8   :  { %821 = vmatprep.subr.bf16.mxu0 %v893_v1  ;;  %v885_v35 = vld [vmem:[%s1080_s2] sm:$0xff]   ;;  %v891_v10 = vld [vmem:[%s1080_s2 + $0x38] sm:$0xff]  }
   0x9   :  { %v766_v44 = vld [vmem:[%s1081_s6 + $0x5] ss:$0 sm:$0xff]  ;;  %v772_v52 = vld [vmem:[%s1081_s6 + $0x6] ss:$0 sm:$0xff]  ;;  %v778_v58 = vld [vmem:[%s1081_s6 + $0x7] ss:$0 sm:$0xff] }
   0xa   :  { %237 = vrot.lane.b32.xlu1 %v101_v3, %s898_s11  ;;  %235 = vrot.lane.b32.xlu0 %v100_v0, %s898_s11  ;;  %v888_v61 = vld [vmem:[%s1080_s2 + $0x20] sm:$0xff]  }
   0xb   :  { %812 = vmatmul.mubr.msk.bf16.vlgmr.msra.gmra.mrb[0].mxu0 %vm48_vm3, %v883_v9  ;;  %v890_v9 = vld [vmem:[%s1080_s2 + $0x30] sm:$0xff]   ;;  %v892_v12 = vld [vmem:[%s1080_s2 + $0x40] sm:$0xff]  }
   0xc   :  { %823 = vmatprep.mubr.msk.bf16.mxu0 %vm897_vm2, %v893_v1 }
   0xe   :  { %306 = vrot.lane.b32.xlu1 %v101_v3, %s899_s4  ;;  %304 = vrot.lane.b32.xlu0 %v100_v0, %s899_s4 }
  0x12   :  { %440 = vrot.lane.b32.xlu1 %v101_v3, %s900_s12  ;;  %438 = vrot.lane.b32.xlu0 %v100_v0, %s900_s12 }
  0x16   :  { %509 = vrot.lane.b32.xlu1 %v101_v3, %s901_s13  ;;  %507 = vrot.lane.b32.xlu0 %v100_v0, %s901_s13 }
  0x1a   :  { %578 = vrot.lane.b32.xlu1 %v101_v3, %s902_s14  ;;  %576 = vrot.lane.b32.xlu0 %v100_v0, %s902_s14 }
  0x1e   :  { %647 = vrot.lane.b32.xlu1 %v101_v3, %s903_s15  ;;  %645 = vrot.lane.b32.xlu0 %v100_v0, %s903_s15  ;;  %v784_v3 = vld [vmem:[%s1081_s6 + $0x8] ss:$0 sm:$0xff] }
  0x22   :  { %40 = vperm.xlu1 %882, %v32_v15   ;;  %35 = vperm.xlu0 %881, %v31_v16  }
  0x26   :  { %720 = vperm.xlu1 %882, %v716_v17   ;;  %725 = vperm.xlu0 %881, %v717_v18  }
  0x74   :  { %v103_v20 = vpop.permute.xlu1 %102  ;;  %v119_v21 = vpop.permute.xlu0 %118 }
  0x75   :  { %v113_v23 = vmul.f32 %v738_v19, %v103_v20  ;;  %v130_v26 = vmul.f32 %v740_v22, %v119_v21 }
  0x78   :  { %v105_v24 = vpop.permute.xlu1 %104  ;;  %v121_v25 = vpop.permute.xlu0 %120 }
  0x79   :  { %v114_v27 = vmul.f32 %v738_v19, %v105_v24  ;;  %v131_v28 = vmul.f32 %v740_v22, %v121_v25 }
  0x7b   :  { %v115_v30 = vpack.c.bf16 %v114_v27, %v113_v23  ;;  %v132_v31 = vpack.c.bf16 %v131_v28, %v130_v26 }
  0x7c   :  { %v238_v32 = vpop.permute.xlu1 %237  ;;  %v236_v33 = vpop.permute.xlu0 %235 }
  0x7d   :  { %v248_v36 = vmul.f32 %v748_v29, %v238_v32  ;;  %v247_v37 = vmul.f32 %v748_v29, %v236_v33  ;;  %816 = vmatpush3.bf16.msra.mxu1 %v132_v31  ;;  %822 = vmatpush3.bf16.msra.mxu0 %v115_v30 }
  0x7e   :  { %827 = vmatprep.subr.bf16.mxu1 %v893_v1  ;;  %833 = vmatprep.subr.bf16.mxu0 %v893_v1 }
  0x7f   :  { %v249_v39 = vpack.c.bf16 %v248_v36, %v247_v37 }
  0x80   :  { %818 = vmatmul.mubr.msk.bf16.vlgmr.msra.gmra.mrb[0].mxu1 %vm141_vm4, %v884_v34  ;;  %824 = vmatmul.mubr.msk.bf16.vlgmr.msra.gmra.mrb[4].mxu0 %vm141_vm4, %v885_v35  ;;  %v307_v40 = vpop.permute.xlu1 %306  ;;  %v305_v41 = vpop.permute.xlu0 %304 }
  0x81   :  { %828 = vmatpush3.bf16.msra.mxu1 %v249_v39  ;;  %v317_v42 = vmul.f32 %v754_v38, %v307_v40  ;;  %v316_v43 = vmul.f32 %v754_v38, %v305_v41  ;;  %829 = vmatprep.mubr.msk.bf16.mxu1 %vm897_vm2, %v893_v1 }
  0x82   :  { %839 = vmatprep.subr.bf16.mxu1 %v893_v1  ;;  %835 = vmatprep.mubr.msk.bf16.mxu0 %vm897_vm2, %v893_v1 }
  0x83   :  { %v318_v45 = vpack.c.bf16 %v317_v42, %v316_v43 }
  0x84   :  { %v441_v46 = vpop.permute.xlu1 %440  ;;  %v439_v48 = vpop.permute.xlu0 %438 }
  0x85   :  { %834 = vmatpush3.bf16.msra.mxu0 %v318_v45  ;;  %v451_v50 = vmul.f32 %v766_v44, %v441_v46  ;;  %v450_v51 = vmul.f32 %v766_v44, %v439_v48 }
  0x86   :  { %845 = vmatprep.subr.bf16.mxu0 %v893_v1 }
  0x87   :  { %v452_v53 = vpack.c.bf16 %v451_v50, %v450_v51 }
  0x88   :  { %830 = vmatmul.mubr.msk.bf16.vlgmr.msra.gmra.mrb[4].mxu1 %vm141_vm4, %v886_v47  ;;  %836 = vmatmul.mubr.msk.bf16.vlgmr.msra.gmra.mrb[8].mxu0 %vm141_vm4, %v887_v49  ;;  %v510_v54 = vpop.permute.xlu1 %509  ;;  %v508_v55 = vpop.permute.xlu0 %507 }
  0x89   :  { %840 = vmatpush3.bf16.msra.mxu1 %v383_v13  ;;  %v520_v56 = vmul.f32 %v772_v52, %v510_v54  ;;  %v519_v57 = vmul.f32 %v772_v52, %v508_v55  ;;  %846 = vmatpush3.bf16.msra.mxu0 %v452_v53 }
  0x8a   :  { %841 = vmatprep.mubr.msk.bf16.mxu1 %vm897_vm2, %v893_v1  ;;  %851 = vmatprep.subr.bf16.mxu1 %v893_v1 }
  0x8b   :  { %847 = vmatprep.mubr.msk.bf16.mxu0 %vm897_vm2, %v893_v1  ;;  %857 = vmatprep.subr.bf16.mxu0 %v893_v1  ;;  %v521_v63 = vpack.c.bf16 %v520_v56, %v519_v57 }
  0x8c   :  { %v579_v59 = vpop.permute.xlu1 %578  ;;  %v577_v60 = vpop.permute.xlu0 %576 }
  0x8d   :  { %v589_v0 = vmul.f32 %v778_v58, %v579_v59  ;;  %v588_v2 = vmul.f32 %v778_v58, %v577_v60 }
  0x8f   :  { %v590_v4 = vpack.c.bf16 %v589_v0, %v588_v2 }
  0x90   :  { %842 = vmatmul.mubr.msk.bf16.vlgmr.msra.gmra.mrb[8].mxu1 %vm141_vm4, %v888_v61  ;;  %848 = vmatmul.mubr.msk.bf16.vlgmr.msra.gmra.mrb[12].mxu0 %vm141_vm4, %v889_v62  ;;  %v648_v5 = vpop.permute.xlu1 %647  ;;  %v646_v6 = vpop.permute.xlu0 %645 }
  0x91   :  { %852 = vmatpush3.bf16.msra.mxu1 %v521_v63  ;;  %v658_v7 = vmul.f32 %v784_v3, %v648_v5  ;;  %v657_v8 = vmul.f32 %v784_v3, %v646_v6  ;;  %858 = vmatpush3.bf16.msra.mxu0 %v590_v4 }
  0x92   :  { %853 = vmatprep.mubr.msk.bf16.mxu1 %vm897_vm2, %v893_v1  ;;  %863 = vmatprep.subr.bf16.mxu1 %v893_v1 }
  0x93   :  { %859 = vmatprep.mubr.msk.bf16.mxu0 %vm897_vm2, %v893_v1  ;;  %v659_v11 = vpack.c.bf16 %v658_v7, %v657_v8 }
  0x98   :  { %854 = vmatmul.mubr.msk.bf16.vlgmr.msra.gmra.mrb[12].mxu1 %vm141_vm4, %v890_v9  ;;  %860 = vmatmul.mubr.msk.bf16.vlgmr.msra.gmra.mrb[16].mxu0 %vm141_vm4, %v891_v10 }
  0x99   :  { %864 = vmatpush3.bf16.msra.mxu1 %v659_v11  ;;  %865 = vmatprep.mubr.msk.bf16.mxu1 %vm897_vm2, %v893_v1 }
  0xa0   :  { %866 = vmatmul.mubr.msk.bf16.vlgmr.msra.gmra.mrb[16].mxu1 %vm141_vm4, %v892_v12 }
  0xa1   :  { %v36_v62 = vpop.permute.xlu0 %35  ;;  %v41_v63 = vpop.permute.xlu1 %40 }
  0xa5   :  { %v721_v10 = vpop.permute.xlu1 %720 }
  0xde   :  { %v93_v13 = vpop.f32.mrb[0].mxu0 }
  0xdf   :  { %v813_v14 = vpop.f32.mrb[1].mxu0  ;;  %v94_v2 = vadd.f32 %v93_v13, %v36_v62 }
  0xe0   :  { %v96_v15 = vpop.f32.mrb[2].mxu0  ;;  %v726_v14 = vpop.permute.xlu0 %725 }
  0xe1   :  { %v814_v16 = vpop.f32.mrb[3].mxu0  ;;  %v97_v6 = vadd.f32 %v96_v15, %v41_v63 }
 0x153   :  { %v179_v17 = vpop.f32.mrb[0].mxu1  ;;  %v228_v18 = vpop.f32.mrb[4].mxu0 }
 0x154   :  { %v229_v19 = vadd.f32 %v228_v18, %v179_v17  ;;  %v819_v20 = vpop.f32.mrb[1].mxu1  ;;  %v825_v21 = vpop.f32.mrb[5].mxu0 }
 0x155   :  { %v182_v22 = vpop.f32.mrb[2].mxu1  ;;  %v231_v23 = vpop.f32.mrb[6].mxu0 }
 0x156   :  { %v232_v24 = vadd.f32 %v231_v23, %v182_v22  ;;  %v820_v25 = vpop.f32.mrb[3].mxu1  ;;  %v826_v1 = vpop.f32.mrb[7].mxu0 }
 0x15b   :  { %v295_v26 = vpop.f32.mrb[4].mxu1  ;;  %v364_v27 = vpop.f32.mrb[8].mxu0 }
 0x15c   :  { %v302_v28 = vadd.f32 %v295_v26, %v229_v19  ;;  %v831_v29 = vpop.f32.mrb[5].mxu1  ;;  %v837_v30 = vpop.f32.mrb[9].mxu0 }
 0x15d   :  { %v298_v31 = vpop.f32.mrb[6].mxu1  ;;  %v367_v32 = vpop.f32.mrb[10].mxu0 }
 0x15e   :  { %v303_v33 = vadd.f32 %v298_v31, %v232_v24  ;;  %v371_v34 = vadd.f32 %v364_v27, %v302_v28  ;;  %v832_v35 = vpop.f32.mrb[7].mxu1  ;;  %v838_v36 = vpop.f32.mrb[11].mxu0 }
 0x160   :  { %v372_v37 = vadd.f32 %v367_v32, %v303_v33 }
 0x163   :  { %v429_v38 = vpop.f32.mrb[8].mxu1  ;;  %v498_v39 = vpop.f32.mrb[12].mxu0 }
 0x164   :  { %v436_v40 = vadd.f32 %v429_v38, %v371_v34  ;;  %v843_v41 = vpop.f32.mrb[9].mxu1  ;;  %v849_v42 = vpop.f32.mrb[13].mxu0 }
 0x165   :  { %v432_v43 = vpop.f32.mrb[10].mxu1  ;;  %v501_v44 = vpop.f32.mrb[14].mxu0 }
 0x166   :  { %v437_v45 = vadd.f32 %v432_v43, %v372_v37  ;;  %v505_v46 = vadd.f32 %v498_v39, %v436_v40  ;;  %v844_v47 = vpop.f32.mrb[11].mxu1  ;;  %v850_v48 = vpop.f32.mrb[15].mxu0 }
 0x168   :  { %v506_v49 = vadd.f32 %v501_v44, %v437_v45 }
 0x16b   :  { %v567_v50 = vpop.f32.mrb[12].mxu1  ;;  %v636_v51 = vpop.f32.mrb[16].mxu0 }
 0x16c   :  { %v574_v52 = vadd.f32 %v567_v50, %v505_v46  ;;  %v855_v53 = vpop.f32.mrb[13].mxu1  ;;  %v861_v54 = vpop.f32.mrb[17].mxu0 }
 0x16d   :  { %v570_v55 = vpop.f32.mrb[14].mxu1  ;;  %v639_v56 = vpop.f32.mrb[18].mxu0 }
 0x16e   :  { %v575_v57 = vadd.f32 %v570_v55, %v506_v49  ;;  %v643_v58 = vadd.f32 %v636_v51, %v574_v52  ;;  %v856_v59 = vpop.f32.mrb[15].mxu1  ;;  %v862_v60 = vpop.f32.mrb[19].mxu0 }
 0x170   :  { %v644_v61 = vadd.f32 %v639_v56, %v575_v57 }
 0x173   :  { %v705_v0 = vpop.f32.mrb[16].mxu1 }
 0x174   :  { %v712_v3 = vadd.f32 %v705_v0, %v643_v58  ;;  %v867_v4 = vpop.f32.mrb[17].mxu1 }
 0x175   :  { %v708_v5 = vpop.f32.mrb[18].mxu1 }
 0x176   :  { %v713_v7 = vadd.f32 %v708_v5, %v644_v61  ;;  %v714_v8 = vadd.f32 %v712_v3, %v94_v2  ;;  %v868_v9 = vpop.f32.mrb[19].mxu1 }
 0x178   :  { %v728_v11 = vadd.f32 %v721_v10, %v714_v8  ;;  %v715_v12 = vadd.f32 %v713_v7, %v97_v6 }
 0x17a   :  { %730 = vst [vmem:[%s1084_s7] sm:$0xff] %v728_v11  ;;  %v729_v16 = vadd.f32 %v726_v14, %v715_v12 }
 0x17c   :  { %731 = vst [vmem:[%s1084_s7 + $0x8] sm:$0xff] %v729_v16 }

// kernel: _lambda_.7
= control target key start
LH: loop header
LB: loop body
LE: loop exit
PB: predicated region body
PF: predicated region fallthrough
CT: control target
= control target key end

     0   :  { %vm33_vm0 = vcmask 1044480   ;;  %v912_v1 = vmov 0   ;;  %v913_v19 = vmov 0.0   ;;  %vm914_vm1 = vmmov 0   ;;  %s918_s11 = smov 119   ;;  %s919_s12 = smov 1   ;;  %s1103_s0 = inlined_call_operand.vmem [shape: f32[5,128], index: 0, kind: input, shape index: {}]   ;;  %s1104_s3 = inlined_call_operand.vmem [shape: f32[5,1], index: 3, kind: input, shape index: {}]   ;;  %s1105_s4 = inlined_call_operand.vmem [shape: f32[5,1], index: 4, kind: input, shape index: {}]   ;;  %s1106_s1 = inlined_call_operand.vmem [shape: bf16[9,16,5], index: 1, kind: input, shape index: {}]   ;;  %s1107_s2 = inlined_call_operand.vmem [shape: f32[16,1], index: 2, kind: input, shape index: {}]   ;;  %s1108_s5 = inlined_call_operand.vmem [shape: f32[16,1], index: 5, kind: input, shape index: {}]   ;;  %s1109_s7 = inlined_call_operand.vmem [shape: f32[9,1,128], index: 7, kind: input, shape index: {}]   ;;  %s1110_s6 = inlined_call_operand.vmem [shape: f32[16,1], index: 6, kind: input, shape index: {}]   ;;  %s1111_s8 = inlined_call_operand.vmem [shape: f32[16,128], index: 8, kind: output, shape index: {}]  }
   0x1   :  { %v30_v0 = vld [vmem:[%s1103_s0] sm:$0x1f]  ;;  %895 = vset.pattern.permute.xlu1 %v912_v1  ;;  %896 = vset.pattern.permute.xlu0 %v912_v1  ;;  %s915_s0 = smov 9   ;;  %s920_s13 = smov 127   ;;  %v683_v26 = vld [vmem:[%s1107_s2 + $0x8] sm:$0xff]  ;;  %vm101_vm2 = vcmask 1041408  }
   0x2   :  { %v31_v2 = vld [vmem:[%s1104_s3] sm:$0x1f]  ;;  %v34_v3 = vsel %vm33_vm0, %v30_v0, 0.0  ;;  %v39_v4 = vmul.f32 %v30_v0, %v30_v0  ;;  %829 = vmatprep.subr.bf16.mxu0 %v913_v19  ;;  %835 = vmatprep.subr.bf16.mxu1 %v913_v19  ;;  %s916_s3 = smov 8   ;;  %s921_s14 = smov 121   ;;  %vm102_vm3 = vcmask 1042432  }
   0x3   :  { %53 = vperm.xlu1 %895, %v31_v2   ;;  %35 = vadd.xlane.f32.xlu0 %v34_v3  ;;  %v32_v5 = vld [vmem:[%s1105_s4] sm:$0x1f]  ;;  %s917_s4 = smov 7   ;;  %s922_s15 = smov 120   ;;  %v923_v33 = vmov 65535   ;;  %v897_v45 = vld [vmem:[%s1106_s1 + $0x8] sm:$0xff]  }
   0x4   :  { %v40_v6 = vsel %vm33_vm0, %v39_v4, 0.0  ;;  %831 = vmatprep.mubr.msk.bf16.mxu0 %vm914_vm1, %v913_v19  ;;  %837 = vmatprep.mubr.msk.bf16.mxu1 %vm914_vm1, %v913_v19  ;;  %v682_v24 = vld [vmem:[%s1107_s2] sm:$0xff]  ;;  %v103_v34 = vsel %vm101_vm2, 4294967295, %v923_v33  ;;  %vm97_vm4 = vcmask 39936   ;;  %v899_v59 = vld [vmem:[%s1106_s1 + $0x10] sm:$0xff]   ;;  %v900_v60 = vld [vmem:[%s1106_s1 + $0x18] sm:$0xff]  }
   0x5   :  { %v696_v25 = vld [vmem:[%s1108_s5] sm:$0xff]  ;;  %v1002_v38 = vsel %vm102_vm3, %v103_v34, 0 }
   0x6   :  { %v760_v27 = vld [vmem:[%s1109_s7] ss:$0 sm:$0xff]  ;;  %v762_v28 = vld [vmem:[%s1109_s7 + $0x1] ss:$0 sm:$0xff]  ;;  %v770_v35 = vld [vmem:[%s1109_s7 + $0x2] ss:$0 sm:$0xff] }
   0x7   :  { %59 = vperm.xlu1 %895, %v32_v5   ;;  %41 = vadd.xlane.f32.xlu0 %v40_v6  ;;  %v782_v43 = vld [vmem:[%s1109_s7 + $0x4] ss:$0 sm:$0xff]  ;;  %v776_v44 = vld [vmem:[%s1109_s7 + $0x3] ss:$0 sm:$0xff]  ;;  %v788_v52 = vld [vmem:[%s1109_s7 + $0x5] ss:$0 sm:$0xff] }
   0x8   :  { %v898_v46 = vld [vmem:[%s1106_s1] sm:$0xff]   ;;  %v806_v6 = vld [vmem:[%s1109_s7 + $0x8] ss:$0 sm:$0xff] }
   0x9   :  { %v794_v58 = vld [vmem:[%s1109_s7 + $0x6] ss:$0 sm:$0xff]  ;;  %v800_v2 = vld [vmem:[%s1109_s7 + $0x7] ss:$0 sm:$0xff] }
  0x82   :  { %v54_v15 = vpop.permute.xlu1 %53 }
  0x86   :  { %v60_v21 = vpop.permute.xlu1 %59 }
  0x90   :  { %v36_v7 = vpop.xlane.xlu0 %35 }
  0x91   :  { %v38_v8 = vmul.f32 0.0078125, %v36_v7 }
  0x93   :  { %v44_v10 = vmul.f32 %v38_v8, %v38_v8  ;;  %v47_v16 = vsub.f32 %v30_v0, %v38_v8  ;;  %v901_v8 = vld [vmem:[%s1106_s1 + $0x20] sm:$0xff]  }
  0x94   :  { %v42_v9 = vpop.xlane.xlu0 %41 }
  0x95   :  { %v43_v11 = vmul.f32 0.0078125, %v42_v9  ;;  %v902_v9 = vld [vmem:[%s1106_s1 + $0x28] sm:$0xff]  }
  0x97   :  { %v45_v12 = vsub.f32 %v43_v11, %v44_v10 }
  0x99   :  { %v46_v13 = vmax.f32 %v45_v12, 0.0 }
  0x9b   :  { %v48_v14 = vadd.f32 1e-05, %v46_v13 }
  0x9d   :  { %906 = vrsqrt.f32 %v48_v14 }
  0xa7   :  { %v907_v17 = vpop.eup %906 }
  0xa8   :  { %v50_v18 = vmul.f32 %v907_v17, %v47_v16  ;;  %v904_v16 = vld [vmem:[%s1106_s1 + $0x38] sm:$0xff]  }
  0xaa   :  { %v56_v20 = vmul.f32 %v54_v15, %v50_v18  ;;  %v903_v15 = vld [vmem:[%s1106_s1 + $0x30] sm:$0xff]   ;;  %v905_v18 = vld [vmem:[%s1106_s1 + $0x40] sm:$0xff]  }
  0xac   :  { %v62_v22 = vadd.f32 %v60_v21, %v56_v20 }
  0xae   :  { %v63_v23 = vmax.f32 %v62_v22, 0.0 }
  0xb0   :  { %64 = vrot.lane.b32.xlu1 %v63_v23, %s915_s0  ;;  %77 = vrot.lane.b32.xlu0 %v63_v23, %s916_s3  ;;  %v347_v51 = vmul.f32 %v782_v43, %v63_v23 }
  0xb2   :  { %v348_v57 = vpack.c.bf16 %v347_v51, %v347_v51 }
  0xb4   :  { %201 = vrot.lane.b32.xlu1 %v63_v23, %s917_s4  ;;  %613 = vrot.lane.b32.xlu0 %v63_v23, %s918_s11  ;;  %v361_v1 = vand.u32 %v348_v57, %v1002_v38 }
  0xb8   :  { %270 = vrot.lane.b32.xlu1 %v63_v23, %s919_s12  ;;  %691 = vperm.xlu0 %896, %v683_v26  }
  0xbc   :  { %406 = vrot.lane.b32.xlu1 %v63_v23, %s920_s13 }
  0xc0   :  { %475 = vrot.lane.b32.xlu1 %v63_v23, %s921_s14 }
  0xc4   :  { %544 = vrot.lane.b32.xlu1 %v63_v23, %s922_s15 }
  0xc8   :  { %686 = vperm.xlu1 %895, %v682_v24  }
  0xcc   :  { %730 = vperm.xlu1 %895, %v696_v25  }
 0x122   :  { %v65_v29 = vpop.permute.xlu1 %64  ;;  %v78_v30 = vpop.permute.xlu0 %77 }
 0x123   :  { %v73_v31 = vmul.f32 %v760_v27, %v65_v29  ;;  %v87_v32 = vmul.f32 %v762_v28, %v78_v30 }
 0x125   :  { %v74_v36 = vpack.c.bf16 %v73_v31, %v73_v31  ;;  %v88_v37 = vpack.c.bf16 %v87_v32, %v87_v32 }
 0x126   :  { %v202_v39 = vpop.permute.xlu1 %201  ;;  %v614_v7 = vpop.permute.xlu0 %613 }
 0x127   :  { %v211_v40 = vmul.f32 %v770_v35, %v202_v39  ;;  %v106_v41 = vand.u32 %v1002_v38, %v88_v37  ;;  %v158_v42 = vand.u32 %v1002_v38, %v74_v36  ;;  %v623_v11 = vmul.f32 %v806_v6, %v614_v7 }
 0x129   :  { %v212_v47 = vpack.c.bf16 %v211_v40, %v211_v40  ;;  %830 = vmatpush3.bf16.msra.mxu0 %v106_v41  ;;  %836 = vmatpush3.bf16.msra.mxu1 %v158_v42  ;;  %v624_v14 = vpack.c.bf16 %v623_v11, %v623_v11 }
 0x12a   :  { %v271_v48 = vpop.permute.xlu1 %270  ;;  %841 = vmatprep.subr.bf16.mxu0 %v913_v19  ;;  %847 = vmatprep.subr.bf16.mxu1 %v913_v19 }
 0x12b   :  { %v225_v49 = vand.u32 %v212_v47, %v1002_v38  ;;  %v280_v50 = vmul.f32 %v776_v44, %v271_v48  ;;  %v637_v17 = vand.u32 %v624_v14, %v1002_v38  ;;  %v699_v14 = vld [vmem:[%s1110_s6 + $0x8] sm:$0xff] }
 0x12c   :  { %832 = vmatmul.mubr.msk.bf16.vlgmr.msra.gmra.mrb[0].mxu0 %vm97_vm4, %v897_v45  ;;  %838 = vmatmul.mubr.msk.bf16.vlgmr.msra.gmra.mrb[0].mxu1 %vm97_vm4, %v898_v46 }
 0x12d   :  { %v281_v53 = vpack.c.bf16 %v280_v50, %v280_v50  ;;  %842 = vmatpush3.bf16.msra.mxu0 %v225_v49  ;;  %843 = vmatprep.mubr.msk.bf16.mxu0 %vm914_vm1, %v913_v19 }
 0x12e   :  { %v407_v54 = vpop.permute.xlu1 %406  ;;  %853 = vmatprep.subr.bf16.mxu0 %v913_v19  ;;  %849 = vmatprep.mubr.msk.bf16.mxu1 %vm914_vm1, %v913_v19 }
 0x12f   :  { %v294_v55 = vand.u32 %v281_v53, %v1002_v38  ;;  %v416_v56 = vmul.f32 %v788_v52, %v407_v54 }
 0x131   :  { %v417_v61 = vpack.c.bf16 %v416_v56, %v416_v56  ;;  %848 = vmatpush3.bf16.msra.mxu1 %v294_v55 }
 0x132   :  { %v476_v62 = vpop.permute.xlu1 %475  ;;  %859 = vmatprep.subr.bf16.mxu1 %v913_v19 }
 0x133   :  { %v430_v63 = vand.u32 %v417_v61, %v1002_v38  ;;  %v485_v0 = vmul.f32 %v794_v58, %v476_v62 }
 0x134   :  { %844 = vmatmul.mubr.msk.bf16.vlgmr.msra.gmra.mrb[4].mxu0 %vm97_vm4, %v899_v59  ;;  %850 = vmatmul.mubr.msk.bf16.vlgmr.msra.gmra.mrb[4].mxu1 %vm97_vm4, %v900_v60 }
 0x135   :  { %854 = vmatpush3.bf16.msra.mxu0 %v361_v1  ;;  %860 = vmatpush3.bf16.msra.mxu1 %v430_v63  ;;  %v486_v4 = vpack.c.bf16 %v485_v0, %v485_v0 }
 0x136   :  { %v545_v3 = vpop.permute.xlu1 %544  ;;  %855 = vmatprep.mubr.msk.bf16.mxu0 %vm914_vm1, %v913_v19  ;;  %865 = vmatprep.subr.bf16.mxu0 %v913_v19 }
 0x137   :  { %v554_v5 = vmul.f32 %v800_v2, %v545_v3  ;;  %861 = vmatprep.mubr.msk.bf16.mxu1 %vm914_vm1, %v913_v19  ;;  %871 = vmatprep.subr.bf16.mxu1 %v913_v19  ;;  %v499_v12 = vand.u32 %v486_v4, %v1002_v38  ;;  %v692_v6 = vpop.permute.xlu0 %691 }
 0x139   :  { %v555_v10 = vpack.c.bf16 %v554_v5, %v554_v5 }
 0x13b   :  { %v568_v13 = vand.u32 %v555_v10, %v1002_v38 }
 0x13c   :  { %856 = vmatmul.mubr.msk.bf16.vlgmr.msra.gmra.mrb[8].mxu0 %vm97_vm4, %v901_v8  ;;  %862 = vmatmul.mubr.msk.bf16.vlgmr.msra.gmra.mrb[8].mxu1 %vm97_vm4, %v902_v9 }
 0x13d   :  { %866 = vmatpush3.bf16.msra.mxu0 %v499_v12  ;;  %872 = vmatpush3.bf16.msra.mxu1 %v568_v13  ;;  %v698_v13 = vld [vmem:[%s1110_s6] sm:$0xff] }
 0x13e   :  { %867 = vmatprep.mubr.msk.bf16.mxu0 %vm914_vm1, %v913_v19  ;;  %877 = vmatprep.subr.bf16.mxu0 %v913_v19 }
 0x13f   :  { %873 = vmatprep.mubr.msk.bf16.mxu1 %vm914_vm1, %v913_v19 }
 0x144   :  { %868 = vmatmul.mubr.msk.bf16.vlgmr.msra.gmra.mrb[12].mxu0 %vm97_vm4, %v903_v15  ;;  %874 = vmatmul.mubr.msk.bf16.vlgmr.msra.gmra.mrb[12].mxu1 %vm97_vm4, %v904_v16  ;;  %v697_v15 = vld [vmem:[%s1108_s5 + $0x8] sm:$0xff] }
 0x145   :  { %878 = vmatpush3.bf16.msra.mxu0 %v637_v17  ;;  %879 = vmatprep.mubr.msk.bf16.mxu0 %vm914_vm1, %v913_v19 }
 0x147   :  { %v687_v2 = vpop.permute.xlu1 %686 }
 0x14b   :  { %v731_v16 = vpop.permute.xlu1 %730 }
 0x14c   :  { %880 = vmatmul.mubr.msk.bf16.vlgmr.msra.gmra.mrb[16].mxu0 %vm97_vm4, %v905_v18 }
 0x1ff   :  { %v142_v20 = vpop.f32.mrb[0].mxu0  ;;  %v194_v21 = vpop.f32.mrb[0].mxu1 }
 0x200   :  { %v195_v22 = vadd.f32 %v194_v21, %v142_v20  ;;  %v833_v23 = vpop.f32.mrb[1].mxu0  ;;  %v839_v24 = vpop.f32.mrb[1].mxu1 }
 0x201   :  { %v145_v25 = vpop.f32.mrb[2].mxu0  ;;  %v197_v26 = vpop.f32.mrb[2].mxu1 }
 0x202   :  { %v198_v27 = vadd.f32 %v197_v26, %v145_v25  ;;  %v834_v28 = vpop.f32.mrb[3].mxu0  ;;  %v840_v29 = vpop.f32.mrb[3].mxu1 }
 0x207   :  { %v261_v30 = vpop.f32.mrb[4].mxu0  ;;  %v330_v31 = vpop.f32.mrb[4].mxu1 }
 0x208   :  { %v268_v32 = vadd.f32 %v261_v30, %v195_v22  ;;  %v845_v19 = vpop.f32.mrb[5].mxu0  ;;  %v851_v33 = vpop.f32.mrb[5].mxu1 }
 0x209   :  { %v264_v34 = vpop.f32.mrb[6].mxu0  ;;  %v333_v35 = vpop.f32.mrb[6].mxu1 }
 0x20a   :  { %v269_v36 = vadd.f32 %v264_v34, %v198_v27  ;;  %v337_v37 = vadd.f32 %v330_v31, %v268_v32  ;;  %v846_v38 = vpop.f32.mrb[7].mxu0  ;;  %v852_v39 = vpop.f32.mrb[7].mxu1 }
 0x20c   :  { %v338_v40 = vadd.f32 %v333_v35, %v269_v36 }
 0x20f   :  { %v397_v41 = vpop.f32.mrb[8].mxu0  ;;  %v466_v42 = vpop.f32.mrb[8].mxu1 }
 0x210   :  { %v404_v43 = vadd.f32 %v397_v41, %v337_v37  ;;  %v857_v44 = vpop.f32.mrb[9].mxu0  ;;  %v863_v45 = vpop.f32.mrb[9].mxu1 }
 0x211   :  { %v400_v46 = vpop.f32.mrb[10].mxu0  ;;  %v469_v47 = vpop.f32.mrb[10].mxu1 }
 0x212   :  { %v405_v48 = vadd.f32 %v400_v46, %v338_v40  ;;  %v473_v49 = vadd.f32 %v466_v42, %v404_v43  ;;  %v858_v50 = vpop.f32.mrb[11].mxu0  ;;  %v864_v51 = vpop.f32.mrb[11].mxu1 }
 0x214   :  { %v474_v52 = vadd.f32 %v469_v47, %v405_v48 }
 0x217   :  { %v535_v53 = vpop.f32.mrb[12].mxu0  ;;  %v604_v54 = vpop.f32.mrb[12].mxu1 }
 0x218   :  { %v542_v55 = vadd.f32 %v535_v53, %v473_v49  ;;  %v869_v56 = vpop.f32.mrb[13].mxu0  ;;  %v875_v57 = vpop.f32.mrb[13].mxu1 }
 0x219   :  { %v538_v58 = vpop.f32.mrb[14].mxu0  ;;  %v607_v59 = vpop.f32.mrb[14].mxu1 }
 0x21a   :  { %v543_v60 = vadd.f32 %v538_v58, %v474_v52  ;;  %v611_v61 = vadd.f32 %v604_v54, %v542_v55  ;;  %v870_v62 = vpop.f32.mrb[15].mxu0  ;;  %v876_v63 = vpop.f32.mrb[15].mxu1 }
 0x21c   :  { %v612_v0 = vadd.f32 %v607_v59, %v543_v60 }
 0x21f   :  { %v673_v1 = vpop.f32.mrb[16].mxu0 }
 0x220   :  { %v680_v3 = vadd.f32 %v673_v1, %v611_v61  ;;  %v881_v4 = vpop.f32.mrb[17].mxu0 }
 0x221   :  { %v676_v5 = vpop.f32.mrb[18].mxu0 }
 0x222   :  { %v694_v7 = vadd.f32 %v687_v2, %v680_v3  ;;  %v681_v8 = vadd.f32 %v676_v5, %v612_v0  ;;  %v882_v9 = vpop.f32.mrb[19].mxu0 }
 0x224   :  { %v695_v10 = vadd.f32 %v692_v6, %v681_v8  ;;  %700 = vadd.xlane.f32.xlu1 %v694_v7  ;;  %v706_v11 = vmul.f32 %v694_v7, %v694_v7 }
 0x226   :  { %702 = vadd.xlane.f32.xlu0 %v695_v10  ;;  %v707_v12 = vmul.f32 %v695_v10, %v695_v10 }
 0x228   :  { %708 = vadd.xlane.f32.xlu1 %v706_v11 }
 0x22a   :  { %710 = vadd.xlane.f32.xlu0 %v707_v12 }
 0x239   :  { %742 = vperm.xlu1 %895, %v698_v13  }
 0x23d   :  { %747 = vperm.xlu1 %895, %v699_v14  }
 0x240   :  { %735 = vperm.xlu0 %896, %v697_v15  }
 0x2b1   :  { %v701_v17 = vpop.xlane.xlu1 %700 }
 0x2b2   :  { %v704_v18 = vmul.f32 0.0078125, %v701_v17 }
 0x2b3   :  { %v703_v20 = vpop.xlane.xlu0 %702 }
 0x2b4   :  { %v705_v21 = vmul.f32 0.0078125, %v703_v20  ;;  %v714_v23 = vmul.f32 %v704_v18, %v704_v18  ;;  %v720_v33 = vsub.f32 %v694_v7, %v704_v18 }
 0x2b5   :  { %v709_v22 = vpop.xlane.xlu1 %708 }
 0x2b6   :  { %v712_v24 = vmul.f32 0.0078125, %v709_v22  ;;  %v715_v26 = vmul.f32 %v705_v21, %v705_v21  ;;  %v721_v36 = vsub.f32 %v695_v10, %v705_v21 }
 0x2b7   :  { %v711_v25 = vpop.xlane.xlu0 %710 }
 0x2b8   :  { %v716_v27 = vsub.f32 %v712_v24, %v714_v23  ;;  %v713_v28 = vmul.f32 0.0078125, %v711_v25 }
 0x2b9   :  { %v743_v35 = vpop.permute.xlu1 %742 }
 0x2ba   :  { %v718_v29 = vmax.f32 %v716_v27, 0.0  ;;  %v717_v30 = vsub.f32 %v713_v28, %v715_v26 }
 0x2bc   :  { %v722_v31 = vadd.f32 1e-05, %v718_v29  ;;  %v719_v32 = vmax.f32 %v717_v30, 0.0 }
 0x2bd   :  { %v748_v44 = vpop.permute.xlu1 %747 }
 0x2be   :  { %908 = vrsqrt.f32 %v722_v31  ;;  %v723_v19 = vadd.f32 1e-05, %v719_v32 }
 0x2bf   :  { %v736_v41 = vpop.permute.xlu0 %735 }
 0x2c0   :  { %910 = vrsqrt.f32 %v723_v19 }
 0x2c8   :  { %v909_v34 = vpop.eup %908 }
 0x2c9   :  { %v726_v37 = vmul.f32 %v909_v34, %v720_v33 }
 0x2ca   :  { %v911_v38 = vpop.eup %910 }
 0x2cb   :  { %v738_v39 = vmul.f32 %v731_v16, %v726_v37  ;;  %v727_v40 = vmul.f32 %v911_v38, %v721_v36 }
 0x2cd   :  { %v750_v42 = vadd.f32 %v743_v35, %v738_v39  ;;  %v739_v43 = vmul.f32 %v736_v41, %v727_v40 }
 0x2cf   :  { %v752_v45 = vmax.f32 %v750_v42, 0.0  ;;  %v751_v46 = vadd.f32 %v748_v44, %v739_v43 }
 0x2d1   :  { %754 = vst [vmem:[%s1111_s8] sm:$0xff] %v752_v45  ;;  %v753_v47 = vmax.f32 %v751_v46, 0.0 }
 0x2d3   :  { %755 = vst [vmem:[%s1111_s8 + $0x8] sm:$0xff] %v753_v47 }

// kernel: _lambda_.10
= control target key start
LH: loop header
LB: loop body
LE: loop exit
PB: predicated region body
PF: predicated region fallthrough
CT: control target
= control target key end

     0   :  { %s883_s23 = smov 0   ;;  %s943_s0 = inlined_call_operand.vmem [shape: f32[2,64,2], index: 0, kind: input, shape index: {}]   ;;  %s944_s1 = inlined_call_operand.vmem [shape: f32[2,2,16], index: 1, kind: input, shape index: {}]   ;;  %s945_s2 = inlined_call_operand.vmem [shape: f32[2,8,16], index: 2, kind: input, shape index: {}]   ;;  %s946_s3 = inlined_call_operand.vmem [shape: f32[2,16,64], index: 3, kind: input, shape index: {}]   ;;  %s947_s4 = inlined_call_operand.vmem [shape: bf16[16,8], index: 4, kind: input, shape index: {}]   ;;  %s948_s5 = inlined_call_operand.<no memory space> [shape: f32[1,1], index: 5, kind: input, shape index: {}]   ;;  %s949_s6 = inlined_call_operand.vmem [shape: f32[2,16,64], index: 6, kind: output, shape index: {}]  }
   0x1   :  { %v11_v0 = vstv %s948_s5 }
   0x2   :  { %12 = vst [vmem:[#allocation2] sm:$0x1] %v11_v0 }
   0x3 LB: > { %s722_s24 = sadd.s32 4294967295, %s840_s23   ;;  %p726_p0 = scmp.ge.s32.totalorder %s840_s23, 1  ;;  %s840_s23 = sphi %s883_s23, %s18_s23  }
   0x4   : > { %p242_p1 = scmp.lt.s32.totalorder %s840_s23, 3 }
   0x6   : > { %p243_p2 = pnand %p726_p0, %p242_p1 }
   0x7   : > { %p285_p3 = scmp.lt.s32.totalorder (!%p243_p2), %s722_s24, 1  ;;  %vm336_vm0 = vcmask (!%p243_p2), 1040384   ;;  %vm323_vm1 = vcmask (!%p243_p2), 15360   ;;  %vm405_vm2 = vcmask (!%p243_p2), 130048   ;;  %vm843_vm3 = vmmov (!%p243_p2), 0  }
   0x8   : > { %246 = sbr.rel (%p243_p2) target bundleno = 1027 (0x403), region = 44  ;;  %vm567_vm4 = vcmask (!%p243_p2), 1043456   ;;  %vm563_vm5 = vcmask (!%p243_p2), 64512   ;;  %vm628_vm6 = vcmask (!%p243_p2), 523264  }
   0xf   : > { %s951_s24 = smov (!%p285_p3, %s722_s24), 1 }
  0x10   : > { %s745_s5 = sshll.u32 %s951_s24, 6  ;;  %s729_s25 = sshll.u32 %s951_s24, 1 }
  0x11   : > { %s293_s28 = scalar_lea.vmem %s944_s1, %s729_s25  ;;  %s289_s7 = scalar_lea.vmem %s943_s0, %s745_s5 }
  0x12   : > { %v321_v1 = vld [vmem:[%s293_s28] sm:$0x3]  ;;  %v310_v3 = vld [vmem:[%s289_s7 + $0x8] sm:$0xff]  ;;  %v311_v6 = vld [vmem:[%s289_s7 + $0x10] sm:$0xff]  ;;  %s730_s8 = sshll.u32 %s951_s24, 3  ;;  %s746_s14 = sshll.u32 %s951_s24, 4 }
  0x13   : > { %v309_v2 = vld [vmem:[%s289_s7] sm:$0xff]  ;;  %v322_v4 = vpack.c.bf16 %v321_v1, %v321_v1  ;;  %v312_v7 = vld [vmem:[%s289_s7 + $0x18] sm:$0xff]  ;;  %v314_v9 = vld [vmem:[%s289_s7 + $0x28] sm:$0xff]  ;;  %s297_s11 = scalar_lea.vmem %s945_s2, %s730_s8  ;;  %s302_s17 = scalar_lea.vmem %s946_s3, %s746_s14 }
  0x14   : > { %v317_v5 = vpack.c.bf16 %v310_v3, %v309_v2  ;;  %v313_v8 = vld [vmem:[%s289_s7 + $0x20] sm:$0xff]  ;;  %v318_v11 = vpack.c.bf16 %v312_v7, %v311_v6  ;;  %v315_v13 = vld [vmem:[%s289_s7 + $0x30] sm:$0xff]  ;;  %v316_v14 = vld [vmem:[%s289_s7 + $0x38] sm:$0xff]  ;;  %s307_s20 = scalar_lea.vmem %s949_s6, %s746_s14 }
  0x15   : > { %788 = vmatprep.subr.msk.bf16.mxu0 %vm336_vm0, %v322_v4  ;;  %v338_v10 = vsel %vm336_vm0, %v322_v4, 0  ;;  %v319_v12 = vpack.c.bf16 %v314_v9, %v313_v8  ;;  %v320_v15 = vpack.c.bf16 %v316_v14, %v315_v13  ;;  %v842_v8 = vmov 0.0  }
  0x16   : > { %762 = vmatprep.mubr.msk.bf16.mxu0 %vm323_vm1, %v317_v5  ;;  %761 = vmatpush3.bf16.msra.mxu0 %v338_v10 }
  0x17   : > { %770 = vmatprep.subr.bf16.mxu1 %v842_v8  ;;  %782 = vmatprep.subr.bf16.mxu0 %v842_v8 }
  0x18   : > { %778 = vmatprep.mubr.msk.bf16.mxu1 %vm843_vm3, %v842_v8 }
  0x19   : > { %763 = vmatmul.mubr.msk.bf16.vlgmr.msra.gmra.mrb[0].mxu0 %vm323_vm1, %v318_v11 }
  0x1a   : > { %766 = vmatprep.mubr.msk.bf16.mxu0 %vm323_vm1, %v319_v12 }
  0x21   : > { %767 = vmatmul.mubr.msk.bf16.gmra.mrb[4].mxu0 %vm323_vm1, %v320_v15 }
  0x22   : > { %784 = vmatprep.mubr.msk.bf16.mxu0 %vm843_vm3, %v842_v8 }
  0xec   : > { %v764_v16 = vpop.f32.mrb[0].mxu0 }
  0xed   : > { %v374_v17 = vpop.f32.mrb[1].mxu0  ;;  %v412_v18 = vsel %vm405_vm2, %v764_v16, -inf }
  0xee   : > { %413 = vmax.xlane.f32.xlu1 %v412_v18  ;;  %v765_v19 = vpop.f32.mrb[2].mxu0  ;;  %v406_v20 = vsel %vm405_vm2, %v374_v17, -inf }
  0xef   : > { %407 = vmax.xlane.f32.xlu0 %v406_v20  ;;  %v377_v21 = vpop.f32.mrb[3].mxu0  ;;  %v415_v22 = vsel %vm405_vm2, %v765_v19, -inf }
  0xf0   : > { %v409_v23 = vsel %vm405_vm2, %v377_v21, -inf }
  0xf2   : > { %416 = vmax.xlane.f32.xlu1 %v415_v22 }
  0xf3   : > { %410 = vmax.xlane.f32.xlu0 %v409_v23 }
  0xf4   : > { %v768_v24 = vpop.f32.mrb[4].mxu0 }
  0xf5   : > { %v390_v25 = vpop.f32.mrb[5].mxu0  ;;  %v424_v30 = vsel %vm405_vm2, %v768_v24, -inf }
  0xf6   : > { %v769_v26 = vpop.f32.mrb[6].mxu0  ;;  %v418_v27 = vsel %vm405_vm2, %v390_v25, -inf }
  0xf7   : > { %419 = vmax.xlane.f32.xlu0 %v418_v27  ;;  %v393_v28 = vpop.f32.mrb[7].mxu0  ;;  %v427_v31 = vsel %vm405_vm2, %v769_v26, -inf }
  0xf8   : > { %v421_v29 = vsel %vm405_vm2, %v393_v28, -inf }
  0xf9   : > { %422 = vmax.xlane.f32.xlu1 %v421_v29 }
  0xfb   : > { %425 = vmax.xlane.f32.xlu0 %v424_v30 }
  0xfd   : > { %428 = vmax.xlane.f32.xlu1 %v427_v31 }
 0x17b   : > { %v414_v32 = vpop.xlane.xlu1 %413 }
 0x17c   : > { %v432_v33 = vsub.f32 %v764_v16, %v414_v32  ;;  %v408_v34 = vpop.xlane.xlu0 %407 }
 0x17d   : > { %v430_v35 = vsub.f32 %v374_v17, %v408_v34 }
 0x17e   : > { %v442_v36 = vmul.f32 1.442695, %v432_v33 }
 0x17f   : > { %v438_v37 = vmul.f32 1.442695, %v430_v35  ;;  %v417_v38 = vpop.xlane.xlu1 %416 }
 0x180   : > { %v433_v39 = vsub.f32 %v765_v19, %v417_v38  ;;  %v411_v40 = vpop.xlane.xlu0 %410 }
 0x181   : > { %802 = vpow2.f32 %v438_v37  ;;  %v431_v41 = vsub.f32 %v377_v21, %v411_v40 }
 0x182   : > { %804 = vpow2.f32 %v442_v36  ;;  %v444_v42 = vmul.f32 1.442695, %v433_v39 }
 0x183   : > { %v440_v43 = vmul.f32 1.442695, %v431_v41  ;;  %v494_v41 = vld [vmem:[%s297_s11] sm:$0xff] }
 0x184   : > { %v420_v44 = vpop.xlane.xlu0 %419 }
 0x185   : > { %806 = vpow2.f32 %v440_v43  ;;  %v434_v45 = vsub.f32 %v390_v25, %v420_v44  ;;  %v742_v43 = vld [vmem:[#allocation2] ss:$0 sm:$0xff]  ;;  %v844_v44 = vmov 0  }
 0x186   : > { %v423_v46 = vpop.xlane.xlu1 %422  ;;  %808 = vpow2.f32 %v444_v42  ;;  %v495_v42 = vpack.c.bf16 %v494_v41, %v494_v41  ;;  %800 = vset.pattern.permute.xlu0 %v844_v44 }
 0x187   : > { %v446_v47 = vmul.f32 1.442695, %v434_v45  ;;  %v435_v48 = vsub.f32 %v393_v28, %v423_v46 }
 0x188   : > { %v426_v49 = vpop.xlane.xlu0 %425 }
 0x189   : > { %810 = vpow2.f32 %v446_v47  ;;  %v448_v50 = vmul.f32 1.442695, %v435_v48  ;;  %v436_v51 = vsub.f32 %v768_v24, %v426_v49 }
 0x18a   : > { %v429_v52 = vpop.xlane.xlu1 %428 }
 0x18b   : > { %v803_v53 = vpop.eup %802  ;;  %812 = vpow2.f32 %v448_v50  ;;  %v450_v54 = vmul.f32 1.442695, %v436_v51  ;;  %v437_v55 = vsub.f32 %v769_v26, %v429_v52  ;;  %v801_v51 = vld [vmem:[%s947_s4] sm:$0xff]  }
 0x18c   : > { %v454_v56 = vsel %vm405_vm2, %v803_v53, 0.0  ;;  %v805_v57 = vpop.eup %804 }
 0x18d   : > { %814 = vpow2.f32 %v450_v54  ;;  %v452_v58 = vmul.f32 1.442695, %v437_v55  ;;  %455 = vadd.xlane.f32.xlu0 %v454_v56  ;;  %v460_v60 = vsel %vm405_vm2, %v805_v57, 0.0  ;;  %v624_v54 = vld [vmem:[%s302_s17] sm:$0xff] }
 0x18f   : > { %v807_v59 = vpop.eup %806  ;;  %816 = vpow2.f32 %v452_v58  ;;  %v625_v58 = vld [vmem:[%s302_s17 + $0x8] sm:$0xff] }
 0x190   : > { %v457_v61 = vsel %vm405_vm2, %v807_v59, 0.0  ;;  %v809_v62 = vpop.eup %808 }
 0x191   : > { %461 = vadd.xlane.f32.xlu0 %v460_v60  ;;  %458 = vadd.xlane.f32.xlu1 %v457_v61  ;;  %v463_v1 = vsel %vm405_vm2, %v809_v62, 0.0 }
 0x193   : > { %v811_v63 = vpop.eup %810 }
 0x194   : > { %v466_v0 = vsel %vm405_vm2, %v811_v63, 0.0 }
 0x195   : > { %v813_v2 = vpop.eup %812  ;;  %467 = vadd.xlane.f32.xlu0 %v466_v0  ;;  %464 = vadd.xlane.f32.xlu1 %v463_v1 }
 0x196   : > { %v469_v5 = vsel %vm405_vm2, %v813_v2, 0.0 }
 0x197   : > { %v815_v3 = vpop.eup %814 }
 0x198   : > { %v472_v4 = vsel %vm405_vm2, %v815_v3, 0.0 }
 0x199   : > { %v817_v6 = vpop.eup %816  ;;  %473 = vadd.xlane.f32.xlu0 %v472_v4  ;;  %470 = vadd.xlane.f32.xlu1 %v469_v5 }
 0x19a   : > { %v475_v7 = vsel %vm405_vm2, %v817_v6, 0.0 }
 0x19d   : > { %476 = vadd.xlane.f32.xlu1 %v475_v7 }
 0x1af   : > { %619 = vperm.xlu0 %800, %v742_v43  }
 0x21a   : > { %v456_v9 = vpop.xlane.xlu0 %455 }
 0x21b   : > { %818 = vrcp.f32 %v456_v9 }
 0x21e   : > { %v459_v10 = vpop.xlane.xlu1 %458  ;;  %v462_v11 = vpop.xlane.xlu0 %461 }
 0x21f   : > { %820 = vrcp.f32 %v459_v10 }
 0x220   : > { %822 = vrcp.f32 %v462_v11 }
 0x222   : > { %v465_v12 = vpop.xlane.xlu1 %464  ;;  %v468_v15 = vpop.xlane.xlu0 %467 }
 0x223   : > { %824 = vrcp.f32 %v465_v12 }
 0x225   : > { %v819_v14 = vpop.eup %818 }
 0x226   : > { %v471_v13 = vpop.xlane.xlu1 %470  ;;  %v486_v17 = vmul.f32 %v819_v14, %v803_v53  ;;  %v474_v25 = vpop.xlane.xlu0 %473 }
 0x227   : > { %826 = vrcp.f32 %v471_v13 }
 0x228   : > { %828 = vrcp.f32 %v468_v15 }
 0x229   : > { %v821_v16 = vpop.eup %820 }
 0x22a   : > { %v487_v18 = vmul.f32 %v821_v16, %v807_v59  ;;  %v823_v19 = vpop.eup %822  ;;  %v477_v22 = vpop.xlane.xlu1 %476 }
 0x22b   : > { %v488_v26 = vmul.f32 %v823_v19, %v805_v57  ;;  %830 = vrcp.f32 %v477_v22 }
 0x22c   : > { %v496_v20 = vpack.c.bf16 %v487_v18, %v486_v17  ;;  %832 = vrcp.f32 %v474_v25 }
 0x22d   : > { %v825_v21 = vpop.eup %824 }
 0x22e   : > { %v504_v23 = vsel %vm405_vm2, %v496_v20, 0  ;;  %v489_v24 = vmul.f32 %v825_v21, %v809_v62  ;;  %v620_v52 = vpop.permute.xlu0 %619 }
 0x22f   : > { %771 = vmatpush3.bf16.xpose.msra.mxu1 %v504_v23 }
 0x230   : > { %772 = vmatprep.subr.bf16.mxu1 %v842_v8  ;;  %v497_v27 = vpack.c.bf16 %v489_v24, %v488_v26 }
 0x231   : > { %v827_v28 = vpop.eup %826 }
 0x232   : > { %v829_v29 = vpop.eup %828  ;;  %v507_v30 = vsel %vm405_vm2, %v497_v27, 0  ;;  %v491_v31 = vmul.f32 %v827_v28, %v813_v2 }
 0x233   : > { %v490_v32 = vmul.f32 %v829_v29, %v811_v63 }
 0x235   : > { %v498_v33 = vpack.c.bf16 %v491_v31, %v490_v32  ;;  %v831_v34 = vpop.eup %830 }
 0x236   : > { %v833_v35 = vpop.eup %832  ;;  %v493_v37 = vmul.f32 %v831_v34, %v817_v6 }
 0x237   : > { %773 = vmatpush3.bf16.xpose.msra.mxu1 %v507_v30  ;;  %v510_v36 = vsel %vm405_vm2, %v498_v33, 0  ;;  %v492_v38 = vmul.f32 %v833_v35, %v815_v3 }
 0x238   : > { %774 = vmatprep.subr.bf16.mxu1 %v842_v8 }
 0x239   : > { %v499_v39 = vpack.c.bf16 %v493_v37, %v492_v38 }
 0x23b   : > { %v513_v40 = vsel %vm405_vm2, %v499_v39, 0 }
 0x23f   : > { %775 = vmatpush3.bf16.xpose.msra.mxu1 %v510_v36 }
 0x240   : > { %776 = vmatprep.subr.bf16.mxu1 %v842_v8 }
 0x247   : > { %777 = vmatpush3.bf16.xpose.msra.mxu1 %v513_v40 }
 0x24e   : > { %779 = vmatmul.mubr.msk.bf16.vlgmr.msra.gmra.mrb[0].mxu1 %vm405_vm2, %v495_v42 }
 0x321   : > { %v549_v45 = vpop.f32.mrb[0].mxu1 }
 0x322   : > { %v557_v46 = vpack.c.bf16 %v549_v45, %v549_v45  ;;  %v780_v47 = vpop.f32.mrb[1].mxu1 }
 0x323   : > { %v552_v48 = vpop.f32.mrb[2].mxu1 }
 0x324   : > { %v569_v49 = vsel %vm567_vm4, %v557_v46, 0  ;;  %v781_v50 = vpop.f32.mrb[3].mxu1 }
 0x325   : > { %783 = vmatpush3.bf16.msra.mxu0 %v569_v49 }
 0x328   : > { %785 = vmatmul.mubr.msk.bf16.vlgmr.msra.gmra.mrb[8].mxu0 %vm563_vm5, %v801_v51 }
 0x3fb   : > { %v605_v53 = vpop.f32.mrb[8].mxu0 }
 0x3fc   : > { %v786_v55 = vpop.f32.mrb[9].mxu0  ;;  %v622_v56 = vmul.f32 %v620_v52, %v605_v53 }
 0x3fd   : > { %v608_v57 = vpop.f32.mrb[10].mxu0 }
 0x3fe   : > { %v623_v59 = vmul.f32 %v620_v52, %v608_v57  ;;  %v626_v60 = vadd.f32 %v624_v54, %v622_v56  ;;  %v787_v61 = vpop.f32.mrb[11].mxu0 }
 0x400   : > { %v627_v62 = vadd.f32 %v625_v58, %v623_v59  ;;  %629 = vst.msk [vmem:[%s307_s20] sm:$0xff] %vm628_vm6, %v626_v60 }
 0x402   : > { %630 = vst.msk [vmem:[%s307_s20 + $0x8] sm:$0xff] %vm628_vm6, %v627_v62 }
 0x403 PF: > { %s18_s23 = sadd.s32 1, %s840_s23  }
 0x404   : > { %p15_p4 = scmp.ge.s32.totalorder %s18_s23, 4  }
 0x406   :  { %17 = sbr.rel (!%p15_p4) target bundleno = 3 (0x3), region = 83 }

// kernel: _lambda_.12
= control target key start
LH: loop header
LB: loop body
LE: loop exit
PB: predicated region body
PF: predicated region fallthrough
CT: control target
= control target key end

     0   :  { %v1550_v3 = vmov 0   ;;  %s1551_s30 = smov 16   ;;  %vm58_vm0 = vcmask 1041408   ;;  %vm54_vm1 = vcmask 162816   ;;  %s1555_s13 = smov 127   ;;  %v165_v30 = vlaneseq  ;;  %s1964_s0 = inlined_call_operand.vmem [shape: f32[8,512], index: 0, kind: input, shape index: {}]   ;;  %s1965_s1 = inlined_call_operand.vmem [shape: f32[20,512], index: 1, kind: input, shape index: {}]   ;;  %s1966_s4 = inlined_call_operand.vmem [shape: bf16[8,20], index: 4, kind: input, shape index: {}]   ;;  %s1967_s5 = inlined_call_operand.vmem [shape: f32[8,1], index: 5, kind: input, shape index: {}]   ;;  %s1968_s3 = inlined_call_operand.vmem [shape: f32[8,1], index: 3, kind: input, shape index: {}]   ;;  %s1969_s6 = inlined_call_operand.vmem [shape: f32[9,1,512], index: 6, kind: input, shape index: {}]   ;;  %s1970_s2 = inlined_call_operand.vmem [shape: bf16[9,8,8], index: 2, kind: input, shape index: {}]   ;;  %s1971_s7 = inlined_call_operand.vmem [shape: f32[8,512], index: 7, kind: output, shape index: {}]  }
   0x1   :  { %v1602_v0 = vld [vmem:[%s1964_s0 + $0x10] sm:$0xff]  ;;  %v1607_v1 = vld [vmem:[%s1964_s0] sm:$0xff]  ;;  %v1612_v2 = vld [vmem:[%s1964_s0 + $0x18] sm:$0xff]  ;;  %103 = vmatprep.mubr.bf16.mxu0 %v1550_v3  ;;  %144 = vmatprep.mubr.bf16.mxu1 %v1550_v3  ;;  %s1556_s14 = smov 113   ;;  %s1557_s15 = smov 112   ;;  %vm253_vm4 = vcmask 1043456  }
   0x2   :  { %207 = vrot.lane.b32.xlu1 %v1602_v0, %s1551_s30  ;;  %203 = vrot.lane.b32.xlu0 %v1607_v1, %s1551_s30  ;;  %v1621_v4 = vld [vmem:[%s1964_s0 + $0x8] sm:$0xff]  ;;  %v31_v7 = vld [vmem:[%s1965_s1 + $0x18] sm:$0xff]  ;;  %s1558_s16 = smov 111   ;;  %v175_v31 = vshrl.u32 %v165_v30, 7  ;;  %v1702_v32 = vand.u32 127, %v165_v30  ;;  %vm249_vm5 = vcmask 64512  }
   0x3   :  { %v29_v5 = vld [vmem:[%s1965_s1 + $0x8] sm:$0xff]  ;;  %v35_v8 = vld [vmem:[%s1965_s1 + $0x38] sm:$0xff]  ;;  %1548 = vset.pattern.permute.xlu0 %v1550_v3  ;;  %1549 = vset.pattern.permute.xlu1 %v1550_v3  ;;  %v28_v11 = vld [vmem:[%s1965_s1] sm:$0xff] }
   0x4   :  { %v33_v6 = vld [vmem:[%s1965_s1 + $0x28] sm:$0xff]  ;;  %v43_v10 = vpack.c.bf16 %v35_v8, %v31_v7  ;;  %v32_v12 = vld [vmem:[%s1965_s1 + $0x20] sm:$0xff]  ;;  %v30_v13 = vld [vmem:[%s1965_s1 + $0x10] sm:$0xff]  ;;  %v1704_v33 = vsub.s32 0, %v175_v31  ;;  %v1706_v34 = vsub.s32 3, %v175_v31  ;;  %v1708_v35 = vsub.s32 1, %v175_v31 }
   0x5   :  { %v41_v9 = vpack.c.bf16 %v33_v6, %v29_v5  ;;  %v40_v14 = vpack.c.bf16 %v32_v12, %v28_v11  ;;  %v34_v15 = vld [vmem:[%s1965_s1 + $0x30] sm:$0xff]  ;;  %v37_v16 = vld [vmem:[%s1965_s1 + $0x48] sm:$0xf]  ;;  %v39_v17 = vld [vmem:[%s1965_s1 + $0x58] sm:$0xf]  ;;  %v1710_v36 = vsub.s32 2, %v175_v31 }
   0x6   :  { %209 = vrot.lane.b32.xlu1 %v1612_v2, %s1551_s30  ;;  %205 = vrot.lane.b32.xlu0 %v1621_v4, %s1551_s30  ;;  %v42_v18 = vpack.c.bf16 %v34_v15, %v30_v13  ;;  %v45_v19 = vpack.c.bf16 %v37_v16, %v37_v16  ;;  %v47_v20 = vpack.c.bf16 %v39_v17, %v39_v17  ;;  %v36_v21 = vld [vmem:[%s1965_s1 + $0x40] sm:$0xf]  ;;  %v38_v22 = vld [vmem:[%s1965_s1 + $0x50] sm:$0xf]  ;;  %s1552_s30 = smov 17   ;;  %s1553_s1 = smov 15  }
   0x7   :  { %71 = vmatprep.subr.bf16.mxu0 %v41_v9  ;;  %112 = vmatprep.subr.bf16.mxu1 %v43_v10  ;;  %v44_v23 = vpack.c.bf16 %v36_v21, %v36_v21  ;;  %v46_v24 = vpack.c.bf16 %v38_v22, %v38_v22  ;;  %v27_v27 = vld [vmem:[%s1966_s4] sm:$0xf]  ;;  %s1554_s4 = smov 1   ;;  %v1487_v37 = vld [vmem:[%s1969_s6 + $0x4] sm:$0xf]  ;;  %vm211_vm2 = vcmp.lt.s32.totalorder %v1702_v32, 16 }
   0x8   :  { %72 = vmatpush1.bf16.msra.mxu0 %v40_v14  ;;  %113 = vmatpush1.bf16.msra.mxu1 %v42_v18  ;;  %v48_v28 = vld [vmem:[%s1967_s5] sm:$0xff]  ;;  %v222_v41 = vrot.slane %v1487_v37, %v1704_v33  ;;  %v234_v42 = vrot.slane %v1487_v37, %v1706_v34  ;;  %v226_v43 = vrot.slane %v1487_v37, %v1708_v35  ;;  %vm167_vm3 = vcmp.lt.s32.totalorder %v1702_v32, 17  ;;  %v1497_v10 = vld [vmem:[%s1969_s6 + $0x8] sm:$0xf] }
   0x9   :  { %1483 = vmatprep.subr.msk.bf16.mxu0 %vm58_vm0, %v45_v19  ;;  %1485 = vmatprep.subr.msk.bf16.mxu1 %vm58_vm0, %v47_v20  ;;  %v60_v25 = vsel %vm58_vm0, %v44_v23, 0  ;;  %v66_v26 = vsel %vm58_vm0, %v46_v24, 0  ;;  %v1465_v29 = vld [vmem:[%s1968_s3] sm:$0xff]  ;;  %v230_v44 = vrot.slane %v1487_v37, %v1710_v36  ;;  %v468_v18 = vrot.slane %v1497_v10, %v1708_v35 }
   0xa   :  { %159 = vrot.lane.b32.xlu1 %v1621_v4, %s1552_s30  ;;  %157 = vrot.lane.b32.xlu0 %v1607_v1, %s1552_s30  ;;  %v172_v40 = vld [vmem:[%s1969_s6] sm:$0xf]  ;;  %v1488_v11 = vld [vmem:[%s1970_s2 + $0x4] sm:$0xf]  ;;  %vm453_vm6 = vcmp.lt.s32.totalorder %v1702_v32, 15  ;;  %vm600_vm7 = vcmp.lt.s32.totalorder %v1702_v32, 1 }
   0xb   :  { %v181_v47 = vrot.slane %v172_v40, %v1708_v35  ;;  %v177_v63 = vrot.slane %v172_v40, %v1704_v33  ;;  %v185_v5 = vrot.slane %v172_v40, %v1710_v36  ;;  %v189_v9 = vrot.slane %v172_v40, %v1706_v34  ;;  %v202_v40 = vld [vmem:[%s1970_s2] sm:$0xf] }
   0xc   :  { %74 = vmatpush1.bf16.msra.mxu0 %v60_v25  ;;  %115 = vmatpush1.bf16.msra.mxu1 %v66_v26  ;;  %vm881_vm8 = vcmp.lt.s32.totalorder %v1702_v32, 127  ;;  %vm1028_vm9 = vcmp.lt.s32.totalorder %v1702_v32, 113  ;;  %vm1175_vm10 = vcmp.lt.s32.totalorder %v1702_v32, 112  ;;  %vm1322_vm11 = vcmp.lt.s32.totalorder %v1702_v32, 111  ;;  %v1528_v32 = vld [vmem:[%s1970_s2 + $0x1c] sm:$0xf] }
   0xe   :  { %163 = vrot.lane.b32.xlu1 %v1612_v2, %s1552_s30  ;;  %161 = vrot.lane.b32.xlu0 %v1602_v0, %s1552_s30 }
   0xf   :  { %1484 = vmatmul.mubr.msk.bf16.vlgmr.msra.gmra.mrb[0].mxu0 %vm54_vm1, %v27_v27  ;;  %1486 = vmatmul.mubr.msk.bf16.vlgmr.msra.gmra.mrb[0].mxu1 %vm54_vm1, %v27_v27 }
  0x10   :  { %298 = vmatprep.mubr.bf16.mxu0 %v1550_v3  ;;  %339 = vmatprep.mubr.bf16.mxu1 %v1550_v3 }
  0x12   :  { %447 = vrot.lane.b32.xlu1 %v1621_v4, %s1553_s1  ;;  %445 = vrot.lane.b32.xlu0 %v1607_v1, %s1553_s1 }
  0x16   :  { %451 = vrot.lane.b32.xlu1 %v1612_v2, %s1553_s1  ;;  %449 = vrot.lane.b32.xlu0 %v1602_v0, %s1553_s1 }
  0x1a   :  { %594 = vrot.lane.b32.xlu1 %v1621_v4, %s1554_s4  ;;  %592 = vrot.lane.b32.xlu0 %v1607_v1, %s1554_s4 }
  0x1e   :  { %598 = vrot.lane.b32.xlu1 %v1612_v2, %s1554_s4  ;;  %596 = vrot.lane.b32.xlu0 %v1602_v0, %s1554_s4 }
  0x22   :  { %875 = vrot.lane.b32.xlu1 %v1621_v4, %s1555_s13  ;;  %873 = vrot.lane.b32.xlu0 %v1607_v1, %s1555_s13 }
  0x26   :  { %879 = vrot.lane.b32.xlu1 %v1612_v2, %s1555_s13  ;;  %877 = vrot.lane.b32.xlu0 %v1602_v0, %s1555_s13 }
  0x2a   :  { %1022 = vrot.lane.b32.xlu1 %v1621_v4, %s1556_s14  ;;  %1020 = vrot.lane.b32.xlu0 %v1607_v1, %s1556_s14 }
  0x2e   :  { %1026 = vrot.lane.b32.xlu1 %v1612_v2, %s1556_s14  ;;  %1024 = vrot.lane.b32.xlu0 %v1602_v0, %s1556_s14 }
  0x32   :  { %1169 = vrot.lane.b32.xlu1 %v1621_v4, %s1557_s15  ;;  %1167 = vrot.lane.b32.xlu0 %v1607_v1, %s1557_s15 }
  0x36   :  { %1173 = vrot.lane.b32.xlu1 %v1612_v2, %s1557_s15  ;;  %1171 = vrot.lane.b32.xlu0 %v1602_v0, %s1557_s15 }
  0x3a   :  { %1316 = vrot.lane.b32.xlu1 %v1621_v4, %s1558_s16  ;;  %1314 = vrot.lane.b32.xlu0 %v1607_v1, %s1558_s16 }
  0x3e   :  { %1320 = vrot.lane.b32.xlu1 %v1612_v2, %s1558_s16  ;;  %1318 = vrot.lane.b32.xlu0 %v1602_v0, %s1558_s16 }
  0x42   :  { %51 = vperm.xlu0 %1548, %v48_v28   ;;  %1468 = vperm.xlu1 %1549, %v1465_v29   ;;  %v464_v28 = vrot.slane %v1497_v10, %v1704_v33  ;;  %v472_v29 = vrot.slane %v1497_v10, %v1710_v36 }
  0x74   :  { %v208_v38 = vpop.permute.xlu1 %207  ;;  %v204_v39 = vpop.permute.xlu0 %203 }
  0x78   :  { %v210_v45 = vpop.permute.xlu1 %209  ;;  %v206_v46 = vpop.permute.xlu0 %205 }
  0x79   :  { %v212_v48 = vsel %vm211_vm2, %v208_v38, %v210_v45  ;;  %v215_v49 = vsel %vm211_vm2, %v210_v45, %v204_v39  ;;  %v213_v50 = vsel %vm211_vm2, %v206_v46, %v208_v38  ;;  %v214_v51 = vsel %vm211_vm2, %v204_v39, %v206_v46  ;;  %v1503_v39 = vld [vmem:[%s1969_s6 + $0xc] sm:$0xf] }
  0x7a   :  { %v239_v52 = vmul.f32 %v222_v41, %v215_v49  ;;  %v242_v53 = vmul.f32 %v234_v42, %v212_v48  ;;  %v240_v54 = vmul.f32 %v226_v43, %v214_v51  ;;  %v241_v55 = vmul.f32 %v230_v44, %v213_v50  ;;  %v1509_v44 = vld [vmem:[%s1969_s6 + $0x10] sm:$0xf] }
  0x7b   :  { %v476_v38 = vrot.slane %v1497_v10, %v1706_v34  ;;  %v615_v48 = vrot.slane %v1503_v39, %v1708_v35  ;;  %v1498_v10 = vld [vmem:[%s1970_s2 + $0x8] sm:$0xf] }
  0x7c   :  { %v243_v56 = vpack.c.bf16 %v239_v52, %v239_v52  ;;  %v246_v57 = vpack.c.bf16 %v242_v53, %v242_v53  ;;  %v244_v58 = vpack.c.bf16 %v240_v54, %v240_v54  ;;  %v245_v59 = vpack.c.bf16 %v241_v55, %v241_v55  ;;  %v160_v60 = vpop.permute.xlu1 %159  ;;  %v158_v61 = vpop.permute.xlu0 %157 }
  0x7d   :  { %v170_v62 = vsel %vm167_vm3, %v158_v61, %v160_v60  ;;  %v749_v52 = vrot.slane %v1509_v44, %v1708_v35  ;;  %v757_v53 = vrot.slane %v1509_v44, %v1706_v34  ;;  %v745_v54 = vrot.slane %v1509_v44, %v1704_v33 }
  0x7e   :  { %v195_v6 = vmul.f32 %v181_v47, %v170_v62  ;;  %1489 = vmatprep.subr.msk.bf16.mxu0 %vm253_vm4, %v244_v58  ;;  %1491 = vmatprep.subr.msk.bf16.mxu1 %vm253_vm4, %v246_v57  ;;  %v255_v7 = vsel %vm253_vm4, %v243_v56, 0  ;;  %v261_v8 = vsel %vm253_vm4, %v245_v59, 0  ;;  %v611_v62 = vrot.slane %v1503_v39, %v1704_v33 }
  0x7f   :  { %267 = vmatpush1.bf16.msra.mxu0 %v255_v7  ;;  %308 = vmatpush1.bf16.msra.mxu1 %v261_v8  ;;  %v623_v8 = vrot.slane %v1503_v39, %v1706_v34 }
  0x80   :  { %v199_v12 = vpack.c.bf16 %v195_v6, %v195_v6  ;;  %v164_v13 = vpop.permute.xlu1 %163  ;;  %v162_v14 = vpop.permute.xlu0 %161 }
  0x81   :  { %v171_v15 = vsel %vm167_vm3, %v164_v13, %v158_v61  ;;  %v168_v16 = vsel %vm167_vm3, %v162_v14, %v164_v13  ;;  %v169_v17 = vsel %vm167_vm3, %v160_v60, %v162_v14  ;;  %v753_v60 = vrot.slane %v1509_v44, %v1710_v36 }
  0x82   :  { %v194_v19 = vmul.f32 %v177_v63, %v171_v15  ;;  %v196_v20 = vmul.f32 %v185_v5, %v169_v17  ;;  %v197_v21 = vmul.f32 %v189_v9, %v168_v16  ;;  %1490 = vmatmul.mubr.msk.bf16.vlgmr.msra.gmra.mrb[4].mxu0 %vm249_vm5, %v1488_v11  ;;  %1492 = vmatmul.mubr.msk.bf16.vlgmr.msra.gmra.mrb[4].mxu1 %vm249_vm5, %v1488_v11  ;;  %v1515_v9 = vld [vmem:[%s1969_s6 + $0x14] sm:$0xf] }
  0x83   :  { %1493 = vmatprep.subr.msk.bf16.mxu0 %vm253_vm4, %v199_v12  ;;  %395 = vmatprep.mubr.bf16.mxu0 %v1550_v3  ;;  %v619_v63 = vrot.slane %v1503_v39, %v1710_v36  ;;  %v763_v11 = vmul.f32 %v749_v52, %v1621_v4  ;;  %v765_v12 = vmul.f32 %v757_v53, %v1612_v2 }
  0x84   :  { %v198_v22 = vpack.c.bf16 %v194_v19, %v194_v19  ;;  %v200_v23 = vpack.c.bf16 %v196_v20, %v196_v20  ;;  %v201_v24 = vpack.c.bf16 %v197_v21, %v197_v21  ;;  %v448_v25 = vpop.permute.xlu1 %447  ;;  %v446_v26 = vpop.permute.xlu0 %445  ;;  %436 = vmatprep.mubr.bf16.mxu1 %v1550_v3  ;;  %v762_v13 = vmul.f32 %v745_v54, %v1607_v1 }
  0x85   :  { %v456_v27 = vsel %vm453_vm6, %v446_v26, %v448_v25  ;;  %v764_v17 = vmul.f32 %v753_v60, %v1602_v0  ;;  %v892_v4 = vrot.slane %v1515_v9, %v1704_v33  ;;  %v767_v0 = vpack.c.bf16 %v763_v11, %v763_v11 }
  0x86   :  { %v482_v30 = vmul.f32 %v468_v18, %v456_v27  ;;  %1495 = vmatprep.subr.msk.bf16.mxu1 %vm253_vm4, %v201_v24  ;;  %v352_v31 = vsel %vm253_vm4, %v198_v22, 0  ;;  %v358_v37 = vsel %vm253_vm4, %v200_v23, 0  ;;  %v769_v1 = vpack.c.bf16 %v765_v12, %v765_v12  ;;  %v1527_v12 = vld [vmem:[%s1969_s6 + $0x1c] sm:$0xf] }
  0x87   :  { %364 = vmatpush1.bf16.msra.mxu0 %v352_v31  ;;  %405 = vmatpush1.bf16.msra.mxu1 %v358_v37  ;;  %v766_v23 = vpack.c.bf16 %v762_v13, %v762_v13  ;;  %v904_v31 = vrot.slane %v1515_v9, %v1706_v34  ;;  %v896_v39 = vrot.slane %v1515_v9, %v1708_v35 }
  0x88   :  { %v486_v41 = vpack.c.bf16 %v482_v30, %v482_v30  ;;  %v452_v42 = vpop.permute.xlu1 %451  ;;  %v450_v43 = vpop.permute.xlu0 %449 }
  0x89   :  { %v457_v45 = vsel %vm453_vm6, %v452_v42, %v446_v26  ;;  %v454_v46 = vsel %vm453_vm6, %v450_v43, %v452_v42  ;;  %v455_v47 = vsel %vm453_vm6, %v448_v25, %v450_v43  ;;  %v1504_v42 = vld [vmem:[%s1970_s2 + $0xc] sm:$0xf] }
  0x8a   :  { %v481_v49 = vmul.f32 %v464_v28, %v457_v45  ;;  %v483_v50 = vmul.f32 %v472_v29, %v455_v47  ;;  %v484_v51 = vmul.f32 %v476_v38, %v454_v46  ;;  %1494 = vmatmul.mubr.msk.bf16.vlgmr.msra.gmra.mrb[8].mxu0 %vm249_vm5, %v202_v40  ;;  %1496 = vmatmul.mubr.msk.bf16.vlgmr.msra.gmra.mrb[8].mxu1 %vm249_vm5, %v202_v40  ;;  %v776_v45 = vsel %vm253_vm4, %v766_v23, 0  ;;  %v1521_v47 = vld [vmem:[%s1969_s6 + $0x18] sm:$0xf] }
  0x8b   :  { %1499 = vmatprep.subr.msk.bf16.mxu0 %vm253_vm4, %v486_v41  ;;  %538 = vmatprep.mubr.bf16.mxu0 %v1550_v3  ;;  %v768_v29 = vpack.c.bf16 %v764_v17, %v764_v17  ;;  %v900_v40 = vrot.slane %v1515_v9, %v1710_v36  ;;  %v1198_v23 = vrot.slane %v1527_v12, %v1706_v34 }
  0x8c   :  { %v485_v55 = vpack.c.bf16 %v481_v49, %v481_v49  ;;  %v487_v56 = vpack.c.bf16 %v483_v50, %v483_v50  ;;  %v488_v57 = vpack.c.bf16 %v484_v51, %v484_v51  ;;  %v595_v58 = vpop.permute.xlu1 %594  ;;  %v593_v59 = vpop.permute.xlu0 %592  ;;  %579 = vmatprep.mubr.bf16.mxu1 %v1550_v3 }
  0x8d   :  { %v603_v61 = vsel %vm600_vm7, %v593_v59, %v595_v58  ;;  %v782_v46 = vsel %vm253_vm4, %v768_v29, 0 }
  0x8e   :  { %v629_v5 = vmul.f32 %v615_v48, %v603_v61  ;;  %1501 = vmatprep.subr.msk.bf16.mxu1 %vm253_vm4, %v488_v57  ;;  %v495_v6 = vsel %vm253_vm4, %v485_v55, 0  ;;  %v501_v7 = vsel %vm253_vm4, %v487_v56, 0  ;;  %v1039_v55 = vrot.slane %v1521_v47, %v1704_v33 }
  0x8f   :  { %507 = vmatpush1.bf16.msra.mxu0 %v495_v6  ;;  %548 = vmatpush1.bf16.msra.mxu1 %v501_v7  ;;  %v1510_v7 = vld [vmem:[%s1970_s2 + $0x10] sm:$0xf] }
  0x90   :  { %v633_v14 = vpack.c.bf16 %v629_v5, %v629_v5  ;;  %v599_v15 = vpop.permute.xlu1 %598  ;;  %v597_v16 = vpop.permute.xlu0 %596  ;;  %v1047_v5 = vrot.slane %v1521_v47, %v1710_v36 }
  0x91   :  { %v604_v18 = vsel %vm600_vm7, %v599_v15, %v593_v59  ;;  %v601_v19 = vsel %vm600_vm7, %v597_v16, %v599_v15  ;;  %v602_v20 = vsel %vm600_vm7, %v595_v58, %v597_v16 }
  0x92   :  { %v628_v21 = vmul.f32 %v611_v62, %v604_v18  ;;  %v630_v2 = vmul.f32 %v619_v63, %v602_v20  ;;  %v631_v22 = vmul.f32 %v623_v8, %v601_v19  ;;  %1500 = vmatmul.mubr.msk.bf16.vlgmr.msra.gmra.mrb[12].mxu0 %vm249_vm5, %v1498_v10  ;;  %1502 = vmatmul.mubr.msk.bf16.vlgmr.msra.gmra.mrb[12].mxu1 %vm249_vm5, %v1498_v10 }
  0x93   :  { %1505 = vmatprep.subr.msk.bf16.mxu0 %vm253_vm4, %v633_v14  ;;  %685 = vmatprep.mubr.bf16.mxu0 %v1550_v3  ;;  %v1051_v62 = vrot.slane %v1521_v47, %v1706_v34  ;;  %v1043_v63 = vrot.slane %v1521_v47, %v1708_v35  ;;  %v1186_v20 = vrot.slane %v1527_v12, %v1704_v33 }
  0x94   :  { %v632_v24 = vpack.c.bf16 %v628_v21, %v628_v21  ;;  %v634_v25 = vpack.c.bf16 %v630_v2, %v630_v2  ;;  %v635_v26 = vpack.c.bf16 %v631_v22, %v631_v22  ;;  %v876_v27 = vpop.permute.xlu1 %875  ;;  %v874_v28 = vpop.permute.xlu0 %873  ;;  %726 = vmatprep.mubr.bf16.mxu1 %v1550_v3 }
  0x95   :  { %v884_v30 = vsel %vm881_vm8, %v874_v28, %v876_v27 }
  0x96   :  { %1507 = vmatprep.subr.msk.bf16.mxu1 %vm253_vm4, %v635_v26  ;;  %v642_v37 = vsel %vm253_vm4, %v632_v24, 0  ;;  %v648_v38 = vsel %vm253_vm4, %v634_v25, 0  ;;  %v909_v41 = vmul.f32 %v892_v4, %v884_v30  ;;  %v1190_v24 = vrot.slane %v1527_v12, %v1708_v35 }
  0x97   :  { %654 = vmatpush1.bf16.msra.mxu0 %v642_v37  ;;  %695 = vmatpush1.bf16.msra.mxu1 %v648_v38  ;;  %v1194_v25 = vrot.slane %v1527_v12, %v1710_v36  ;;  %v1533_v37 = vld [vmem:[%s1969_s6 + $0x20] sm:$0xf] }
  0x98   :  { %v880_v43 = vpop.permute.xlu1 %879  ;;  %v878_v44 = vpop.permute.xlu0 %877  ;;  %1511 = vmatprep.subr.msk.bf16.mxu0 %vm253_vm4, %v767_v0  ;;  %1513 = vmatprep.subr.msk.bf16.mxu1 %vm253_vm4, %v769_v1  ;;  %v913_v54 = vpack.c.bf16 %v909_v41, %v909_v41 }
  0x99   :  { %v885_v48 = vsel %vm881_vm8, %v880_v43, %v874_v28  ;;  %v882_v49 = vsel %vm881_vm8, %v878_v44, %v880_v43  ;;  %v883_v50 = vsel %vm881_vm8, %v876_v27, %v878_v44  ;;  %v1516_v27 = vld [vmem:[%s1970_s2 + $0x14] sm:$0xf] }
  0x9a   :  { %1506 = vmatmul.mubr.msk.bf16.vlgmr.msra.gmra.mrb[16].mxu0 %vm249_vm5, %v1504_v42  ;;  %1508 = vmatmul.mubr.msk.bf16.vlgmr.msra.gmra.mrb[16].mxu1 %vm249_vm5, %v1504_v42  ;;  %v912_v51 = vmul.f32 %v904_v31, %v885_v48  ;;  %v910_v52 = vmul.f32 %v896_v39, %v883_v50  ;;  %v911_v53 = vmul.f32 %v900_v40, %v882_v49  ;;  %v923_v8 = vsel %vm253_vm4, %v913_v54, 0 }
  0x9b   :  { %788 = vmatpush1.bf16.msra.mxu0 %v776_v45  ;;  %829 = vmatpush1.bf16.msra.mxu1 %v782_v46  ;;  %v1333_v45 = vrot.slane %v1533_v37, %v1704_v33  ;;  %v1337_v33 = vrot.slane %v1533_v37, %v1708_v35 }
  0x9c   :  { %v916_v56 = vpack.c.bf16 %v912_v51, %v912_v51  ;;  %v914_v57 = vpack.c.bf16 %v910_v52, %v910_v52  ;;  %v915_v58 = vpack.c.bf16 %v911_v53, %v911_v53  ;;  %v1023_v59 = vpop.permute.xlu1 %1022  ;;  %v1021_v60 = vpop.permute.xlu0 %1020  ;;  %819 = vmatprep.mubr.bf16.mxu0 %v1550_v3  ;;  %860 = vmatprep.mubr.bf16.mxu1 %v1550_v3 }
  0x9d   :  { %v1031_v61 = vsel %vm1028_vm9, %v1021_v60, %v1023_v59  ;;  %v1345_v52 = vrot.slane %v1533_v37, %v1706_v34  ;;  %v1341_v53 = vrot.slane %v1533_v37, %v1710_v36 }
  0x9e   :  { %1517 = vmatprep.subr.msk.bf16.mxu0 %vm253_vm4, %v914_v57  ;;  %1519 = vmatprep.subr.msk.bf16.mxu1 %vm253_vm4, %v916_v56  ;;  %v1056_v6 = vmul.f32 %v1039_v55, %v1031_v61  ;;  %v929_v11 = vsel %vm253_vm4, %v915_v58, 0  ;;  %v1522_v55 = vld [vmem:[%s1970_s2 + $0x18] sm:$0xf] }
  0xa0   :  { %v1027_v9 = vpop.permute.xlu1 %1026  ;;  %v1025_v10 = vpop.permute.xlu0 %1024  ;;  %v1060_v19 = vpack.c.bf16 %v1056_v6, %v1056_v6 }
  0xa1   :  { %v1032_v13 = vsel %vm1028_vm9, %v1027_v9, %v1021_v60  ;;  %v1029_v14 = vsel %vm1028_vm9, %v1025_v10, %v1027_v9  ;;  %v1030_v15 = vsel %vm1028_vm9, %v1023_v59, %v1025_v10  ;;  %v1534_v10 = vld [vmem:[%s1970_s2 + $0x20] sm:$0xf] }
  0xa2   :  { %1512 = vmatmul.mubr.msk.bf16.vlgmr.msra.gmra.mrb[20].mxu0 %vm249_vm5, %v1510_v7  ;;  %1514 = vmatmul.mubr.msk.bf16.vlgmr.msra.gmra.mrb[20].mxu1 %vm249_vm5, %v1510_v7  ;;  %v1059_v16 = vmul.f32 %v1051_v62, %v1032_v13  ;;  %v1057_v17 = vmul.f32 %v1043_v63, %v1030_v15  ;;  %v1058_v18 = vmul.f32 %v1047_v5, %v1029_v14  ;;  %v1070_v28 = vsel %vm253_vm4, %v1060_v19, 0 }
  0xa3   :  { %935 = vmatpush1.bf16.msra.mxu0 %v923_v8  ;;  %976 = vmatpush1.bf16.msra.mxu1 %v929_v11 }
  0xa4   :  { %v1063_v4 = vpack.c.bf16 %v1059_v16, %v1059_v16  ;;  %v1061_v21 = vpack.c.bf16 %v1057_v17, %v1057_v17  ;;  %v1062_v2 = vpack.c.bf16 %v1058_v18, %v1058_v18  ;;  %v1170_v22 = vpop.permute.xlu1 %1169  ;;  %v1168_v0 = vpop.permute.xlu0 %1167  ;;  %966 = vmatprep.mubr.bf16.mxu0 %v1550_v3  ;;  %1007 = vmatprep.mubr.bf16.mxu1 %v1550_v3 }
  0xa5   :  { %v1178_v1 = vsel %vm1175_vm10, %v1168_v0, %v1170_v22 }
  0xa6   :  { %1523 = vmatprep.subr.msk.bf16.mxu0 %vm253_vm4, %v1061_v21  ;;  %1525 = vmatprep.subr.msk.bf16.mxu1 %vm253_vm4, %v1063_v4  ;;  %v1203_v26 = vmul.f32 %v1186_v20, %v1178_v1  ;;  %v1076_v31 = vsel %vm253_vm4, %v1062_v2, 0 }
  0xa8   :  { %v1174_v29 = vpop.permute.xlu1 %1173  ;;  %v1172_v30 = vpop.permute.xlu0 %1171  ;;  %v1207_v44 = vpack.c.bf16 %v1203_v26, %v1203_v26 }
  0xa9   :  { %v1179_v38 = vsel %vm1175_vm10, %v1174_v29, %v1168_v0  ;;  %v1176_v39 = vsel %vm1175_vm10, %v1172_v30, %v1174_v29  ;;  %v1177_v40 = vsel %vm1175_vm10, %v1170_v22, %v1172_v30 }
  0xaa   :  { %1518 = vmatmul.mubr.msk.bf16.vlgmr.msra.gmra.mrb[24].mxu0 %vm249_vm5, %v1516_v27  ;;  %1520 = vmatmul.mubr.msk.bf16.vlgmr.msra.gmra.mrb[24].mxu1 %vm249_vm5, %v1516_v27  ;;  %v1206_v41 = vmul.f32 %v1198_v23, %v1179_v38  ;;  %v1204_v42 = vmul.f32 %v1190_v24, %v1177_v40  ;;  %v1205_v43 = vmul.f32 %v1194_v25, %v1176_v39  ;;  %v1217_v56 = vsel %vm253_vm4, %v1207_v44, 0 }
  0xab   :  { %1082 = vmatpush1.bf16.msra.mxu0 %v1070_v28  ;;  %1123 = vmatpush1.bf16.msra.mxu1 %v1076_v31 }
  0xac   :  { %v1210_v46 = vpack.c.bf16 %v1206_v41, %v1206_v41  ;;  %v1208_v47 = vpack.c.bf16 %v1204_v42, %v1204_v42  ;;  %v1209_v48 = vpack.c.bf16 %v1205_v43, %v1205_v43  ;;  %v1317_v49 = vpop.permute.xlu1 %1316  ;;  %v1315_v50 = vpop.permute.xlu0 %1314  ;;  %1113 = vmatprep.mubr.bf16.mxu0 %v1550_v3  ;;  %1154 = vmatprep.mubr.bf16.mxu1 %v1550_v3 }
  0xad   :  { %v1325_v51 = vsel %vm1322_vm11, %v1315_v50, %v1317_v49 }
  0xae   :  { %1529 = vmatprep.subr.msk.bf16.mxu0 %vm253_vm4, %v1208_v47  ;;  %1531 = vmatprep.subr.msk.bf16.mxu1 %vm253_vm4, %v1210_v46  ;;  %v1350_v54 = vmul.f32 %v1333_v45, %v1325_v51  ;;  %v1223_v59 = vsel %vm253_vm4, %v1209_v48, 0 }
  0xb0   :  { %v1321_v57 = vpop.permute.xlu1 %1320  ;;  %v1319_v58 = vpop.permute.xlu0 %1318  ;;  %v1354_v63 = vpack.c.bf16 %v1350_v54, %v1350_v54 }
  0xb1   :  { %v1326_v60 = vsel %vm1322_vm11, %v1321_v57, %v1315_v50  ;;  %v1323_v34 = vsel %vm1322_vm11, %v1319_v58, %v1321_v57  ;;  %v1324_v35 = vsel %vm1322_vm11, %v1317_v49, %v1319_v58 }
  0xb2   :  { %1524 = vmatmul.mubr.msk.bf16.vlgmr.msra.gmra.mrb[28].mxu0 %vm249_vm5, %v1522_v55  ;;  %1526 = vmatmul.mubr.msk.bf16.vlgmr.msra.gmra.mrb[28].mxu1 %vm249_vm5, %v1522_v55  ;;  %v1353_v36 = vmul.f32 %v1345_v52, %v1326_v60  ;;  %v1351_v61 = vmul.f32 %v1337_v33, %v1324_v35  ;;  %v1352_v62 = vmul.f32 %v1341_v53, %v1323_v34  ;;  %v1364_v8 = vsel %vm253_vm4, %v1354_v63, 0 }
  0xb3   :  { %1229 = vmatpush1.bf16.msra.mxu0 %v1217_v56  ;;  %1270 = vmatpush1.bf16.msra.mxu1 %v1223_v59 }
  0xb4   :  { %v1357_v5 = vpack.c.bf16 %v1353_v36, %v1353_v36  ;;  %v1355_v6 = vpack.c.bf16 %v1351_v61, %v1351_v61  ;;  %v1356_v7 = vpack.c.bf16 %v1352_v62, %v1352_v62  ;;  %1260 = vmatprep.mubr.bf16.mxu0 %v1550_v3  ;;  %1301 = vmatprep.mubr.bf16.mxu1 %v1550_v3 }
  0xb6   :  { %1535 = vmatprep.subr.msk.bf16.mxu0 %vm253_vm4, %v1355_v6  ;;  %1537 = vmatprep.subr.msk.bf16.mxu1 %vm253_vm4, %v1357_v5  ;;  %v1370_v9 = vsel %vm253_vm4, %v1356_v7, 0 }
  0xba   :  { %1530 = vmatmul.mubr.msk.bf16.vlgmr.msra.gmra.mrb[32].mxu0 %vm249_vm5, %v1528_v32  ;;  %1532 = vmatmul.mubr.msk.bf16.vlgmr.msra.gmra.mrb[32].mxu1 %vm249_vm5, %v1528_v32 }
  0xbb   :  { %1376 = vmatpush1.bf16.msra.mxu0 %v1364_v8  ;;  %1417 = vmatpush1.bf16.msra.mxu1 %v1370_v9 }
  0xbc   :  { %1407 = vmatprep.mubr.bf16.mxu0 %v1550_v3  ;;  %1448 = vmatprep.mubr.bf16.mxu1 %v1550_v3 }
  0xc2   :  { %1536 = vmatmul.mubr.msk.bf16.vlgmr.msra.gmra.mrb[36].mxu0 %vm249_vm5, %v1534_v10  ;;  %1538 = vmatmul.mubr.msk.bf16.vlgmr.msra.gmra.mrb[36].mxu1 %vm249_vm5, %v1534_v10 }
  0xe2   :  { %v1940_v11 = vpop.f32.mrb[0].mxu0  ;;  %v1942_v12 = vpop.f32.mrb[0].mxu1 }
  0xe3   :  { %v1944_v13 = vpop.f32.mrb[1].mxu0  ;;  %v1946_v14 = vpop.f32.mrb[1].mxu1 }
  0xe4   :  { %v109_v15 = vpop.f32.mrb[2].mxu0  ;;  %v150_v16 = vpop.f32.mrb[2].mxu1 }
  0xe5   :  { %v110_v17 = vpop.f32.mrb[3].mxu0  ;;  %v151_v3 = vpop.f32.mrb[3].mxu1 }
 0x155   :  { %v300_v18 = vpop.f32.mrb[4].mxu0  ;;  %v341_v19 = vpop.f32.mrb[4].mxu1 }
 0x156   :  { %v302_v20 = vpop.f32.mrb[5].mxu0  ;;  %v343_v4 = vpop.f32.mrb[5].mxu1 }
 0x157   :  { %v304_v21 = vpop.f32.mrb[6].mxu0  ;;  %v345_v2 = vpop.f32.mrb[6].mxu1 }
 0x158   :  { %v305_v22 = vpop.f32.mrb[7].mxu0  ;;  %v346_v0 = vpop.f32.mrb[7].mxu1 }
 0x15d   :  { %v397_v1 = vpop.f32.mrb[8].mxu0  ;;  %v438_v23 = vpop.f32.mrb[8].mxu1 }
 0x15e   :  { %v398_v24 = vadd.f32 %v397_v1, %v300_v18  ;;  %v439_v25 = vadd.f32 %v438_v23, %v341_v19  ;;  %v399_v26 = vpop.f32.mrb[9].mxu0  ;;  %v440_v27 = vpop.f32.mrb[9].mxu1 }
 0x15f   :  { %v400_v28 = vadd.f32 %v399_v26, %v302_v20  ;;  %v441_v29 = vadd.f32 %v440_v27, %v343_v4  ;;  %v401_v30 = vpop.f32.mrb[10].mxu0  ;;  %v442_v31 = vpop.f32.mrb[10].mxu1 }
 0x160   :  { %v402_v37 = vpop.f32.mrb[11].mxu0  ;;  %v443_v38 = vpop.f32.mrb[11].mxu1 }
 0x165   :  { %v540_v39 = vpop.f32.mrb[12].mxu0  ;;  %v581_v40 = vpop.f32.mrb[12].mxu1 }
 0x166   :  { %v588_v41 = vadd.f32 %v540_v39, %v398_v24  ;;  %v590_v42 = vadd.f32 %v581_v40, %v439_v25  ;;  %v542_v43 = vpop.f32.mrb[13].mxu0  ;;  %v583_v44 = vpop.f32.mrb[13].mxu1 }
 0x167   :  { %v589_v45 = vadd.f32 %v542_v43, %v400_v28  ;;  %v591_v46 = vadd.f32 %v583_v44, %v441_v29  ;;  %v544_v47 = vpop.f32.mrb[14].mxu0  ;;  %v585_v48 = vpop.f32.mrb[14].mxu1 }
 0x168   :  { %v545_v49 = vpop.f32.mrb[15].mxu0  ;;  %v586_v50 = vpop.f32.mrb[15].mxu1 }
 0x16d   :  { %v687_v51 = vpop.f32.mrb[16].mxu0  ;;  %v728_v52 = vpop.f32.mrb[16].mxu1 }
 0x16e   :  { %v735_v33 = vadd.f32 %v687_v51, %v588_v41  ;;  %v737_v53 = vadd.f32 %v728_v52, %v590_v42  ;;  %v689_v54 = vpop.f32.mrb[17].mxu0  ;;  %v730_v55 = vpop.f32.mrb[17].mxu1 }
 0x16f   :  { %v736_v56 = vadd.f32 %v689_v54, %v589_v45  ;;  %v738_v57 = vadd.f32 %v730_v55, %v591_v46  ;;  %v691_v58 = vpop.f32.mrb[18].mxu0  ;;  %v732_v59 = vpop.f32.mrb[18].mxu1 }
 0x170   :  { %v692_v60 = vpop.f32.mrb[19].mxu0  ;;  %v733_v34 = vpop.f32.mrb[19].mxu1 }
 0x171   :  { %v52_v51 = vpop.permute.xlu0 %51  ;;  %v1469_v52 = vpop.permute.xlu1 %1468 }
 0x172   :  { %v106_v54 = vadd.f32 %v1940_v11, %v52_v51  ;;  %v147_v55 = vadd.f32 %v1942_v12, %v52_v51  ;;  %v108_v60 = vadd.f32 %v1944_v13, %v52_v51  ;;  %v149_v34 = vadd.f32 %v1946_v14, %v52_v51 }
 0x175   :  { %v821_v35 = vpop.f32.mrb[20].mxu0  ;;  %v862_v36 = vpop.f32.mrb[20].mxu1 }
 0x176   :  { %v869_v61 = vadd.f32 %v821_v35, %v735_v33  ;;  %v871_v62 = vadd.f32 %v862_v36, %v737_v53  ;;  %v823_v63 = vpop.f32.mrb[21].mxu0  ;;  %v864_v5 = vpop.f32.mrb[21].mxu1 }
 0x177   :  { %v870_v6 = vadd.f32 %v823_v63, %v736_v56  ;;  %v872_v7 = vadd.f32 %v864_v5, %v738_v57  ;;  %v825_v32 = vpop.f32.mrb[22].mxu0  ;;  %v866_v8 = vpop.f32.mrb[22].mxu1 }
 0x178   :  { %v826_v9 = vpop.f32.mrb[23].mxu0  ;;  %v867_v10 = vpop.f32.mrb[23].mxu1 }
 0x17d   :  { %v968_v15 = vpop.f32.mrb[24].mxu0  ;;  %v1009_v16 = vpop.f32.mrb[24].mxu1 }
 0x17e   :  { %v1016_v17 = vadd.f32 %v968_v15, %v869_v61  ;;  %v1018_v3 = vadd.f32 %v1009_v16, %v871_v62  ;;  %v970_v18 = vpop.f32.mrb[25].mxu0  ;;  %v1011_v19 = vpop.f32.mrb[25].mxu1 }
 0x17f   :  { %v1017_v20 = vadd.f32 %v970_v18, %v870_v6  ;;  %v1019_v4 = vadd.f32 %v1011_v19, %v872_v7  ;;  %v972_v21 = vpop.f32.mrb[26].mxu0  ;;  %v1013_v2 = vpop.f32.mrb[26].mxu1 }
 0x180   :  { %v973_v22 = vpop.f32.mrb[27].mxu0  ;;  %v1014_v0 = vpop.f32.mrb[27].mxu1 }
 0x185   :  { %v1115_v1 = vpop.f32.mrb[28].mxu0  ;;  %v1156_v23 = vpop.f32.mrb[28].mxu1 }
 0x186   :  { %v1163_v24 = vadd.f32 %v1115_v1, %v1016_v17  ;;  %v1165_v25 = vadd.f32 %v1156_v23, %v1018_v3  ;;  %v1117_v26 = vpop.f32.mrb[29].mxu0  ;;  %v1158_v27 = vpop.f32.mrb[29].mxu1 }
 0x187   :  { %v1164_v28 = vadd.f32 %v1117_v26, %v1017_v20  ;;  %v1166_v29 = vadd.f32 %v1158_v27, %v1019_v4  ;;  %v1119_v30 = vpop.f32.mrb[30].mxu0  ;;  %v1160_v31 = vpop.f32.mrb[30].mxu1 }
 0x188   :  { %v1120_v37 = vpop.f32.mrb[31].mxu0  ;;  %v1161_v38 = vpop.f32.mrb[31].mxu1 }
 0x18d   :  { %v1262_v39 = vpop.f32.mrb[32].mxu0  ;;  %v1303_v40 = vpop.f32.mrb[32].mxu1 }
 0x18e   :  { %v1310_v41 = vadd.f32 %v1262_v39, %v1163_v24  ;;  %v1312_v42 = vadd.f32 %v1303_v40, %v1165_v25  ;;  %v1264_v43 = vpop.f32.mrb[33].mxu0  ;;  %v1305_v44 = vpop.f32.mrb[33].mxu1 }
 0x18f   :  { %v1311_v45 = vadd.f32 %v1264_v43, %v1164_v28  ;;  %v1313_v46 = vadd.f32 %v1305_v44, %v1166_v29  ;;  %v1266_v47 = vpop.f32.mrb[34].mxu0  ;;  %v1307_v48 = vpop.f32.mrb[34].mxu1 }
 0x190   :  { %v1267_v49 = vpop.f32.mrb[35].mxu0  ;;  %v1308_v50 = vpop.f32.mrb[35].mxu1 }
 0x195   :  { %v1409_v33 = vpop.f32.mrb[36].mxu0  ;;  %v1450_v53 = vpop.f32.mrb[36].mxu1 }
 0x196   :  { %v1457_v56 = vadd.f32 %v1409_v33, %v1310_v41  ;;  %v1459_v57 = vadd.f32 %v1450_v53, %v1312_v42  ;;  %v1411_v58 = vpop.f32.mrb[37].mxu0  ;;  %v1452_v59 = vpop.f32.mrb[37].mxu1 }
 0x197   :  { %v1458_v35 = vadd.f32 %v1411_v58, %v1311_v45  ;;  %v1460_v36 = vadd.f32 %v1452_v59, %v1313_v46  ;;  %v1413_v61 = vpop.f32.mrb[38].mxu0  ;;  %v1454_v62 = vpop.f32.mrb[38].mxu1 }
 0x198   :  { %v1461_v63 = vadd.f32 %v1457_v56, %v106_v54  ;;  %v1463_v5 = vadd.f32 %v1459_v57, %v147_v55  ;;  %v1414_v6 = vpop.f32.mrb[39].mxu0  ;;  %v1455_v7 = vpop.f32.mrb[39].mxu1 }
 0x199   :  { %v1462_v32 = vadd.f32 %v1458_v35, %v108_v60  ;;  %v1464_v11 = vadd.f32 %v1460_v36, %v149_v34 }
 0x19a   :  { %v1471_v8 = vadd.f32 %v1469_v52, %v1461_v63  ;;  %v1473_v12 = vadd.f32 %v1469_v52, %v1463_v5 }
 0x19b   :  { %v1472_v9 = vadd.f32 %v1469_v52, %v1462_v32  ;;  %v1474_v10 = vadd.f32 %v1469_v52, %v1464_v11 }
 0x19c   :  { %1475 = vst [vmem:[%s1971_s7] sm:$0xff] %v1471_v8  ;;  %1477 = vst [vmem:[%s1971_s7 + $0x10] sm:$0xff] %v1473_v12 }
 0x19d   :  { %1476 = vst [vmem:[%s1971_s7 + $0x8] sm:$0xff] %v1472_v9  ;;  %1478 = vst [vmem:[%s1971_s7 + $0x18] sm:$0xff] %v1474_v10 }

// kernel: _lambda_.13
= control target key start
LH: loop header
LB: loop body
LE: loop exit
PB: predicated region body
PF: predicated region fallthrough
CT: control target
= control target key end

     0   :  { %v1487_v3 = vmov 0   ;;  %s1491_s9 = smov 1   ;;  %s1492_s10 = smov 127   ;;  %v90_v49 = vlaneseq  ;;  %vm178_vm1 = vcmask 1043456   ;;  %vm174_vm3 = vcmask 64512   ;;  %s1876_s0 = inlined_call_operand.vmem [shape: f32[8,512], index: 0, kind: input, shape index: {}]   ;;  %s1877_s3 = inlined_call_operand.vmem [shape: f32[8,1], index: 3, kind: input, shape index: {}]   ;;  %s1878_s4 = inlined_call_operand.vmem [shape: f32[8,1], index: 4, kind: input, shape index: {}]   ;;  %s1879_s2 = inlined_call_operand.vmem [shape: f32[3,1], index: 2, kind: input, shape index: {}]   ;;  %s1880_s5 = inlined_call_operand.vmem [shape: f32[9,1,512], index: 5, kind: input, shape index: {}]   ;;  %s1881_s1 = inlined_call_operand.vmem [shape: bf16[9,3,8], index: 1, kind: input, shape index: {}]   ;;  %s1882_s6 = inlined_call_operand.vmem [shape: f32[3,512], index: 6, kind: output, shape index: {}]  }
   0x1   :  { %v24_v0 = vld [vmem:[%s1876_s0] sm:$0xff]  ;;  %v25_v1 = vld [vmem:[%s1876_s0 + $0x8] sm:$0xff]  ;;  %v26_v2 = vld [vmem:[%s1876_s0 + $0x10] sm:$0xff]  ;;  %1475 = vset.pattern.permute.xlu1 %v1487_v3  ;;  %223 = vmatprep.mubr.bf16.mxu0 %v1487_v3  ;;  %s1493_s11 = smov 113   ;;  %s1494_s12 = smov 112  }
   0x2   :  { %v30_v4 = vadd.f32 %v25_v1, %v24_v0  ;;  %v37_v5 = vmul.f32 %v24_v0, %v24_v0  ;;  %v38_v6 = vmul.f32 %v25_v1, %v25_v1  ;;  %v39_v7 = vmul.f32 %v26_v2, %v26_v2  ;;  %v28_v8 = vld [vmem:[%s1877_s3] sm:$0xff]  ;;  %264 = vmatprep.mubr.bf16.mxu1 %v1487_v3  ;;  %v27_v9 = vld [vmem:[%s1876_s0 + $0x18] sm:$0xff]  ;;  %s1488_s0 = smov 16   ;;  %s1489_s3 = smov 17  }
   0x3   :  { %62 = vperm.xlu1 %1475, %v28_v8   ;;  %1476 = vset.pattern.permute.xlu0 %v1487_v3  ;;  %v40_v11 = vmul.f32 %v27_v9, %v27_v9  ;;  %v29_v13 = vld [vmem:[%s1878_s4] sm:$0xff]  ;;  %s1490_s4 = smov 15   ;;  %s1495_s13 = smov 111   ;;  %v100_v50 = vshrl.u32 %v90_v49, 7  ;;  %v1596_v51 = vand.u32 127, %v90_v49 }
   0x4   :  { %v31_v10 = vadd.f32 %v30_v4, %v26_v2  ;;  %v41_v12 = vadd.f32 %v38_v6, %v37_v5  ;;  %v1386_v48 = vld [vmem:[%s1879_s2] sm:$0x7]  ;;  %v1414_v52 = vld [vmem:[%s1880_s5 + $0x4] sm:$0xf] }
   0x5   :  { %v1601_v53 = vsub.s32 1, %v100_v50  ;;  %vm136_vm0 = vcmp.lt.s32.totalorder %v1596_v51, 16  ;;  %v1605_v57 = vsub.s32 2, %v100_v50  ;;  %vm92_vm2 = vcmp.lt.s32.totalorder %v1596_v51, 17 }
   0x6   :  { %v32_v14 = vadd.f32 %v31_v10, %v27_v9  ;;  %v42_v15 = vadd.f32 %v41_v12, %v39_v7  ;;  %v97_v7 = vld [vmem:[%s1880_s5] sm:$0xf]  ;;  %vm378_vm4 = vcmp.lt.s32.totalorder %v1596_v51, 15  ;;  %vm525_vm5 = vcmp.lt.s32.totalorder %v1596_v51, 1 }
   0x7   :  { %71 = vperm.xlu1 %1475, %v29_v13   ;;  %v151_v54 = vrot.slane %v1414_v52, %v1601_v53  ;;  %v155_v59 = vrot.slane %v1414_v52, %v1605_v57  ;;  %vm806_vm6 = vcmp.lt.s32.totalorder %v1596_v51, 127  ;;  %vm953_vm7 = vcmp.lt.s32.totalorder %v1596_v51, 113 }
   0x8   :  { %33 = vadd.xlane.f32.xlu0 %v32_v14  ;;  %v43_v16 = vadd.f32 %v42_v15, %v40_v11  ;;  %vm1100_vm8 = vcmp.lt.s32.totalorder %v1596_v51, 112  ;;  %vm1247_vm9 = vcmp.lt.s32.totalorder %v1596_v51, 111 }
   0xc   :  { %44 = vadd.xlane.f32.xlu0 %v43_v16 }
  0x82   :  { %v63_v25 = vpop.permute.xlu1 %62 }
  0x86   :  { %v72_v39 = vpop.permute.xlu1 %71 }
  0x95   :  { %v34_v17 = vpop.xlane.xlu0 %33 }
  0x96   :  { %v36_v18 = vmul.f32 0.001953125, %v34_v17 }
  0x98   :  { %v47_v20 = vmul.f32 %v36_v18, %v36_v18  ;;  %v50_v26 = vsub.f32 %v24_v0, %v36_v18  ;;  %v51_v27 = vsub.f32 %v25_v1, %v36_v18  ;;  %v52_v28 = vsub.f32 %v26_v2, %v36_v18 }
  0x99   :  { %v45_v19 = vpop.xlane.xlu0 %44  ;;  %v53_v29 = vsub.f32 %v27_v9, %v36_v18  ;;  %v1610_v0 = vsub.s32 0, %v100_v50  ;;  %v1612_v1 = vsub.s32 3, %v100_v50 }
  0x9a   :  { %v46_v21 = vmul.f32 0.001953125, %v45_v19 }
  0x9b   :  { %v147_v5 = vrot.slane %v1414_v52, %v1610_v0  ;;  %v159_v6 = vrot.slane %v1414_v52, %v1612_v1  ;;  %v102_v13 = vrot.slane %v97_v7, %v1610_v0 }
  0x9c   :  { %v48_v22 = vsub.f32 %v46_v21, %v47_v20 }
  0x9e   :  { %v49_v23 = vmax.f32 %v48_v22, 0.0 }
  0xa0   :  { %v54_v24 = vadd.f32 1e-05, %v49_v23 }
  0xa2   :  { %1477 = vrsqrt.f32 %v54_v24  ;;  %v106_v24 = vrot.slane %v97_v7, %v1601_v53 }
  0xac   :  { %v1478_v30 = vpop.eup %1477 }
  0xad   :  { %v56_v31 = vmul.f32 %v1478_v30, %v50_v26  ;;  %v57_v32 = vmul.f32 %v1478_v30, %v51_v27  ;;  %v58_v33 = vmul.f32 %v1478_v30, %v52_v28  ;;  %v59_v34 = vmul.f32 %v1478_v30, %v53_v29 }
  0xae   :  { %v110_v29 = vrot.slane %v97_v7, %v1605_v57 }
  0xaf   :  { %v65_v35 = vmul.f32 %v63_v25, %v56_v31  ;;  %v66_v36 = vmul.f32 %v63_v25, %v57_v32  ;;  %v67_v37 = vmul.f32 %v63_v25, %v58_v33  ;;  %v68_v38 = vmul.f32 %v63_v25, %v59_v34  ;;  %v1415_v25 = vld [vmem:[%s1881_s1 + $0x2] sm:$0x3]  ;;  %v1424_v33 = vld [vmem:[%s1880_s5 + $0x8] sm:$0xf] }
  0xb0   :  { %v114_v32 = vrot.slane %v97_v7, %v1612_v1 }
  0xb1   :  { %v74_v40 = vadd.f32 %v72_v39, %v65_v35  ;;  %v75_v41 = vadd.f32 %v72_v39, %v66_v36  ;;  %v76_v42 = vadd.f32 %v72_v39, %v67_v37  ;;  %v77_v43 = vadd.f32 %v72_v39, %v68_v38 }
  0xb2   :  { %v389_v39 = vrot.slane %v1424_v33, %v1610_v0 }
  0xb3   :  { %v1553_v44 = vmax.f32 %v74_v40, 0.0  ;;  %v1555_v45 = vmax.f32 %v75_v41, 0.0  ;;  %v1559_v46 = vmax.f32 %v76_v42, 0.0  ;;  %v1561_v47 = vmax.f32 %v77_v43, 0.0 }
  0xb4   :  { %v393_v43 = vrot.slane %v1424_v33, %v1601_v53 }
  0xb5   :  { %130 = vrot.lane.b32.xlu1 %v1555_v45, %s1488_s0  ;;  %128 = vrot.lane.b32.xlu0 %v1553_v44, %s1488_s0 }
  0xb9   :  { %132 = vrot.lane.b32.xlu1 %v1559_v46, %s1488_s0  ;;  %88 = vrot.lane.b32.xlu0 %v1561_v47, %s1489_s3 }
  0xbd   :  { %134 = vrot.lane.b32.xlu1 %v1561_v47, %s1488_s0  ;;  %372 = vrot.lane.b32.xlu0 %v1555_v45, %s1490_s4 }
  0xc1   :  { %82 = vrot.lane.b32.xlu1 %v1553_v44, %s1489_s3  ;;  %376 = vrot.lane.b32.xlu0 %v1561_v47, %s1490_s4 }
  0xc5   :  { %84 = vrot.lane.b32.xlu1 %v1555_v45, %s1489_s3  ;;  %519 = vrot.lane.b32.xlu0 %v1555_v45, %s1491_s9 }
  0xc9   :  { %86 = vrot.lane.b32.xlu1 %v1559_v46, %s1489_s3  ;;  %523 = vrot.lane.b32.xlu0 %v1561_v47, %s1491_s9 }
  0xcd   :  { %370 = vrot.lane.b32.xlu1 %v1553_v44, %s1490_s4  ;;  %800 = vrot.lane.b32.xlu0 %v1555_v45, %s1492_s10 }
  0xd1   :  { %374 = vrot.lane.b32.xlu1 %v1559_v46, %s1490_s4  ;;  %804 = vrot.lane.b32.xlu0 %v1561_v47, %s1492_s10 }
  0xd5   :  { %517 = vrot.lane.b32.xlu1 %v1553_v44, %s1491_s9  ;;  %947 = vrot.lane.b32.xlu0 %v1555_v45, %s1493_s11 }
  0xd9   :  { %521 = vrot.lane.b32.xlu1 %v1559_v46, %s1491_s9  ;;  %951 = vrot.lane.b32.xlu0 %v1561_v47, %s1493_s11 }
  0xdd   :  { %798 = vrot.lane.b32.xlu1 %v1553_v44, %s1492_s10  ;;  %1094 = vrot.lane.b32.xlu0 %v1555_v45, %s1494_s12 }
  0xe1   :  { %802 = vrot.lane.b32.xlu1 %v1559_v46, %s1492_s10  ;;  %1098 = vrot.lane.b32.xlu0 %v1561_v47, %s1494_s12 }
  0xe5   :  { %945 = vrot.lane.b32.xlu1 %v1553_v44, %s1493_s11  ;;  %1241 = vrot.lane.b32.xlu0 %v1555_v45, %s1495_s13 }
  0xe9   :  { %949 = vrot.lane.b32.xlu1 %v1559_v46, %s1493_s11  ;;  %1245 = vrot.lane.b32.xlu0 %v1561_v47, %s1495_s13 }
  0xed   :  { %1092 = vrot.lane.b32.xlu1 %v1553_v44, %s1494_s12 }
  0xf1   :  { %1096 = vrot.lane.b32.xlu1 %v1559_v46, %s1494_s12 }
  0xf5   :  { %1239 = vrot.lane.b32.xlu1 %v1553_v44, %s1495_s13 }
  0xf9   :  { %1243 = vrot.lane.b32.xlu1 %v1559_v46, %s1495_s13 }
  0xfd   :  { %1389 = vperm.xlu1 %1475, %v1386_v48   ;;  %v127_v48 = vld [vmem:[%s1881_s1] sm:$0x3] }
 0x127   :  { %v131_v55 = vpop.permute.xlu1 %130  ;;  %v129_v56 = vpop.permute.xlu0 %128 }
 0x128   :  { %v139_v58 = vsel %vm136_vm0, %v129_v56, %v131_v55 }
 0x129   :  { %v165_v60 = vmul.f32 %v151_v54, %v139_v58  ;;  %v397_v58 = vrot.slane %v1424_v33, %v1605_v57 }
 0x12b   :  { %v133_v61 = vpop.permute.xlu1 %132  ;;  %v89_v62 = vpop.permute.xlu0 %88  ;;  %v169_v63 = vpack.c.bf16 %v165_v60, %v165_v60 }
 0x12c   :  { %v138_v2 = vsel %vm136_vm0, %v131_v55, %v133_v61 }
 0x12d   :  { %v166_v4 = vmul.f32 %v155_v59, %v138_v2  ;;  %1416 = vmatprep.subr.msk.bf16.mxu0 %vm178_vm1, %v169_v63  ;;  %v1436_v59 = vld [vmem:[%s1880_s5 + $0x10] sm:$0xf]  ;;  %v401_v63 = vrot.slane %v1424_v33, %v1612_v1  ;;  %v1430_v2 = vld [vmem:[%s1880_s5 + $0xc] sm:$0xf] }
 0x12f   :  { %v135_v8 = vpop.permute.xlu1 %134  ;;  %v1622_v9 = vpop.permute.xlu0 %372  ;;  %v170_v15 = vpack.c.bf16 %v166_v4, %v166_v4 }
 0x130   :  { %v137_v10 = vsel %vm136_vm0, %v133_v61, %v135_v8  ;;  %v140_v11 = vsel %vm136_vm0, %v135_v8, %v129_v56  ;;  %v674_v8 = vrot.slane %v1436_v59, %v1601_v53 }
 0x131   :  { %v164_v12 = vmul.f32 %v147_v5, %v140_v11  ;;  %v167_v14 = vmul.f32 %v159_v6, %v137_v10  ;;  %v186_v23 = vsel %vm178_vm1, %v170_v15, 0  ;;  %v670_v10 = vrot.slane %v1436_v59, %v1610_v0 }
 0x133   :  { %v83_v16 = vpop.permute.xlu1 %82  ;;  %v1630_v17 = vpop.permute.xlu0 %376  ;;  %v171_v18 = vpack.c.bf16 %v167_v14, %v167_v14  ;;  %v168_v19 = vpack.c.bf16 %v164_v12, %v164_v12 }
 0x134   :  { %v96_v20 = vsel %vm92_vm2, %v89_v62, %v83_v16 }
 0x135   :  { %v119_v21 = vmul.f32 %v102_v13, %v96_v20  ;;  %1418 = vmatprep.subr.msk.bf16.mxu1 %vm178_vm1, %v171_v18  ;;  %v180_v22 = vsel %vm178_vm1, %v168_v19, 0  ;;  %v536_v13 = vrot.slane %v1430_v2, %v1610_v0  ;;  %v540_v18 = vrot.slane %v1430_v2, %v1601_v53 }
 0x136   :  { %192 = vmatpush1.bf16.msra.mxu0 %v180_v22  ;;  %233 = vmatpush1.bf16.msra.mxu1 %v186_v23  ;;  %v678_v19 = vrot.slane %v1436_v59, %v1605_v57  ;;  %v688_v23 = vmul.f32 %v674_v8, %v1555_v45  ;;  %v548_v45 = vrot.slane %v1430_v2, %v1612_v1 }
 0x137   :  { %v85_v26 = vpop.permute.xlu1 %84  ;;  %v1641_v27 = vpop.permute.xlu0 %519  ;;  %v123_v30 = vpack.c.bf16 %v119_v21, %v119_v21 }
 0x138   :  { %v95_v28 = vsel %vm92_vm2, %v83_v16, %v85_v26 }
 0x139   :  { %v120_v31 = vmul.f32 %v106_v24, %v95_v28  ;;  %1417 = vmatmul.mubr.msk.bf16.vlgmr.msra.gmra.mrb[0].mxu0 %vm174_vm3, %v1415_v25  ;;  %1419 = vmatmul.mubr.msk.bf16.vlgmr.msra.gmra.mrb[0].mxu1 %vm174_vm3, %v1415_v25  ;;  %v277_v42 = vsel %vm178_vm1, %v123_v30, 0  ;;  %v687_v24 = vmul.f32 %v670_v10, %v1553_v44  ;;  %v544_v28 = vrot.slane %v1430_v2, %v1605_v57 }
 0x13a   :  { %320 = vmatprep.mubr.bf16.mxu0 %v1487_v3  ;;  %361 = vmatprep.mubr.bf16.mxu1 %v1487_v3 }
 0x13b   :  { %v124_v34 = vpack.c.bf16 %v120_v31, %v120_v31  ;;  %v87_v35 = vpop.permute.xlu1 %86  ;;  %v1654_v36 = vpop.permute.xlu0 %523 }
 0x13c   :  { %v93_v37 = vsel %vm92_vm2, %v87_v35, %v89_v62  ;;  %v94_v38 = vsel %vm92_vm2, %v85_v26, %v87_v35 }
 0x13d   :  { %v121_v40 = vmul.f32 %v110_v29, %v94_v38  ;;  %v122_v41 = vmul.f32 %v114_v32, %v93_v37  ;;  %1420 = vmatprep.subr.msk.bf16.mxu0 %vm178_vm1, %v124_v34  ;;  %v1442_v32 = vld [vmem:[%s1880_s5 + $0x14] sm:$0xf]  ;;  %v689_v34 = vmul.f32 %v678_v19, %v1559_v46 }
 0x13e   :  { %289 = vmatpush1.bf16.msra.mxu0 %v277_v42 }
 0x13f   :  { %v125_v49 = vpack.c.bf16 %v121_v40, %v121_v40  ;;  %v126_v50 = vpack.c.bf16 %v122_v41, %v122_v41  ;;  %v371_v52 = vpop.permute.xlu1 %370  ;;  %v1668_v54 = vpop.permute.xlu0 %800  ;;  %v691_v40 = vpack.c.bf16 %v687_v24, %v687_v24 }
 0x140   :  { %v381_v55 = vsel %vm378_vm4, %v371_v52, %v1622_v9  ;;  %v382_v56 = vsel %vm378_vm4, %v1630_v17, %v371_v52 }
 0x141   :  { %v406_v60 = vmul.f32 %v389_v39, %v382_v56  ;;  %v407_v61 = vmul.f32 %v393_v43, %v381_v55  ;;  %1421 = vmatmul.mubr.msk.bf16.vlgmr.msra.gmra.mrb[4].mxu0 %vm174_vm3, %v127_v48  ;;  %1422 = vmatprep.subr.msk.bf16.mxu1 %vm178_vm1, %v126_v50  ;;  %v283_v62 = vsel %vm178_vm1, %v125_v49, 0  ;;  %v692_v39 = vpack.c.bf16 %v688_v23, %v688_v23 }
 0x142   :  { %330 = vmatpush1.bf16.msra.mxu1 %v283_v62  ;;  %463 = vmatprep.mubr.bf16.mxu0 %v1487_v3  ;;  %v817_v43 = vrot.slane %v1442_v32, %v1610_v0  ;;  %v829_v49 = vrot.slane %v1442_v32, %v1612_v1  ;;  %v821_v62 = vrot.slane %v1442_v32, %v1601_v53 }
 0x143   :  { %v410_v4 = vpack.c.bf16 %v406_v60, %v406_v60  ;;  %v411_v5 = vpack.c.bf16 %v407_v61, %v407_v61  ;;  %v375_v6 = vpop.permute.xlu1 %374  ;;  %v1688_v7 = vpop.permute.xlu0 %804  ;;  %v701_v61 = vsel %vm178_vm1, %v691_v40, 0 }
 0x144   :  { %v379_v11 = vsel %vm378_vm4, %v375_v6, %v1630_v17  ;;  %v380_v12 = vsel %vm378_vm4, %v1622_v9, %v375_v6  ;;  %v1425_v17 = vld [vmem:[%s1881_s1 + $0x4] sm:$0x3]  ;;  %v682_v9 = vrot.slane %v1436_v59, %v1612_v1  ;;  %v1448_v6 = vld [vmem:[%s1880_s5 + $0x18] sm:$0xf] }
 0x145   :  { %v408_v14 = vmul.f32 %v397_v58, %v380_v12  ;;  %v409_v15 = vmul.f32 %v401_v63, %v379_v11  ;;  %1423 = vmatmul.mubr.msk.bf16.vlgmr.msra.gmra.mrb[4].mxu1 %vm174_vm3, %v127_v48  ;;  %1426 = vmatprep.subr.msk.bf16.mxu0 %vm178_vm1, %v411_v5  ;;  %v420_v16 = vsel %vm178_vm1, %v410_v4, 0  ;;  %v693_v58 = vpack.c.bf16 %v689_v34, %v689_v34 }
 0x146   :  { %432 = vmatpush1.bf16.msra.mxu0 %v420_v16  ;;  %504 = vmatprep.mubr.bf16.mxu1 %v1487_v3  ;;  %v690_v33 = vmul.f32 %v682_v9, %v1561_v47  ;;  %v825_v5 = vrot.slane %v1442_v32, %v1605_v57  ;;  %v972_v23 = vrot.slane %v1448_v6, %v1605_v57 }
 0x147   :  { %v412_v20 = vpack.c.bf16 %v408_v14, %v408_v14  ;;  %v413_v21 = vpack.c.bf16 %v409_v15, %v409_v15  ;;  %v518_v22 = vpop.permute.xlu1 %517  ;;  %v1719_v31 = vpop.permute.xlu0 %947  ;;  %v707_v10 = vsel %vm178_vm1, %v693_v58, 0  ;;  %v976_v14 = vrot.slane %v1448_v6, %v1612_v1 }
 0x148   :  { %v528_v25 = vsel %vm525_vm5, %v518_v22, %v1641_v27  ;;  %v529_v26 = vsel %vm525_vm5, %v1654_v36, %v518_v22  ;;  %v694_v56 = vpack.c.bf16 %v690_v33, %v690_v33  ;;  %v968_v22 = vrot.slane %v1448_v6, %v1601_v53 }
 0x149   :  { %v553_v29 = vmul.f32 %v536_v13, %v529_v26  ;;  %v554_v30 = vmul.f32 %v540_v18, %v528_v25  ;;  %1427 = vmatmul.mubr.msk.bf16.vlgmr.msra.gmra.mrb[8].mxu0 %vm174_vm3, %v1425_v17  ;;  %1428 = vmatprep.subr.msk.bf16.mxu1 %vm178_vm1, %v413_v21  ;;  %v426_v44 = vsel %vm178_vm1, %v412_v20, 0  ;;  %v964_v13 = vrot.slane %v1448_v6, %v1610_v0  ;;  %v1449_v6 = vld [vmem:[%s1881_s1 + $0xc] sm:$0x3] }
 0x14a   :  { %473 = vmatpush1.bf16.msra.mxu1 %v426_v44  ;;  %610 = vmatprep.mubr.bf16.mxu0 %v1487_v3 }
 0x14b   :  { %v557_v35 = vpack.c.bf16 %v553_v29, %v553_v29  ;;  %v558_v37 = vpack.c.bf16 %v554_v30, %v554_v30  ;;  %v522_v38 = vpop.permute.xlu1 %521  ;;  %v952_v52 = vpop.permute.xlu0 %951  ;;  %v1454_v29 = vld [vmem:[%s1880_s5 + $0x1c] sm:$0xf] }
 0x14c   :  { %v526_v41 = vsel %vm525_vm5, %v522_v38, %v1654_v36  ;;  %v527_v42 = vsel %vm525_vm5, %v1641_v27, %v522_v38  ;;  %v1431_v36 = vld [vmem:[%s1881_s1 + $0x6] sm:$0x3]  ;;  %v1111_v34 = vrot.slane %v1454_v29, %v1610_v0 }
 0x14d   :  { %v555_v47 = vmul.f32 %v544_v28, %v527_v42  ;;  %v556_v48 = vmul.f32 %v548_v45, %v526_v41  ;;  %1429 = vmatmul.mubr.msk.bf16.vlgmr.msra.gmra.mrb[8].mxu1 %vm174_vm3, %v1425_v17  ;;  %1432 = vmatprep.subr.msk.bf16.mxu0 %vm178_vm1, %v558_v37  ;;  %v567_v46 = vsel %vm178_vm1, %v557_v35, 0  ;;  %v1123_v35 = vrot.slane %v1454_v29, %v1612_v1  ;;  %v1443_v41 = vld [vmem:[%s1881_s1 + $0xa] sm:$0x3] }
 0x14e   :  { %579 = vmatpush1.bf16.msra.mxu0 %v567_v46  ;;  %651 = vmatprep.mubr.bf16.mxu1 %v1487_v3  ;;  %v1119_v46 = vrot.slane %v1454_v29, %v1605_v57 }
 0x14f   :  { %v559_v27 = vpack.c.bf16 %v555_v47, %v555_v47  ;;  %v560_v50 = vpack.c.bf16 %v556_v48, %v556_v48  ;;  %v799_v55 = vpop.permute.xlu1 %798  ;;  %1438 = vmatprep.subr.msk.bf16.mxu0 %vm178_vm1, %v692_v39  ;;  %v1095_v18 = vpop.permute.xlu0 %1094  ;;  %v1115_v48 = vrot.slane %v1454_v29, %v1601_v53 }
 0x150   :  { %v809_v59 = vsel %vm806_vm6, %v799_v55, %v1668_v54  ;;  %v810_v60 = vsel %vm806_vm6, %v1688_v7, %v799_v55  ;;  %v1460_v55 = vld [vmem:[%s1880_s5 + $0x20] sm:$0xf] }
 0x151   :  { %v834_v63 = vmul.f32 %v817_v43, %v809_v59  ;;  %v837_v2 = vmul.f32 %v829_v49, %v810_v60  ;;  %1433 = vmatmul.mubr.msk.bf16.vlgmr.msra.gmra.mrb[12].mxu0 %vm174_vm3, %v1431_v36  ;;  %1434 = vmatprep.subr.msk.bf16.mxu1 %vm178_vm1, %v560_v50  ;;  %v573_v4 = vsel %vm178_vm1, %v559_v27, 0 }
 0x152   :  { %620 = vmatpush1.bf16.msra.mxu1 %v573_v4  ;;  %713 = vmatpush1.bf16.msra.mxu0 %v701_v61  ;;  %v1258_v61 = vrot.slane %v1460_v55, %v1610_v0 }
 0x153   :  { %v803_v8 = vpop.permute.xlu1 %802  ;;  %1440 = vmatprep.subr.msk.bf16.mxu1 %vm178_vm1, %v694_v56  ;;  %744 = vmatprep.mubr.bf16.mxu0 %v1487_v3  ;;  %v838_v15 = vpack.c.bf16 %v834_v63, %v834_v63  ;;  %v841_v16 = vpack.c.bf16 %v837_v2, %v837_v2  ;;  %v1099_v30 = vpop.permute.xlu0 %1098 }
 0x154   :  { %v807_v11 = vsel %vm806_vm6, %v803_v8, %v1688_v7  ;;  %v808_v12 = vsel %vm806_vm6, %v1668_v54, %v803_v8  ;;  %v1437_v7 = vld [vmem:[%s1881_s1 + $0x8] sm:$0x3] }
 0x155   :  { %v835_v17 = vmul.f32 %v821_v62, %v808_v12  ;;  %v836_v9 = vmul.f32 %v825_v5, %v807_v11  ;;  %1435 = vmatmul.mubr.msk.bf16.vlgmr.msra.gmra.mrb[12].mxu1 %vm174_vm3, %v1431_v36  ;;  %v848_v28 = vsel %vm178_vm1, %v838_v15, 0  ;;  %v1270_v62 = vrot.slane %v1460_v55, %v1612_v1 }
 0x156   :  { %754 = vmatpush1.bf16.msra.mxu1 %v707_v10  ;;  %785 = vmatprep.mubr.bf16.mxu1 %v1487_v3  ;;  %v1262_v12 = vrot.slane %v1460_v55, %v1601_v53 }
 0x157   :  { %v839_v19 = vpack.c.bf16 %v835_v17, %v835_v17  ;;  %v946_v54 = vpop.permute.xlu1 %945  ;;  %1446 = vmatprep.subr.msk.bf16.mxu1 %vm178_vm1, %v841_v16  ;;  %v840_v24 = vpack.c.bf16 %v836_v9, %v836_v9  ;;  %v1242_v49 = vpop.permute.xlu0 %1241 }
 0x158   :  { %v956_v20 = vsel %vm953_vm7, %v946_v54, %v1719_v31  ;;  %v957_v21 = vsel %vm953_vm7, %v952_v52, %v946_v54 }
 0x159   :  { %v981_v25 = vmul.f32 %v964_v13, %v956_v20  ;;  %v984_v26 = vmul.f32 %v976_v14, %v957_v21  ;;  %1439 = vmatmul.mubr.msk.bf16.vlgmr.msra.gmra.mrb[16].mxu0 %vm174_vm3, %v1437_v7  ;;  %1444 = vmatprep.subr.msk.bf16.mxu0 %vm178_vm1, %v839_v19  ;;  %v854_v40 = vsel %vm178_vm1, %v840_v24, 0  ;;  %v1266_v13 = vrot.slane %v1460_v55, %v1605_v57  ;;  %v1455_v21 = vld [vmem:[%s1881_s1 + $0xe] sm:$0x3] }
 0x15a   :  { %860 = vmatpush1.bf16.msra.mxu0 %v848_v28  ;;  %891 = vmatprep.mubr.bf16.mxu0 %v1487_v3 }
 0x15b   :  { %v988_v44 = vpack.c.bf16 %v984_v26, %v984_v26  ;;  %v950_v45 = vpop.permute.xlu1 %949  ;;  %v985_v37 = vpack.c.bf16 %v981_v25, %v981_v25  ;;  %v1246_v8 = vpop.permute.xlu0 %1245  ;;  %v1461_v25 = vld [vmem:[%s1881_s1 + $0x10] sm:$0x3] }
 0x15c   :  { %v954_v32 = vsel %vm953_vm7, %v950_v45, %v952_v52  ;;  %v955_v33 = vsel %vm953_vm7, %v1719_v31, %v950_v45 }
 0x15d   :  { %v982_v38 = vmul.f32 %v968_v22, %v955_v33  ;;  %v983_v39 = vmul.f32 %v972_v23, %v954_v32  ;;  %1441 = vmatmul.mubr.msk.bf16.vlgmr.msra.gmra.mrb[16].mxu1 %vm174_vm3, %v1437_v7  ;;  %v995_v52 = vsel %vm178_vm1, %v985_v37, 0 }
 0x15e   :  { %901 = vmatpush1.bf16.msra.mxu1 %v854_v40  ;;  %932 = vmatprep.mubr.bf16.mxu1 %v1487_v3 }
 0x15f   :  { %v986_v42 = vpack.c.bf16 %v982_v38, %v982_v38  ;;  %1452 = vmatprep.subr.msk.bf16.mxu1 %vm178_vm1, %v988_v44  ;;  %v1093_v31 = vpop.permute.xlu1 %1092  ;;  %v987_v36 = vpack.c.bf16 %v983_v39, %v983_v39 }
 0x160   :  { %v1103_v43 = vsel %vm1100_vm8, %v1093_v31, %v1095_v18  ;;  %v1104_v47 = vsel %vm1100_vm8, %v1099_v30, %v1093_v31 }
 0x161   :  { %v1128_v27 = vmul.f32 %v1111_v34, %v1103_v43  ;;  %v1131_v50 = vmul.f32 %v1123_v35, %v1104_v47  ;;  %1445 = vmatmul.mubr.msk.bf16.vlgmr.msra.gmra.mrb[20].mxu0 %vm174_vm3, %v1443_v41  ;;  %1450 = vmatprep.subr.msk.bf16.mxu0 %vm178_vm1, %v986_v42  ;;  %v1001_v5 = vsel %vm178_vm1, %v987_v36, 0 }
 0x162   :  { %1007 = vmatpush1.bf16.msra.mxu0 %v995_v52  ;;  %1038 = vmatprep.mubr.bf16.mxu0 %v1487_v3 }
 0x163   :  { %v1135_v56 = vpack.c.bf16 %v1131_v50, %v1131_v50  ;;  %v1097_v58 = vpop.permute.xlu1 %1096  ;;  %v1132_v63 = vpack.c.bf16 %v1128_v27, %v1128_v27 }
 0x164   :  { %v1101_v59 = vsel %vm1100_vm8, %v1097_v58, %v1099_v30  ;;  %v1102_v60 = vsel %vm1100_vm8, %v1095_v18, %v1097_v58 }
 0x165   :  { %v1129_v2 = vmul.f32 %v1115_v48, %v1102_v60  ;;  %v1130_v4 = vmul.f32 %v1119_v46, %v1101_v59  ;;  %1447 = vmatmul.mubr.msk.bf16.vlgmr.msra.gmra.mrb[20].mxu1 %vm174_vm3, %v1443_v41  ;;  %v1142_v18 = vsel %vm178_vm1, %v1132_v63, 0 }
 0x166   :  { %1048 = vmatpush1.bf16.msra.mxu1 %v1001_v5  ;;  %1079 = vmatprep.mubr.bf16.mxu1 %v1487_v3 }
 0x167   :  { %v1133_v10 = vpack.c.bf16 %v1129_v2, %v1129_v2  ;;  %1458 = vmatprep.subr.msk.bf16.mxu1 %vm178_vm1, %v1135_v56  ;;  %v1240_v0 = vpop.permute.xlu1 %1239  ;;  %v1134_v14 = vpack.c.bf16 %v1130_v4, %v1130_v4 }
 0x168   :  { %v1250_v1 = vsel %vm1247_vm9, %v1240_v0, %v1242_v49  ;;  %v1251_v11 = vsel %vm1247_vm9, %v1246_v8, %v1240_v0 }
 0x169   :  { %v1275_v15 = vmul.f32 %v1258_v61, %v1250_v1  ;;  %v1278_v16 = vmul.f32 %v1270_v62, %v1251_v11  ;;  %1451 = vmatmul.mubr.msk.bf16.vlgmr.msra.gmra.mrb[24].mxu0 %vm174_vm3, %v1449_v6  ;;  %1456 = vmatprep.subr.msk.bf16.mxu0 %vm178_vm1, %v1133_v10  ;;  %v1148_v20 = vsel %vm178_vm1, %v1134_v14, 0 }
 0x16a   :  { %1154 = vmatpush1.bf16.msra.mxu0 %v1142_v18  ;;  %1185 = vmatprep.mubr.bf16.mxu0 %v1487_v3 }
 0x16b   :  { %v1282_v17 = vpack.c.bf16 %v1278_v16, %v1278_v16  ;;  %v1244_v9 = vpop.permute.xlu1 %1243  ;;  %v1279_v57 = vpack.c.bf16 %v1275_v15, %v1275_v15 }
 0x16c   :  { %v1248_v7 = vsel %vm1247_vm9, %v1244_v9, %v1246_v8  ;;  %v1249_v53 = vsel %vm1247_vm9, %v1242_v49, %v1244_v9 }
 0x16d   :  { %v1276_v19 = vmul.f32 %v1262_v12, %v1249_v53  ;;  %v1277_v54 = vmul.f32 %v1266_v13, %v1248_v7  ;;  %1453 = vmatmul.mubr.msk.bf16.vlgmr.msra.gmra.mrb[24].mxu1 %vm174_vm3, %v1449_v6  ;;  %v1289_v51 = vsel %vm178_vm1, %v1279_v57, 0 }
 0x16e   :  { %1195 = vmatpush1.bf16.msra.mxu1 %v1148_v20  ;;  %1226 = vmatprep.mubr.bf16.mxu1 %v1487_v3 }
 0x16f   :  { %v1280_v22 = vpack.c.bf16 %v1276_v19, %v1276_v19  ;;  %1464 = vmatprep.subr.msk.bf16.mxu1 %vm178_vm1, %v1282_v17  ;;  %v1281_v23 = vpack.c.bf16 %v1277_v54, %v1277_v54 }
 0x171   :  { %1457 = vmatmul.mubr.msk.bf16.vlgmr.msra.gmra.mrb[28].mxu0 %vm174_vm3, %v1455_v21  ;;  %1462 = vmatprep.subr.msk.bf16.mxu0 %vm178_vm1, %v1280_v22  ;;  %v1295_v24 = vsel %vm178_vm1, %v1281_v23, 0 }
 0x172   :  { %1301 = vmatpush1.bf16.msra.mxu0 %v1289_v51  ;;  %1332 = vmatprep.mubr.bf16.mxu0 %v1487_v3 }
 0x175   :  { %1459 = vmatmul.mubr.msk.bf16.vlgmr.msra.gmra.mrb[28].mxu1 %vm174_vm3, %v1455_v21 }
 0x176   :  { %1342 = vmatpush1.bf16.msra.mxu1 %v1295_v24  ;;  %1373 = vmatprep.mubr.bf16.mxu1 %v1487_v3 }
 0x179   :  { %1463 = vmatmul.mubr.msk.bf16.vlgmr.msra.gmra.mrb[32].mxu0 %vm174_vm3, %v1461_v25 }
 0x17d   :  { %1465 = vmatmul.mubr.msk.bf16.vlgmr.msra.gmra.mrb[32].mxu1 %vm174_vm3, %v1461_v25 }
 0x20c   :  { %v225_v26 = vpop.f32.mrb[0].mxu0  ;;  %v266_v28 = vpop.f32.mrb[0].mxu1 }
 0x20d   :  { %v227_v29 = vpop.f32.mrb[1].mxu0  ;;  %v268_v30 = vpop.f32.mrb[1].mxu1 }
 0x20e   :  { %v229_v44 = vpop.f32.mrb[2].mxu0  ;;  %v270_v45 = vpop.f32.mrb[2].mxu1 }
 0x20f   :  { %v230_v32 = vpop.f32.mrb[3].mxu0  ;;  %v271_v33 = vpop.f32.mrb[3].mxu1 }
 0x214   :  { %v322_v34 = vpop.f32.mrb[4].mxu0 }
 0x215   :  { %v323_v35 = vadd.f32 %v322_v34, %v225_v26  ;;  %v324_v37 = vpop.f32.mrb[5].mxu0 }
 0x216   :  { %v325_v38 = vadd.f32 %v324_v37, %v227_v29  ;;  %v326_v39 = vpop.f32.mrb[6].mxu0 }
 0x217   :  { %v327_v40 = vpop.f32.mrb[7].mxu0 }
 0x218   :  { %v363_v41 = vpop.f32.mrb[4].mxu1 }
 0x219   :  { %v364_v3 = vadd.f32 %v363_v41, %v266_v28  ;;  %v365_v42 = vpop.f32.mrb[5].mxu1 }
 0x21a   :  { %v366_v31 = vadd.f32 %v365_v42, %v268_v30  ;;  %v367_v43 = vpop.f32.mrb[6].mxu1 }
 0x21b   :  { %v368_v47 = vpop.f32.mrb[7].mxu1 }
 0x21c   :  { %v465_v48 = vpop.f32.mrb[8].mxu0 }
 0x21d   :  { %v513_v46 = vadd.f32 %v465_v48, %v323_v35  ;;  %v467_v49 = vpop.f32.mrb[9].mxu0 }
 0x21e   :  { %v514_v36 = vadd.f32 %v467_v49, %v325_v38  ;;  %v469_v27 = vpop.f32.mrb[10].mxu0 }
 0x21f   :  { %v470_v50 = vpop.f32.mrb[11].mxu0 }
 0x220   :  { %v506_v52 = vpop.f32.mrb[8].mxu1 }
 0x221   :  { %v515_v55 = vadd.f32 %v506_v52, %v364_v3  ;;  %v508_v56 = vpop.f32.mrb[9].mxu1 }
 0x222   :  { %v516_v58 = vadd.f32 %v508_v56, %v366_v31  ;;  %v510_v59 = vpop.f32.mrb[10].mxu1 }
 0x223   :  { %v511_v60 = vpop.f32.mrb[11].mxu1 }
 0x224   :  { %v612_v61 = vpop.f32.mrb[12].mxu0  ;;  %v1390_v60 = vpop.permute.xlu1 %1389 }
 0x225   :  { %v660_v62 = vadd.f32 %v612_v61, %v513_v46  ;;  %v614_v63 = vpop.f32.mrb[13].mxu0 }
 0x226   :  { %v661_v2 = vadd.f32 %v614_v63, %v514_v36  ;;  %v616_v4 = vpop.f32.mrb[14].mxu0 }
 0x227   :  { %v617_v5 = vpop.f32.mrb[15].mxu0 }
 0x228   :  { %v653_v6 = vpop.f32.mrb[12].mxu1 }
 0x229   :  { %v662_v8 = vadd.f32 %v653_v6, %v515_v55  ;;  %v655_v10 = vpop.f32.mrb[13].mxu1 }
 0x22a   :  { %v663_v0 = vadd.f32 %v655_v10, %v516_v58  ;;  %v657_v1 = vpop.f32.mrb[14].mxu1 }
 0x22b   :  { %v658_v11 = vpop.f32.mrb[15].mxu1 }
 0x22c   :  { %v746_v12 = vpop.f32.mrb[16].mxu0 }
 0x22d   :  { %v794_v13 = vadd.f32 %v746_v12, %v660_v62  ;;  %v748_v14 = vpop.f32.mrb[17].mxu0 }
 0x22e   :  { %v795_v15 = vadd.f32 %v748_v14, %v661_v2  ;;  %v750_v16 = vpop.f32.mrb[18].mxu0 }
 0x22f   :  { %v751_v18 = vpop.f32.mrb[19].mxu0 }
 0x230   :  { %v787_v17 = vpop.f32.mrb[16].mxu1 }
 0x231   :  { %v796_v9 = vadd.f32 %v787_v17, %v662_v8  ;;  %v789_v7 = vpop.f32.mrb[17].mxu1 }
 0x232   :  { %v797_v53 = vadd.f32 %v789_v7, %v663_v0  ;;  %v791_v57 = vpop.f32.mrb[18].mxu1 }
 0x233   :  { %v792_v19 = vpop.f32.mrb[19].mxu1 }
 0x234   :  { %v893_v54 = vpop.f32.mrb[20].mxu0 }
 0x235   :  { %v941_v20 = vadd.f32 %v893_v54, %v794_v13  ;;  %v895_v21 = vpop.f32.mrb[21].mxu0 }
 0x236   :  { %v942_v22 = vadd.f32 %v895_v21, %v795_v15  ;;  %v897_v23 = vpop.f32.mrb[22].mxu0 }
 0x237   :  { %v898_v51 = vpop.f32.mrb[23].mxu0 }
 0x238   :  { %v934_v24 = vpop.f32.mrb[20].mxu1 }
 0x239   :  { %v943_v25 = vadd.f32 %v934_v24, %v796_v9  ;;  %v936_v26 = vpop.f32.mrb[21].mxu1 }
 0x23a   :  { %v944_v28 = vadd.f32 %v936_v26, %v797_v53  ;;  %v938_v29 = vpop.f32.mrb[22].mxu1 }
 0x23b   :  { %v939_v30 = vpop.f32.mrb[23].mxu1 }
 0x23c   :  { %v1040_v44 = vpop.f32.mrb[24].mxu0 }
 0x23d   :  { %v1088_v45 = vadd.f32 %v1040_v44, %v941_v20  ;;  %v1042_v32 = vpop.f32.mrb[25].mxu0 }
 0x23e   :  { %v1089_v33 = vadd.f32 %v1042_v32, %v942_v22  ;;  %v1044_v34 = vpop.f32.mrb[26].mxu0 }
 0x23f   :  { %v1045_v35 = vpop.f32.mrb[27].mxu0 }
 0x240   :  { %v1081_v37 = vpop.f32.mrb[24].mxu1 }
 0x241   :  { %v1090_v38 = vadd.f32 %v1081_v37, %v943_v25  ;;  %v1083_v39 = vpop.f32.mrb[25].mxu1 }
 0x242   :  { %v1091_v40 = vadd.f32 %v1083_v39, %v944_v28  ;;  %v1085_v41 = vpop.f32.mrb[26].mxu1 }
 0x243   :  { %v1086_v3 = vpop.f32.mrb[27].mxu1 }
 0x244   :  { %v1187_v42 = vpop.f32.mrb[28].mxu0 }
 0x245   :  { %v1235_v31 = vadd.f32 %v1187_v42, %v1088_v45  ;;  %v1189_v43 = vpop.f32.mrb[29].mxu0 }
 0x246   :  { %v1236_v47 = vadd.f32 %v1189_v43, %v1089_v33  ;;  %v1191_v48 = vpop.f32.mrb[30].mxu0 }
 0x247   :  { %v1192_v46 = vpop.f32.mrb[31].mxu0 }
 0x248   :  { %v1228_v49 = vpop.f32.mrb[28].mxu1 }
 0x249   :  { %v1237_v36 = vadd.f32 %v1228_v49, %v1090_v38  ;;  %v1230_v27 = vpop.f32.mrb[29].mxu1 }
 0x24a   :  { %v1238_v50 = vadd.f32 %v1230_v27, %v1091_v40  ;;  %v1232_v52 = vpop.f32.mrb[30].mxu1 }
 0x24b   :  { %v1233_v55 = vpop.f32.mrb[31].mxu1 }
 0x24c   :  { %v1334_v56 = vpop.f32.mrb[32].mxu0 }
 0x24d   :  { %v1382_v58 = vadd.f32 %v1334_v56, %v1235_v31  ;;  %v1336_v59 = vpop.f32.mrb[33].mxu0 }
 0x24e   :  { %v1383_v61 = vadd.f32 %v1336_v59, %v1236_v47  ;;  %v1338_v62 = vpop.f32.mrb[34].mxu0 }
 0x24f   :  { %v1392_v63 = vadd.f32 %v1390_v60, %v1382_v58  ;;  %v1339_v2 = vpop.f32.mrb[35].mxu0 }
 0x250   :  { %v1393_v4 = vadd.f32 %v1390_v60, %v1383_v61  ;;  %v1375_v5 = vpop.f32.mrb[32].mxu1 }
 0x251   :  { %1479 = vtanh.f32 %v1392_v63  ;;  %v1384_v6 = vadd.f32 %v1375_v5, %v1237_v36  ;;  %v1377_v8 = vpop.f32.mrb[33].mxu1 }
 0x252   :  { %1481 = vtanh.f32 %v1393_v4  ;;  %v1385_v10 = vadd.f32 %v1377_v8, %v1238_v50  ;;  %v1379_v0 = vpop.f32.mrb[34].mxu1 }
 0x253   :  { %v1394_v1 = vadd.f32 %v1390_v60, %v1384_v6  ;;  %v1380_v11 = vpop.f32.mrb[35].mxu1 }
 0x254   :  { %v1395_v12 = vadd.f32 %v1390_v60, %v1385_v10 }
 0x255   :  { %1483 = vtanh.f32 %v1394_v1 }
 0x256   :  { %1485 = vtanh.f32 %v1395_v12 }
 0x25b   :  { %v1480_v13 = vpop.eup %1479 }
 0x25c   :  { %v1482_v14 = vpop.eup %1481 }
 0x25d   :  { %v1404_v15 = vcombine.low %v1480_v13, %v1482_v14 }
 0x25f   :  { %v1484_v16 = vpop.eup %1483  ;;  %1408 = vst [vmem:[%s1882_s6] sm:$0x77] %v1404_v15 }
 0x260   :  { %v1486_v18 = vpop.eup %1485 }
 0x261   :  { %v1405_v17 = vcombine.low %v1484_v16, %v1486_v18 }
 0x263   :  { %1409 = vst [vmem:[%s1882_s6 + $0x8] sm:$0x77] %v1405_v17 }

// kernel: _lambda_.11
= control target key start
LH: loop header
LB: loop body
LE: loop exit
PB: predicated region body
PF: predicated region fallthrough
CT: control target
= control target key end

     0   :  { %vm58_vm0 = vcmask 1043456   ;;  %v3085_v3 = vmov 0   ;;  %s1960_s18 = smov 15   ;;  %s1961_s19 = smov 1   ;;  %vm379_vm6 = vcmask 1041408   ;;  %vm375_vm7 = vcmask 162816   ;;  %s3076_s0 = inlined_call_operand.vmem [shape: f32[20,512], index: 0, kind: input, shape index: {}]   ;;  %s3077_s3 = inlined_call_operand.vmem [shape: f32[20,1], index: 3, kind: input, shape index: {}]   ;;  %s3078_s4 = inlined_call_operand.vmem [shape: f32[20,1], index: 4, kind: input, shape index: {}]   ;;  %s3079_s7 = inlined_call_operand.vmem [shape: f32[9,1,512], index: 7, kind: input, shape index: {}]   ;;  %s3080_s2 = inlined_call_operand.vmem [shape: f32[8,1], index: 2, kind: input, shape index: {}]   ;;  %s3081_s1 = inlined_call_operand.vmem [shape: bf16[9,8,20], index: 1, kind: input, shape index: {}]   ;;  %s3082_s6 = inlined_call_operand.vmem [shape: f32[8,1], index: 6, kind: input, shape index: {}]   ;;  %s3083_s5 = inlined_call_operand.vmem [shape: f32[8,1], index: 5, kind: input, shape index: {}]   ;;  %s3084_s8 = inlined_call_operand.vmem [shape: f32[8,512], index: 8, kind: output, shape index: {}]  }
   0x1   :  { %v2014_v0 = vld [vmem:[%s3076_s0] sm:$0xff]  ;;  %v2019_v1 = vld [vmem:[%s3076_s0 + $0x8] sm:$0xff]  ;;  %v2024_v2 = vld [vmem:[%s3076_s0 + $0x10] sm:$0xff]  ;;  %1948 = vset.pattern.permute.xlu1 %v3085_v3  ;;  %1947 = vset.pattern.permute.xlu0 %v3085_v3  ;;  %s1962_s20 = smov 127   ;;  %s1963_s21 = smov 113  }
   0x2   :  { %v2031_v4 = vld [vmem:[%s3076_s0 + $0x18] sm:$0xff]  ;;  %v48_v5 = vadd.f32 %v2019_v1, %v2014_v0  ;;  %v72_v6 = vmul.f32 %v2014_v0, %v2014_v0  ;;  %v73_v7 = vmul.f32 %v2019_v1, %v2019_v1  ;;  %v74_v8 = vmul.f32 %v2024_v2, %v2024_v2  ;;  %v2044_v9 = vld [vmem:[%s3076_s0 + $0x20] sm:$0xff]  ;;  %v2049_v10 = vld [vmem:[%s3076_s0 + $0x28] sm:$0xff]  ;;  %424 = vmatprep.mubr.bf16.mxu0 %v3085_v3  ;;  %s1964_s26 = smov 112   ;;  %s1965_s30 = smov 111  }
   0x3   :  { %v75_v11 = vmul.f32 %v2031_v4, %v2031_v4  ;;  %v2057_v12 = vld [vmem:[%s3076_s0 + $0x30] sm:$0xff]  ;;  %v2062_v13 = vld [vmem:[%s3076_s0 + $0x38] sm:$0xff]  ;;  %v53_v14 = vadd.f32 %v2049_v10, %v2044_v9  ;;  %v76_v15 = vmul.f32 %v2044_v9, %v2044_v9  ;;  %v77_v16 = vmul.f32 %v2049_v10, %v2049_v10  ;;  %v2073_v17 = vld [vmem:[%s3076_s0 + $0x40] sm:$0xf]  ;;  %465 = vmatprep.mubr.bf16.mxu1 %v3085_v3 }
   0x4   :  { %v49_v18 = vadd.f32 %v48_v5, %v2024_v2  ;;  %v84_v19 = vadd.f32 %v73_v7, %v72_v6  ;;  %v78_v20 = vmul.f32 %v2057_v12, %v2057_v12  ;;  %v79_v21 = vmul.f32 %v2062_v13, %v2062_v13  ;;  %v2084_v22 = vld [vmem:[%s3076_s0 + $0x48] sm:$0xf]  ;;  %v2089_v23 = vld [vmem:[%s3076_s0 + $0x50] sm:$0xf]  ;;  %v2100_v30 = vld [vmem:[%s3076_s0 + $0x58] sm:$0xf] }
   0x5   :  { %v54_v24 = vadd.f32 %v53_v14, %v2057_v12  ;;  %v89_v25 = vadd.f32 %v77_v16, %v76_v15  ;;  %v59_v26 = vsel %vm58_vm0, %v2073_v17, 0.0  ;;  %v60_v27 = vsel %vm58_vm0, %v2084_v22, 0.0  ;;  %v43_v51 = vld [vmem:[%s3077_s3 + $0x8] sm:$0xff]  ;;  %v42_v52 = vld [vmem:[%s3077_s3] sm:$0xff]  ;;  %v44_v55 = vld [vmem:[%s3077_s3 + $0x10] sm:$0xf] }
   0x6   :  { %v50_v28 = vadd.f32 %v49_v18, %v2031_v4  ;;  %v85_v29 = vadd.f32 %v84_v19, %v74_v8  ;;  %v61_v31 = vadd.f32 %v60_v27, %v59_v26  ;;  %v62_v32 = vsel %vm58_vm0, %v2089_v23, 0.0  ;;  %v45_v53 = vld [vmem:[%s3078_s4] sm:$0xff]  ;;  %v46_v54 = vld [vmem:[%s3078_s4 + $0x8] sm:$0xff]  ;;  %v47_v56 = vld [vmem:[%s3078_s4 + $0x10] sm:$0xf]  ;;  %s1958_s3 = smov 16  }
   0x7   :  { %v55_v33 = vadd.f32 %v54_v24, %v2062_v13  ;;  %v90_v34 = vadd.f32 %v89_v25, %v78_v20  ;;  %v80_v35 = vmul.f32 %v2073_v17, %v2073_v17  ;;  %v81_v38 = vmul.f32 %v2084_v22, %v2084_v22  ;;  %s1959_s4 = smov 17  }
   0x8   :  { %51 = vadd.xlane.f32.xlu0 %v50_v28  ;;  %v86_v36 = vadd.f32 %v85_v29, %v75_v11  ;;  %v63_v37 = vadd.f32 %v62_v32, %v61_v31  ;;  %v82_v39 = vmul.f32 %v2089_v23, %v2089_v23  ;;  %v64_v40 = vsel %vm58_vm0, %v2100_v30, 0.0 }
   0x9   :  { %v83_v41 = vmul.f32 %v2100_v30, %v2100_v30  ;;  %v94_v42 = vsel %vm58_vm0, %v80_v35, 0.0  ;;  %v91_v43 = vadd.f32 %v90_v34, %v79_v21  ;;  %v95_v44 = vsel %vm58_vm0, %v81_v38, 0.0 }
   0xa   :  { %87 = vadd.xlane.f32.xlu1 %v86_v36  ;;  %v97_v45 = vsel %vm58_vm0, %v82_v39, 0.0  ;;  %v96_v46 = vadd.f32 %v95_v44, %v94_v42  ;;  %v65_v47 = vadd.f32 %v64_v40, %v63_v37 }
   0xb   :  { %v99_v48 = vsel %vm58_vm0, %v83_v41, 0.0 }
   0xc   :  { %56 = vadd.xlane.f32.xlu0 %v55_v33  ;;  %v98_v49 = vadd.f32 %v97_v45, %v96_v46 }
   0xe   :  { %92 = vadd.xlane.f32.xlu1 %v91_v43  ;;  %v100_v50 = vadd.f32 %v99_v48, %v98_v49 }
  0x10   :  { %66 = vadd.xlane.f32.xlu0 %v65_v47 }
  0x12   :  { %101 = vadd.xlane.f32.xlu1 %v100_v50 }
  0x23   :  { %152 = vperm.xlu1 %1948, %v43_v51  }
  0x26   :  { %147 = vperm.xlu0 %1947, %v42_v52  }
  0x27   :  { %174 = vperm.xlu1 %1948, %v45_v53  }
  0x2b   :  { %179 = vperm.xlu1 %1948, %v46_v54  }
  0x2f   :  { %157 = vperm.xlu1 %1948, %v44_v55  }
  0x33   :  { %184 = vperm.xlu1 %1948, %v47_v56  }
  0x95   :  { %v52_v57 = vpop.xlane.xlu0 %51 }
  0x96   :  { %v69_v58 = vmul.f32 0.001953125, %v52_v57 }
  0x97   :  { %v88_v59 = vpop.xlane.xlu1 %87 }
  0x98   :  { %v103_v60 = vmul.f32 0.001953125, %v88_v59  ;;  %v106_v61 = vmul.f32 %v69_v58, %v69_v58  ;;  %v115_v24 = vsub.f32 %v2014_v0, %v69_v58  ;;  %v116_v29 = vsub.f32 %v2019_v1, %v69_v58 }
  0x99   :  { %v57_v62 = vpop.xlane.xlu0 %56  ;;  %v118_v40 = vsub.f32 %v2031_v4, %v69_v58  ;;  %v117_v48 = vsub.f32 %v2024_v2, %v69_v58 }
  0x9a   :  { %v109_v63 = vsub.f32 %v103_v60, %v106_v61  ;;  %v70_v5 = vmul.f32 0.001953125, %v57_v62 }
  0x9b   :  { %v93_v6 = vpop.xlane.xlu1 %92 }
  0x9c   :  { %v112_v7 = vmax.f32 %v109_v63, 0.0  ;;  %v104_v8 = vmul.f32 0.001953125, %v93_v6  ;;  %v107_v11 = vmul.f32 %v70_v5, %v70_v5  ;;  %v119_v31 = vsub.f32 %v2044_v9, %v70_v5 }
  0x9d   :  { %v2139_v20 = vpop.xlane.xlu0 %66  ;;  %v120_v32 = vsub.f32 %v2049_v10, %v70_v5  ;;  %v122_v33 = vsub.f32 %v2062_v13, %v70_v5  ;;  %v121_v37 = vsub.f32 %v2057_v12, %v70_v5 }
  0x9e   :  { %v127_v14 = vadd.f32 1e-05, %v112_v7  ;;  %v110_v15 = vsub.f32 %v104_v8, %v107_v11  ;;  %v71_v62 = vmul.f32 0.001953125, %v2139_v20 }
  0x9f   :  { %v2137_v18 = vpop.xlane.xlu1 %101 }
  0xa0   :  { %1949 = vrsqrt.f32 %v127_v14  ;;  %v113_v16 = vmax.f32 %v110_v15, 0.0  ;;  %v105_v63 = vmul.f32 0.001953125, %v2137_v18  ;;  %v108_v5 = vmul.f32 %v71_v62, %v71_v62 }
  0xa1   :  { %v124_v14 = vsub.f32 %v2084_v22, %v71_v62  ;;  %v125_v18 = vsub.f32 %v2089_v23, %v71_v62 }
  0xa2   :  { %v128_v19 = vadd.f32 1e-05, %v113_v16  ;;  %v111_v6 = vsub.f32 %v105_v63, %v108_v5 }
  0xa3   :  { %v153_v21 = vpop.permute.xlu1 %152 }
  0xa4   :  { %1951 = vrsqrt.f32 %v128_v19  ;;  %v114_v7 = vmax.f32 %v111_v6, 0.0  ;;  %v123_v19 = vsub.f32 %v2073_v17, %v71_v62 }
  0xa5   :  { %v148_v26 = vpop.permute.xlu0 %147 }
  0xa6   :  { %v129_v8 = vadd.f32 1e-05, %v114_v7 }
  0xa7   :  { %v175_v28 = vpop.permute.xlu1 %174 }
  0xa8   :  { %1953 = vrsqrt.f32 %v129_v8 }
  0xaa   :  { %v1950_v25 = vpop.eup %1949 }
  0xab   :  { %v133_v27 = vmul.f32 %v1950_v25, %v115_v24  ;;  %v134_v36 = vmul.f32 %v1950_v25, %v116_v29  ;;  %v180_v9 = vpop.permute.xlu1 %179  ;;  %v136_v45 = vmul.f32 %v1950_v25, %v118_v40  ;;  %v135_v51 = vmul.f32 %v1950_v25, %v117_v48  ;;  %v1886_v40 = vld [vmem:[%s3079_s7 + $0x4] sm:$0xf] }
  0xac   :  { %v126_v24 = vsub.f32 %v2100_v30, %v71_v62 }
  0xad   :  { %v160_v34 = vmul.f32 %v148_v26, %v133_v27  ;;  %v161_v10 = vmul.f32 %v148_v26, %v134_v36  ;;  %v163_v52 = vmul.f32 %v148_v26, %v136_v45  ;;  %v162_v55 = vmul.f32 %v148_v26, %v135_v51 }
  0xae   :  { %v1952_v35 = vpop.eup %1951  ;;  %v235_v36 = vlaneseq }
  0xaf   :  { %v137_v38 = vmul.f32 %v1952_v35, %v119_v31  ;;  %v138_v39 = vmul.f32 %v1952_v35, %v120_v32  ;;  %v140_v0 = vmul.f32 %v1952_v35, %v122_v33  ;;  %v187_v41 = vadd.f32 %v175_v28, %v160_v34  ;;  %v158_v16 = vpop.permute.xlu1 %157 }
  0xb0   :  { %v139_v42 = vmul.f32 %v1952_v35, %v121_v37  ;;  %v188_v53 = vadd.f32 %v175_v28, %v161_v10  ;;  %v190_v56 = vadd.f32 %v175_v28, %v163_v52  ;;  %v189_v59 = vadd.f32 %v175_v28, %v162_v55 }
  0xb1   :  { %v164_v43 = vmul.f32 %v153_v21, %v137_v38  ;;  %v165_v1 = vmul.f32 %v153_v21, %v138_v39  ;;  %v167_v44 = vmul.f32 %v153_v21, %v140_v0  ;;  %v2148_v46 = vmax.f32 %v187_v41, 0.0 }
  0xb2   :  { %v166_v12 = vmul.f32 %v153_v21, %v139_v42  ;;  %v2163_v57 = vmax.f32 %v188_v53, 0.0  ;;  %v2171_v60 = vmax.f32 %v190_v56, 0.0  ;;  %v2177_v61 = vmax.f32 %v189_v59, 0.0  ;;  %v1954_v11 = vpop.eup %1953 }
  0xb3   :  { %3117 = vst [vmem:[#allocation2_spill] sm:$0xff] %v2148_v46  ;;  %v191_v13 = vadd.f32 %v180_v9, %v164_v43  ;;  %v192_v47 = vadd.f32 %v180_v9, %v165_v1  ;;  %293 = vrot.lane.b32.xlu1 %v2148_v46, %s1958_s3  ;;  %v194_v4 = vadd.f32 %v180_v9, %v167_v44  ;;  %v185_v25 = vpop.permute.xlu1 %184  ;;  %v2293_v38 = vand.u32 127, %v235_v36 }
  0xb4   :  { %v193_v2 = vadd.f32 %v180_v9, %v166_v12  ;;  %3119 = vst [vmem:[#allocation4_spill] sm:$0xff] %v2177_v61  ;;  %v142_v15 = vmul.f32 %v1954_v11, %v124_v14  ;;  %v143_v22 = vmul.f32 %v1954_v11, %v125_v18  ;;  %v141_v21 = vmul.f32 %v1954_v11, %v123_v19 }
  0xb5   :  { %v2153_v49 = vmax.f32 %v191_v13, 0.0  ;;  %v2155_v50 = vmax.f32 %v192_v47, 0.0  ;;  %v2161_v54 = vmax.f32 %v194_v4, 0.0  ;;  %v144_v27 = vmul.f32 %v1954_v11, %v126_v24 }
  0xb6   :  { %v2169_v58 = vmax.f32 %v193_v2, 0.0  ;;  %v169_v20 = vmul.f32 %v158_v16, %v142_v15  ;;  %v170_v23 = vmul.f32 %v158_v16, %v143_v22  ;;  %v168_v28 = vmul.f32 %v158_v16, %v141_v21 }
  0xb7   :  { %301 = vrot.lane.b32.xlu0 %v2155_v50, %s1958_s3  ;;  %295 = vrot.lane.b32.xlu1 %v2153_v49, %s1958_s3  ;;  %v171_v31 = vmul.f32 %v158_v16, %v144_v27  ;;  %v253_v39 = vshrl.u32 %v235_v36, 7  ;;  %vm317_vm1 = vcmp.lt.s32.totalorder %v2293_v38, 16  ;;  %vm237_vm2 = vcmp.lt.s32.totalorder %v2293_v38, 17 }
  0xb8   :  { %3118 = vst [vmem:[#allocation3_spill] sm:$0xff] %v2169_v58  ;;  %v196_v26 = vadd.f32 %v185_v25, %v169_v20  ;;  %v197_v17 = vadd.f32 %v185_v25, %v170_v23  ;;  %v195_v32 = vadd.f32 %v185_v25, %v168_v28  ;;  %v250_v20 = vld [vmem:[%s3079_s7] sm:$0xf]  ;;  %vm595_vm3 = vcmp.lt.s32.totalorder %v2293_v38, 15 }
  0xb9   :  { %v198_v33 = vadd.f32 %v185_v25, %v171_v31  ;;  %v2303_v42 = vsub.s32 1, %v253_v39  ;;  %v2314_v45 = vsub.s32 0, %v253_v39  ;;  %v2329_v4 = vsub.s32 2, %v253_v39 }
  0xba   :  { %v2261_v29 = vmax.f32 %v196_v26, 0.0  ;;  %v2267_v30 = vmax.f32 %v197_v17, 0.0  ;;  %v2269_v34 = vmax.f32 %v195_v32, 0.0  ;;  %v2331_v52 = vsub.s32 3, %v253_v39 }
  0xbb   :  { %313 = vrot.lane.b32.xlu0 %v2161_v54, %s1958_s3  ;;  %299 = vrot.lane.b32.xlu1 %v2163_v57, %s1958_s3  ;;  %v2275_v35 = vmax.f32 %v198_v33, 0.0  ;;  %v2310_v43 = vrot.slane %v1886_v40, %v2303_v42  ;;  %v2321_v13 = vrot.slane %v1886_v40, %v2314_v45  ;;  %v2336_v56 = vrot.slane %v1886_v40, %v2329_v4 }
  0xbc   :  { %3120 = vst [vmem:[#allocation5_spill] sm:$0xff] %v2261_v29  ;;  %3121 = vst [vmem:[#allocation6_spill] sm:$0xff] %v2269_v34  ;;  %v2341_v59 = vrot.slane %v1886_v40, %v2331_v52  ;;  %v2372_v27 = vrot.slane %v250_v20, %v2303_v42  ;;  %vm778_vm4 = vcmp.lt.s32.totalorder %v2293_v38, 1  ;;  %vm1107_vm5 = vcmp.lt.s32.totalorder %v2293_v38, 127 }
  0xbd   :  { %3122 = vst [vmem:[#allocation7_spill] sm:$0xff] %v2275_v35  ;;  %vm1290_vm8 = vcmp.lt.s32.totalorder %v2293_v38, 113  ;;  %vm1473_vm9 = vcmp.lt.s32.totalorder %v2293_v38, 112  ;;  %vm1656_vm10 = vcmp.lt.s32.totalorder %v2293_v38, 111  ;;  %v1933_v38 = vld [vmem:[%s3081_s1 + $0x20] sm:$0xf] }
  0xbf   :  { %307 = vrot.lane.b32.xlu0 %v2169_v58, %s1958_s3  ;;  %311 = vrot.lane.b32.xlu1 %v2171_v60, %s1958_s3 }
  0xc3   :  { %213 = vrot.lane.b32.xlu0 %v2153_v49, %s1959_s4  ;;  %305 = vrot.lane.b32.xlu1 %v2177_v61, %s1958_s3 }
  0xc7   :  { %219 = vrot.lane.b32.xlu0 %v2155_v50, %s1959_s4  ;;  %211 = vrot.lane.b32.xlu1 %v2148_v46, %s1959_s4 }
  0xcb   :  { %231 = vrot.lane.b32.xlu0 %v2161_v54, %s1959_s4  ;;  %217 = vrot.lane.b32.xlu1 %v2163_v57, %s1959_s4 }
  0xcf   :  { %225 = vrot.lane.b32.xlu0 %v2169_v58, %s1959_s4  ;;  %229 = vrot.lane.b32.xlu1 %v2171_v60, %s1959_s4 }
  0xd3   :  { %573 = vrot.lane.b32.xlu0 %v2153_v49, %s1960_s18  ;;  %223 = vrot.lane.b32.xlu1 %v2177_v61, %s1959_s4 }
  0xd7   :  { %579 = vrot.lane.b32.xlu0 %v2155_v50, %s1960_s18  ;;  %571 = vrot.lane.b32.xlu1 %v2148_v46, %s1960_s18 }
  0xdb   :  { %591 = vrot.lane.b32.xlu0 %v2161_v54, %s1960_s18  ;;  %577 = vrot.lane.b32.xlu1 %v2163_v57, %s1960_s18 }
  0xdf   :  { %585 = vrot.lane.b32.xlu0 %v2169_v58, %s1960_s18  ;;  %589 = vrot.lane.b32.xlu1 %v2171_v60, %s1960_s18 }
  0xe3   :  { %756 = vrot.lane.b32.xlu0 %v2153_v49, %s1961_s19  ;;  %583 = vrot.lane.b32.xlu1 %v2177_v61, %s1960_s18 }
  0xe7   :  { %762 = vrot.lane.b32.xlu0 %v2155_v50, %s1961_s19  ;;  %754 = vrot.lane.b32.xlu1 %v2148_v46, %s1961_s19 }
  0xeb   :  { %774 = vrot.lane.b32.xlu0 %v2161_v54, %s1961_s19  ;;  %760 = vrot.lane.b32.xlu1 %v2163_v57, %s1961_s19 }
  0xef   :  { %768 = vrot.lane.b32.xlu0 %v2169_v58, %s1961_s19  ;;  %772 = vrot.lane.b32.xlu1 %v2171_v60, %s1961_s19 }
  0xf3   :  { %1091 = vrot.lane.b32.xlu0 %v2155_v50, %s1962_s20  ;;  %766 = vrot.lane.b32.xlu1 %v2177_v61, %s1961_s19 }
  0xf7   :  { %1097 = vrot.lane.b32.xlu0 %v2169_v58, %s1962_s20  ;;  %1089 = vrot.lane.b32.xlu1 %v2163_v57, %s1962_s20 }
  0xfb   :  { %1085 = vrot.lane.b32.xlu0 %v2153_v49, %s1962_s20  ;;  %1095 = vrot.lane.b32.xlu1 %v2177_v61, %s1962_s20 }
  0xff   :  { %1103 = vrot.lane.b32.xlu0 %v2161_v54, %s1962_s20  ;;  %1083 = vrot.lane.b32.xlu1 %v2148_v46, %s1962_s20 }
 0x103   :  { %1274 = vrot.lane.b32.xlu0 %v2155_v50, %s1963_s21  ;;  %1101 = vrot.lane.b32.xlu1 %v2171_v60, %s1962_s20 }
 0x107   :  { %1280 = vrot.lane.b32.xlu0 %v2169_v58, %s1963_s21  ;;  %1272 = vrot.lane.b32.xlu1 %v2163_v57, %s1963_s21 }
 0x10b   :  { %1268 = vrot.lane.b32.xlu0 %v2153_v49, %s1963_s21  ;;  %1278 = vrot.lane.b32.xlu1 %v2177_v61, %s1963_s21 }
 0x10f   :  { %303 = vrot.lane.b32.xlu0 %v2261_v29, %s1958_s3  ;;  %1266 = vrot.lane.b32.xlu1 %v2148_v46, %s1963_s21 }
 0x113   :  { %309 = vrot.lane.b32.xlu0 %v2267_v30, %s1958_s3  ;;  %297 = vrot.lane.b32.xlu1 %v2269_v34, %s1958_s3 }
 0x117   :  { %221 = vrot.lane.b32.xlu0 %v2261_v29, %s1959_s4  ;;  %315 = vrot.lane.b32.xlu1 %v2275_v35, %s1958_s3 }
 0x11b   :  { %227 = vrot.lane.b32.xlu0 %v2267_v30, %s1959_s4  ;;  %215 = vrot.lane.b32.xlu1 %v2269_v34, %s1959_s4 }
 0x11f   :  { %581 = vrot.lane.b32.xlu0 %v2261_v29, %s1960_s18  ;;  %233 = vrot.lane.b32.xlu1 %v2275_v35, %s1959_s4 }
 0x123   :  { %587 = vrot.lane.b32.xlu0 %v2267_v30, %s1960_s18  ;;  %575 = vrot.lane.b32.xlu1 %v2269_v34, %s1960_s18 }
 0x125   :  { %v294_v37 = vpop.permute.xlu1 %293 }
 0x127   :  { %764 = vrot.lane.b32.xlu0 %v2261_v29, %s1961_s19  ;;  %593 = vrot.lane.b32.xlu1 %v2275_v35, %s1960_s18 }
 0x129   :  { %v302_v0 = vpop.permute.xlu0 %301  ;;  %v296_v41 = vpop.permute.xlu1 %295 }
 0x12a   :  { %v325_v1 = vsel %vm317_vm1, %v296_v41, %v302_v0 }
 0x12b   :  { %770 = vrot.lane.b32.xlu0 %v2267_v30, %s1961_s19  ;;  %758 = vrot.lane.b32.xlu1 %v2269_v34, %s1961_s19  ;;  %v358_v48 = vmul.f32 %v2310_v43, %v325_v1 }
 0x12d   :  { %v314_v44 = vpop.permute.xlu0 %313  ;;  %v300_v9 = vpop.permute.xlu1 %299 }
 0x12e   :  { %v324_v10 = vsel %vm317_vm1, %v294_v37, %v300_v9  ;;  %v328_v12 = vsel %vm317_vm1, %v314_v44, %v296_v41 }
 0x12f   :  { %1093 = vrot.lane.b32.xlu0 %v2261_v29, %s1962_s20  ;;  %776 = vrot.lane.b32.xlu1 %v2275_v35, %s1961_s19  ;;  %v354_v47 = vmul.f32 %v2310_v43, %v324_v10  ;;  %v357_v62 = vmul.f32 %v2321_v13, %v328_v12 }
 0x131   :  { %v308_v51 = vpop.permute.xlu0 %307  ;;  %v312_v53 = vpop.permute.xlu1 %311  ;;  %v366_v2 = vpack.c.bf16 %v358_v48, %v354_v47  ;;  %v2410_v47 = vrot.slane %v250_v20, %v2329_v4  ;;  %v2413_v48 = vrot.slane %v250_v20, %v2331_v52 }
 0x132   :  { %v327_v55 = vsel %vm317_vm1, %v312_v53, %v294_v37  ;;  %v322_v5 = vsel %vm317_vm1, %v302_v0, %v308_v51  ;;  %v319_v6 = vsel %vm317_vm1, %v308_v51, %v314_v44  ;;  %v2389_v37 = vrot.slane %v250_v20, %v2314_v45 }
 0x133   :  { %1105 = vrot.lane.b32.xlu0 %v2275_v35, %s1962_s20  ;;  %v353_v63 = vmul.f32 %v2321_v13, %v327_v55  ;;  %1087 = vrot.lane.b32.xlu1 %v2269_v34, %s1962_s20  ;;  %v359_v14 = vmul.f32 %v2336_v56, %v322_v5  ;;  %v360_v22 = vmul.f32 %v2341_v59, %v319_v6 }
 0x134   :  { %392 = vmatprep.subr.bf16.mxu0 %v366_v2 }
 0x135   :  { %v214_v7 = vpop.permute.xlu0 %213  ;;  %v306_v8 = vpop.permute.xlu1 %305  ;;  %v365_v11 = vpack.c.bf16 %v357_v62, %v353_v63 }
 0x136   :  { %v318_v15 = vsel %vm317_vm1, %v306_v8, %v312_v53  ;;  %v321_v16 = vsel %vm317_vm1, %v300_v9, %v306_v8 }
 0x137   :  { %1286 = vrot.lane.b32.xlu0 %v2161_v54, %s1963_s21  ;;  %v355_v18 = vmul.f32 %v2336_v56, %v321_v16  ;;  %1099 = vrot.lane.b32.xlu1 %v2267_v30, %s1962_s20  ;;  %v356_v19 = vmul.f32 %v2341_v59, %v318_v15  ;;  %v2607_v16 = vld [vmem:[%s3079_s7 + $0x14] sm:$0xf] }
 0x138   :  { %393 = vmatpush1.bf16.msra.mxu0 %v365_v11  ;;  %3127 = vst [vmem:[#allocation12_spill] sm:$0xff] %v2607_v16 }
 0x139   :  { %v220_v21 = vpop.permute.xlu0 %219  ;;  %v212_v24 = vpop.permute.xlu1 %211  ;;  %v368_v23 = vpack.c.bf16 %v360_v22, %v356_v19  ;;  %v367_v26 = vpack.c.bf16 %v359_v14, %v355_v18 }
 0x13a   :  { %v245_v25 = vsel %vm237_vm2, %v214_v7, %v220_v21 }
 0x13b   :  { %1276 = vrot.lane.b32.xlu0 %v2261_v29, %s1963_s21  ;;  %1284 = vrot.lane.b32.xlu1 %v2171_v60, %s1963_s21  ;;  %v2383_v33 = vmul.f32 %v2372_v27, %v245_v25 }
 0x13c   :  { %433 = vmatprep.subr.bf16.mxu1 %v368_v23 }
 0x13d   :  { %434 = vmatpush1.bf16.msra.mxu1 %v367_v26  ;;  %v232_v28 = vpop.permute.xlu0 %231  ;;  %v218_v17 = vpop.permute.xlu1 %217 }
 0x13e   :  { %v248_v31 = vsel %vm237_vm2, %v232_v28, %v214_v7  ;;  %v244_v32 = vsel %vm237_vm2, %v212_v24, %v218_v17  ;;  %v1896_v7 = vld [vmem:[%s3079_s7 + $0x8] sm:$0xf] }
 0x13f   :  { %1288 = vrot.lane.b32.xlu0 %v2275_v35, %s1963_s21  ;;  %v2386_v36 = vmul.f32 %v2372_v27, %v244_v32  ;;  %1270 = vrot.lane.b32.xlu1 %v2269_v34, %s1963_s21  ;;  %v2404_v9 = vmul.f32 %v2389_v37, %v248_v31  ;;  %v2452_v18 = vrot.slane %v1896_v7, %v2303_v42 }
 0x140   :  { %v2469_v23 = vrot.slane %v1896_v7, %v2314_v45 }
 0x141   :  { %v226_v39 = vpop.permute.xlu0 %225  ;;  %v230_v0 = vpop.permute.xlu1 %229 }
 0x142   :  { %v239_v40 = vsel %vm237_vm2, %v226_v39, %v232_v28  ;;  %v242_v41 = vsel %vm237_vm2, %v220_v21, %v226_v39  ;;  %v247_v44 = vsel %vm237_vm2, %v230_v0, %v212_v24 }
 0x143   :  { %1457 = vrot.lane.b32.xlu0 %v2155_v50, %s1964_s26  ;;  %v2407_v10 = vmul.f32 %v2389_v37, %v247_v44  ;;  %1282 = vrot.lane.b32.xlu1 %v2267_v30, %s1963_s21  ;;  %v2427_v62 = vmul.f32 %v2410_v47, %v242_v41  ;;  %v2430_v63 = vmul.f32 %v2413_v48, %v239_v40 }
 0x144   :  { %v2490_v41 = vrot.slane %v1896_v7, %v2329_v4  ;;  %v2493_v44 = vrot.slane %v1896_v7, %v2331_v52 }
 0x145   :  { %v574_v12 = vpop.permute.xlu0 %573  ;;  %v224_v53 = vpop.permute.xlu1 %223 }
 0x146   :  { %v238_v2 = vsel %vm237_vm2, %v224_v53, %v230_v0  ;;  %v241_v55 = vsel %vm237_vm2, %v218_v17, %v224_v53 }
 0x147   :  { %1463 = vrot.lane.b32.xlu0 %v2169_v58, %s1964_s26  ;;  %v2433_v5 = vmul.f32 %v2410_v47, %v241_v55  ;;  %v2436_v6 = vmul.f32 %v2413_v48, %v238_v2  ;;  %1455 = vrot.lane.b32.xlu1 %v2163_v57, %s1964_s26 }
 0x149   :  { %v580_v8 = vpop.permute.xlu0 %579  ;;  %v572_v14 = vpop.permute.xlu1 %571 }
 0x14a   :  { %v603_v15 = vsel %vm595_vm3, %v574_v12, %v580_v8 }
 0x14b   :  { %1451 = vrot.lane.b32.xlu0 %v2153_v49, %s1964_s26  ;;  %1461 = vrot.lane.b32.xlu1 %v2177_v61, %s1964_s26  ;;  %v2463_v24 = vmul.f32 %v2452_v18, %v603_v15 }
 0x14d   :  { %v592_v19 = vpop.permute.xlu0 %591  ;;  %v578_v22 = vpop.permute.xlu1 %577 }
 0x14e   :  { %v606_v20 = vsel %vm595_vm3, %v592_v19, %v574_v12  ;;  %v602_v21 = vsel %vm595_vm3, %v572_v14, %v578_v22 }
 0x14f   :  { %1469 = vrot.lane.b32.xlu0 %v2161_v54, %s1964_s26  ;;  %v2466_v25 = vmul.f32 %v2452_v18, %v602_v21  ;;  %1449 = vrot.lane.b32.xlu1 %v2148_v46, %s1964_s26  ;;  %v2484_v0 = vmul.f32 %v2469_v23, %v606_v20 }
 0x151   :  { %v586_v26 = vpop.permute.xlu0 %585  ;;  %v590_v28 = vpop.permute.xlu1 %589 }
 0x152   :  { %v597_v17 = vsel %vm595_vm3, %v586_v26, %v592_v19  ;;  %v600_v31 = vsel %vm595_vm3, %v580_v8, %v586_v26  ;;  %v605_v39 = vsel %vm595_vm3, %v590_v28, %v572_v14 }
 0x153   :  { %1459 = vrot.lane.b32.xlu0 %v2261_v29, %s1964_s26  ;;  %v2487_v40 = vmul.f32 %v2469_v23, %v605_v39  ;;  %1467 = vrot.lane.b32.xlu1 %v2171_v60, %s1964_s26  ;;  %v2507_v7 = vmul.f32 %v2490_v41, %v600_v31  ;;  %v2510_v14 = vmul.f32 %v2493_v44, %v597_v17 }
 0x155   :  { %v757_v12 = vpop.permute.xlu0 %756  ;;  %v584_v2 = vpop.permute.xlu1 %583 }
 0x156   :  { %v596_v55 = vsel %vm595_vm3, %v584_v2, %v590_v28  ;;  %v599_v8 = vsel %vm595_vm3, %v578_v22, %v584_v2  ;;  %v2523_v22 = vld [vmem:[%s3079_s7 + $0xc] sm:$0xf] }
 0x157   :  { %1471 = vrot.lane.b32.xlu0 %v2275_v35, %s1964_s26  ;;  %v2513_v15 = vmul.f32 %v2490_v41, %v599_v8  ;;  %v2516_v19 = vmul.f32 %v2493_v44, %v596_v55  ;;  %1453 = vrot.lane.b32.xlu1 %v2269_v34, %s1964_s26  ;;  %v2535_v31 = vrot.slane %v2523_v22, %v2303_v42 }
 0x158   :  { %v2556_v17 = vrot.slane %v2523_v22, %v2314_v45  ;;  %v2579_v51 = vrot.slane %v2523_v22, %v2329_v4 }
 0x159   :  { %v763_v20 = vpop.permute.xlu0 %762  ;;  %v755_v26 = vpop.permute.xlu1 %754 }
 0x15a   :  { %v786_v28 = vsel %vm778_vm4, %v757_v12, %v763_v20 }
 0x15b   :  { %1640 = vrot.lane.b32.xlu0 %v2155_v50, %s1965_s30  ;;  %1465 = vrot.lane.b32.xlu1 %v2267_v30, %s1964_s26  ;;  %v2549_v21 = vmul.f32 %v2535_v31, %v786_v28 }
 0x15d   :  { %v2539_v39 = vpop.permute.xlu0 %774  ;;  %v761_v2 = vpop.permute.xlu1 %760 }
 0x15e   :  { %v789_v55 = vsel %vm778_vm4, %v2539_v39, %v757_v12  ;;  %v785_v8 = vsel %vm778_vm4, %v755_v26, %v761_v2 }
 0x15f   :  { %1646 = vrot.lane.b32.xlu0 %v2169_v58, %s1965_s30  ;;  %v2552_v53 = vmul.f32 %v2535_v31, %v785_v8  ;;  %1638 = vrot.lane.b32.xlu1 %v2163_v57, %s1965_s30  ;;  %v2572_v8 = vmul.f32 %v2556_v17, %v789_v55 }
 0x161   :  { %v2560_v12 = vpop.permute.xlu0 %768  ;;  %v2562_v32 = vpop.permute.xlu1 %772  ;;  %3123 = vst [vmem:[#allocation8_spill] sm:$0xff] %v2572_v8  ;;  %v2638_v8 = vrot.slane %v2607_v16, %v2314_v45 }
 0x162   :  { %v788_v28 = vsel %vm778_vm4, %v2562_v32, %v755_v26  ;;  %v783_v26 = vsel %vm778_vm4, %v763_v20, %v2560_v12 }
 0x163   :  { %1634 = vrot.lane.b32.xlu0 %v2153_v49, %s1965_s30  ;;  %v2575_v11 = vmul.f32 %v2556_v17, %v788_v28  ;;  %1644 = vrot.lane.b32.xlu1 %v2177_v61, %s1965_s30  ;;  %v2597_v1 = vmul.f32 %v2579_v51, %v783_v26  ;;  %3132 = vst [vmem:[#allocation17_spill] sm:$0xff] %v2638_v8 }
 0x165   :  { %3124 = vst [vmem:[#allocation9_spill] sm:$0xff] %v2575_v11  ;;  %v1092_v3 = vpop.permute.xlu0 %1091  ;;  %v2588_v55 = vpop.permute.xlu1 %766  ;;  %3125 = vst [vmem:[#allocation10_spill] sm:$0xff] %v2597_v1 }
 0x166   :  { %v782_v28 = vsel %vm778_vm4, %v761_v2, %v2588_v55 }
 0x167   :  { %1652 = vrot.lane.b32.xlu0 %v2161_v54, %s1965_s30  ;;  %v2600_v20 = vmul.f32 %v2579_v51, %v782_v28  ;;  %1632 = vrot.lane.b32.xlu1 %v2148_v46, %s1965_s30  ;;  %v2617_v28 = vrot.slane %v2607_v16, %v2303_v42 }
 0x169   :  { %3126 = vst [vmem:[#allocation11_spill] sm:$0xff] %v2600_v20  ;;  %v1098_v2 = vpop.permute.xlu0 %1097  ;;  %v1090_v58 = vpop.permute.xlu1 %1089  ;;  %3128 = vst [vmem:[#allocation13_spill] sm:$0xff] %v2617_v28 }
 0x16a   :  { %v1112_v26 = vsel %vm1107_vm5, %v1092_v3, %v1098_v2 }
 0x16b   :  { %1642 = vrot.lane.b32.xlu0 %v2261_v29, %s1965_s30  ;;  %1650 = vrot.lane.b32.xlu1 %v2171_v60, %s1965_s30  ;;  %v2631_v29 = vmul.f32 %v2617_v28, %v1112_v26 }
 0x16d   :  { %v2621_v46 = vpop.permute.xlu0 %1085  ;;  %v1096_v11 = vpop.permute.xlu1 %1095  ;;  %3130 = vst [vmem:[#allocation15_spill] sm:$0xff] %v2631_v29 }
 0x16e   :  { %3129 = vst [vmem:[#allocation14_spill] sm:$0xff] %v2621_v46  ;;  %v1115_v61 = vsel %vm1107_vm5, %v2621_v46, %v1092_v3  ;;  %v1111_v20 = vsel %vm1107_vm5, %v1090_v58, %v1096_v11 }
 0x16f   :  { %1654 = vrot.lane.b32.xlu0 %v2275_v35, %s1965_s30  ;;  %v2634_v1 = vmul.f32 %v2617_v28, %v1111_v20  ;;  %1636 = vrot.lane.b32.xlu1 %v2269_v34, %s1965_s30  ;;  %v2652_v20 = vmul.f32 %v2638_v8, %v1115_v61  ;;  %v2659_v34 = vrot.slane %v2607_v16, %v2329_v4 }
 0x171   :  { %3131 = vst [vmem:[#allocation16_spill] sm:$0xff] %v2634_v1  ;;  %v2642_v3 = vpop.permute.xlu0 %1103  ;;  %v2644_v46 = vpop.permute.xlu1 %1083  ;;  %3135 = vst [vmem:[#allocation20_spill] sm:$0xff] %v2652_v20 }
 0x172   :  { %3133 = vst [vmem:[#allocation18_spill] sm:$0xff] %v2642_v3  ;;  %3134 = vst [vmem:[#allocation19_spill] sm:$0xff] %v2644_v46  ;;  %v1114_v26 = vsel %vm1107_vm5, %v2644_v46, %v1090_v58  ;;  %v1109_v35 = vsel %vm1107_vm5, %v1098_v2, %v2642_v3  ;;  %v1815_v58 = vld [vmem:[%s3080_s2] sm:$0xff] }
 0x173   :  { %v2655_v28 = vmul.f32 %v2638_v8, %v1114_v26  ;;  %3137 = vst [vmem:[#allocation22_spill] sm:$0xff] %v2659_v34  ;;  %1648 = vrot.lane.b32.xlu1 %v2267_v30, %s1965_s30  ;;  %v2679_v8 = vmul.f32 %v2659_v34, %v1109_v35 }
 0x175   :  { %3136 = vst [vmem:[#allocation21_spill] sm:$0xff] %v2655_v28  ;;  %v2666_v1 = vpop.permute.xlu0 %1274  ;;  %v2673_v26 = vpop.permute.xlu1 %1101  ;;  %3140 = vst [vmem:[#allocation25_spill] sm:$0xff] %v2679_v8 }
 0x176   :  { %3138 = vst [vmem:[#allocation23_spill] sm:$0xff] %v2666_v1  ;;  %3139 = vst [vmem:[#allocation24_spill] sm:$0xff] %v2673_v26  ;;  %v1108_v29 = vsel %vm1107_vm5, %v1096_v11, %v2673_v26 }
 0x177   :  { %v2682_v2 = vmul.f32 %v2659_v34, %v1108_v29  ;;  %1818 = vperm.xlu1 %1948, %v1815_v58  }
 0x179   :  { %3141 = vst [vmem:[#allocation26_spill] sm:$0xff] %v2682_v2  ;;  %v2684_v1 = vpop.permute.xlu0 %1280  ;;  %v2688_v46 = vpop.permute.xlu1 %1272 }
 0x17a   :  { %3142 = vst [vmem:[#allocation27_spill] sm:$0xff] %v2684_v1  ;;  %3143 = vst [vmem:[#allocation28_spill] sm:$0xff] %v2688_v46 }
 0x17d   :  { %v2690_v61 = vpop.permute.xlu0 %1268  ;;  %v2692_v28 = vpop.permute.xlu1 %1278 }
 0x17e   :  { %3144 = vst [vmem:[#allocation29_spill] sm:$0xff] %v2690_v61  ;;  %3145 = vst [vmem:[#allocation30_spill] sm:$0xff] %v2692_v28 }
 0x181   :  { %v304_v20 = vpop.permute.xlu0 %303  ;;  %v2694_v11 = vpop.permute.xlu1 %1266 }
 0x182   :  { %3146 = vst [vmem:[#allocation31_spill] sm:$0xff] %v2694_v11 }
 0x185   :  { %v310_v35 = vpop.permute.xlu0 %309  ;;  %v298_v26 = vpop.permute.xlu1 %297 }
 0x186   :  { %v323_v29 = vsel %vm317_vm1, %v304_v20, %v310_v35  ;;  %v326_v58 = vsel %vm317_vm1, %v298_v26, %v304_v20 }
 0x187   :  { %v362_v34 = vmul.f32 %v2310_v43, %v326_v58  ;;  %v363_v3 = vmul.f32 %v2336_v56, %v323_v29 }
 0x189   :  { %v222_v2 = vpop.permute.xlu0 %221  ;;  %v370_v8 = vpack.c.bf16 %v362_v34, %v362_v34  ;;  %v316_v61 = vpop.permute.xlu1 %315  ;;  %v371_v28 = vpack.c.bf16 %v363_v3, %v363_v3 }
 0x18a   :  { %v320_v46 = vsel %vm317_vm1, %v310_v35, %v316_v61  ;;  %v329_v11 = vsel %vm317_vm1, %v316_v61, %v298_v26 }
 0x18b   :  { %v361_v1 = vmul.f32 %v2321_v13, %v329_v11  ;;  %v364_v16 = vmul.f32 %v2341_v59, %v320_v46  ;;  %1888 = vmatprep.subr.msk.bf16.mxu0 %vm379_vm6, %v370_v8  ;;  %v387_v13 = vsel %vm379_vm6, %v371_v28, 0 }
 0x18d   :  { %v228_v43 = vpop.permute.xlu0 %227  ;;  %v369_v20 = vpack.c.bf16 %v361_v1, %v361_v1  ;;  %v372_v56 = vpack.c.bf16 %v364_v16, %v364_v16  ;;  %v216_v29 = vpop.permute.xlu1 %215  ;;  %v1887_v1 = vld [vmem:[%s3081_s1 + $0x4] sm:$0xf] }
 0x18e   :  { %v243_v34 = vsel %vm237_vm2, %v222_v2, %v228_v43  ;;  %v246_v35 = vsel %vm237_vm2, %v216_v29, %v222_v2 }
 0x18f   :  { %v282_v61 = vmul.f32 %v2410_v47, %v243_v34  ;;  %v281_v3 = vmul.f32 %v2372_v27, %v246_v35  ;;  %1890 = vmatprep.subr.msk.bf16.mxu1 %vm379_vm6, %v372_v56  ;;  %v381_v46 = vsel %vm379_vm6, %v369_v20, 0  ;;  %v3147_v47 = vpack.c.bf16 %v2383_v33, %v2386_v36  ;;  %v292_v35 = vld [vmem:[%s3081_s1] sm:$0xf] }
 0x190   :  { %395 = vmatpush1.bf16.msra.mxu0 %v381_v46  ;;  %436 = vmatpush1.bf16.msra.mxu1 %v387_v13  ;;  %v3148_v27 = vpack.c.bf16 %v2430_v63, %v2436_v6  ;;  %v3149_v33 = vpack.c.bf16 %v2404_v9, %v2407_v10  ;;  %v3150_v36 = vpack.c.bf16 %v2427_v62, %v2433_v5 }
 0x191   :  { %v582_v59 = vpop.permute.xlu0 %581  ;;  %v234_v16 = vpop.permute.xlu1 %233  ;;  %489 = vmatprep.subr.bf16.mxu0 %v3147_v47  ;;  %v290_v8 = vpack.c.bf16 %v282_v61, %v282_v61  ;;  %v289_v2 = vpack.c.bf16 %v281_v3, %v281_v3  ;;  %v779_v10 = vsel %vm778_vm4, %v2588_v55, %v2562_v32  ;;  %v809_v34 = vrot.slane %v2523_v22, %v2331_v52  ;;  %v1908_v61 = vld [vmem:[%s3079_s7 + $0x10] sm:$0xf] }
 0x192   :  { %530 = vmatprep.subr.bf16.mxu1 %v3148_v27  ;;  %v240_v28 = vsel %vm237_vm2, %v228_v43, %v234_v16  ;;  %v249_v26 = vsel %vm237_vm2, %v234_v16, %v216_v29  ;;  %v3152_v55 = vpack.c.bf16 %v2463_v24, %v2466_v25  ;;  %v3153_v22 = vpack.c.bf16 %v2510_v14, %v2516_v19 }
 0x193   :  { %v280_v11 = vmul.f32 %v2389_v37, %v249_v26  ;;  %v283_v58 = vmul.f32 %v2413_v48, %v240_v28  ;;  %1889 = vmatmul.mubr.msk.bf16.vlgmr.msra.gmra.mrb[0].mxu0 %vm375_vm7, %v1887_v1  ;;  %1891 = vmatmul.mubr.msk.bf16.vlgmr.msra.gmra.mrb[0].mxu1 %vm375_vm7, %v1887_v1  ;;  %v3151_v48 = vmov 0   ;;  %v484_v29 = vsel %vm379_vm6, %v290_v8, 0 }
 0x194   :  { %490 = vmatpush1.bf16.msra.mxu0 %v3149_v33  ;;  %531 = vmatpush1.bf16.msra.mxu1 %v3150_v36  ;;  %v817_v3 = vmul.f32 %v809_v34, %v779_v10  ;;  %v3154_v19 = vpack.c.bf16 %v2484_v0, %v2487_v40  ;;  %v947_v16 = vrot.slane %v1908_v61, %v2303_v42  ;;  %v3160_v10 = vld [vmem:[#allocation10_spill] sm:$0xff] }
 0x195   :  { %v588_v63 = vpop.permute.xlu0 %587  ;;  %v288_v6 = vpack.c.bf16 %v280_v11, %v280_v11  ;;  %v291_v43 = vpack.c.bf16 %v283_v58, %v283_v58  ;;  %v576_v20 = vpop.permute.xlu1 %575  ;;  %1892 = vmatprep.subr.msk.bf16.mxu0 %vm379_vm6, %v289_v2  ;;  %521 = vmatprep.mubr.bf16.mxu0 %v3151_v48  ;;  %v1897_v11 = vld [vmem:[%s3081_s1 + $0x8] sm:$0xf]  ;;  %v943_v58 = vrot.slane %v1908_v61, %v2314_v45 }
 0x196   :  { %v601_v37 = vsel %vm595_vm3, %v582_v59, %v588_v63  ;;  %v604_v56 = vsel %vm595_vm3, %v576_v20, %v582_v59  ;;  %562 = vmatprep.mubr.bf16.mxu1 %v3151_v48  ;;  %v3155_v59 = vpack.c.bf16 %v2507_v7, %v2513_v15  ;;  %v3156_v36 = vpack.c.bf16 %v2549_v21, %v2552_v53 }
 0x197   :  { %v641_v9 = vmul.f32 %v2490_v41, %v601_v37  ;;  %v640_v62 = vmul.f32 %v2452_v18, %v604_v56  ;;  %1894 = vmatprep.subr.msk.bf16.mxu1 %vm379_vm6, %v291_v43  ;;  %v478_v5 = vsel %vm379_vm6, %v288_v6, 0  ;;  %v780_v18 = vsel %vm778_vm4, %v2560_v12, %v2539_v39 }
 0x198   :  { %492 = vmatpush1.bf16.msra.mxu0 %v478_v5  ;;  %533 = vmatpush1.bf16.msra.mxu1 %v484_v29  ;;  %v821_v14 = vmul.f32 %v809_v34, %v780_v18  ;;  %v964_v56 = vmul.f32 %v943_v58, %v2153_v49  ;;  %v3164_v49 = vld [vmem:[#allocation3_spill] sm:$0xff] }
 0x199   :  { %v765_v41 = vpop.permute.xlu0 %764  ;;  %v594_v32 = vpop.permute.xlu1 %593  ;;  %668 = vmatprep.subr.bf16.mxu0 %v3152_v55  ;;  %709 = vmatprep.subr.bf16.mxu1 %v3153_v22  ;;  %v649_v46 = vpack.c.bf16 %v641_v9, %v641_v9  ;;  %v648_v12 = vpack.c.bf16 %v640_v62, %v640_v62  ;;  %v3161_v62 = vld [vmem:[#allocation11_spill] sm:$0xff] }
 0x19a   :  { %v598_v13 = vsel %vm595_vm3, %v588_v63, %v594_v32  ;;  %v607_v39 = vsel %vm595_vm3, %v594_v32, %v576_v20  ;;  %v829_v26 = vpack.c.bf16 %v821_v14, %v817_v3  ;;  %v965_v63 = vmul.f32 %v947_v16, %v2155_v50  ;;  %v3157_v50 = vld [vmem:[#allocation8_spill] sm:$0xff]  ;;  %v3165_v32 = vld [vmem:[#allocation5_spill] sm:$0xff] }
 0x19b   :  { %v639_v24 = vmul.f32 %v2469_v23, %v607_v39  ;;  %v642_v25 = vmul.f32 %v2493_v44, %v598_v13  ;;  %1893 = vmatmul.mubr.msk.bf16.vlgmr.msra.gmra.mrb[4].mxu0 %vm375_vm7, %v292_v35  ;;  %1895 = vmatmul.mubr.msk.bf16.vlgmr.msra.gmra.mrb[4].mxu1 %vm375_vm7, %v292_v35  ;;  %v955_v23 = vrot.slane %v1908_v61, %v2331_v52  ;;  %v663_v28 = vsel %vm379_vm6, %v649_v46, 0  ;;  %v3167_v13 = vld [vmem:[#allocation4_spill] sm:$0xff] }
 0x19c   :  { %669 = vmatpush1.bf16.msra.mxu0 %v3154_v19  ;;  %710 = vmatpush1.bf16.msra.mxu1 %v3155_v59  ;;  %v3162_v5 = vpack.c.bf16 %v3160_v10, %v3161_v62 }
 0x19d   :  { %v771_v1 = vpop.permute.xlu0 %770  ;;  %v647_v47 = vpack.c.bf16 %v639_v24, %v639_v24  ;;  %v650_v44 = vpack.c.bf16 %v642_v25, %v642_v25  ;;  %v759_v27 = vpop.permute.xlu1 %758  ;;  %1898 = vmatprep.subr.msk.bf16.mxu0 %vm379_vm6, %v648_v12  ;;  %700 = vmatprep.mubr.bf16.mxu0 %v3151_v48  ;;  %v963_v6 = vmul.f32 %v955_v23, %v2171_v60  ;;  %v3158_v60 = vld [vmem:[#allocation9_spill] sm:$0xff]  ;;  %v3168_v12 = vld [vmem:[#allocation7_spill] sm:$0xff] }
 0x19e   :  { %v784_v8 = vsel %vm778_vm4, %v765_v41, %v771_v1  ;;  %v787_v0 = vsel %vm778_vm4, %v759_v27, %v765_v41  ;;  %741 = vmatprep.mubr.bf16.mxu1 %v3151_v48  ;;  %v967_v43 = vmul.f32 %v955_v23, %v2161_v54  ;;  %v3159_v54 = vpack.c.bf16 %v3157_v50, %v3158_v60  ;;  %v3163_v41 = vld [vmem:[#allocation2_spill] sm:$0xff]  ;;  %v3177_v50 = vld [vmem:[#allocation28_spill] sm:$0xff] }
 0x19f   :  { %v824_v40 = vmul.f32 %v2579_v51, %v784_v8  ;;  %v823_v7 = vmul.f32 %v2535_v31, %v787_v0  ;;  %1900 = vmatprep.subr.msk.bf16.mxu1 %vm379_vm6, %v650_v44  ;;  %v657_v15 = vsel %vm379_vm6, %v647_v47, 0  ;;  %v961_v51 = vmul.f32 %v947_v16, %v2163_v57  ;;  %v3170_v44 = vld [vmem:[#allocation19_spill] sm:$0xff] }
 0x1a0   :  { %671 = vmatpush1.bf16.msra.mxu0 %v657_v15  ;;  %712 = vmatpush1.bf16.msra.mxu1 %v663_v28  ;;  %v951_v31 = vrot.slane %v1908_v61, %v2329_v4  ;;  %v960_v35 = vmul.f32 %v943_v58, %v3163_v41  ;;  %v3166_v61 = vld [vmem:[#allocation6_spill] sm:$0xff]  ;;  %v971_v24 = vmul.f32 %v955_v23, %v3168_v12  ;;  %v1920_v28 = vld [vmem:[%s3079_s7 + $0x18] sm:$0xf] }
 0x1a1   :  { %v2803_v2 = vpop.permute.xlu0 %1093  ;;  %v777_v33 = vpop.permute.xlu1 %776  ;;  %851 = vmatprep.subr.bf16.mxu0 %v3156_v36  ;;  %892 = vmatprep.subr.bf16.mxu1 %v829_v26  ;;  %v832_v20 = vpack.c.bf16 %v824_v40, %v824_v40  ;;  %v831_v9 = vpack.c.bf16 %v823_v7, %v823_v7  ;;  %v968_v3 = vmul.f32 %v943_v58, %v3166_v61  ;;  %v3172_v40 = vld [vmem:[#allocation14_spill] sm:$0xff]  ;;  %v3182_v12 = vld [vmem:[#allocation29_spill] sm:$0xff] }
 0x1a2   :  { %v781_v57 = vsel %vm778_vm4, %v771_v1, %v777_v33  ;;  %v790_v37 = vsel %vm778_vm4, %v777_v33, %v759_v27  ;;  %v966_v18 = vmul.f32 %v951_v31, %v3164_v49  ;;  %v973_v46 = vpack.c.bf16 %v965_v63, %v961_v51  ;;  %v3171_v27 = vld [vmem:[#allocation24_spill] sm:$0xff]  ;;  %v3173_v7 = vld [vmem:[#allocation18_spill] sm:$0xff] }
 0x1a3   :  { %v822_v53 = vmul.f32 %v2556_v17, %v790_v37  ;;  %v825_v21 = vmul.f32 %v809_v34, %v781_v57  ;;  %1899 = vmatmul.mubr.msk.bf16.vlgmr.msra.gmra.mrb[8].mxu0 %vm375_vm7, %v1897_v11  ;;  %1901 = vmatmul.mubr.msk.bf16.vlgmr.msra.gmra.mrb[8].mxu1 %vm375_vm7, %v1897_v11  ;;  %v969_v17 = vmul.f32 %v947_v16, %v3165_v32  ;;  %v846_v19 = vsel %vm379_vm6, %v832_v20, 0  ;;  %v3169_v16 = vld [vmem:[#allocation12_spill] sm:$0xff]  ;;  %v3179_v41 = vld [vmem:[#allocation22_spill] sm:$0xff] }
 0x1a4   :  { %852 = vmatpush1.bf16.msra.mxu0 %v3159_v54  ;;  %893 = vmatpush1.bf16.msra.mxu1 %v3162_v5  ;;  %v962_v39 = vmul.f32 %v951_v31, %v3167_v13  ;;  %v970_v25 = vmul.f32 %v951_v31, %v2267_v30  ;;  %v975_v59 = vpack.c.bf16 %v967_v43, %v963_v6  ;;  %v1903_v30 = vld [vmem:[%s3081_s1 + $0xc] sm:$0xf]  ;;  %v3178_v54 = vld [vmem:[#allocation17_spill] sm:$0xff] }
 0x1a5   :  { %v1106_v29 = vpop.permute.xlu0 %1105  ;;  %v830_v34 = vpack.c.bf16 %v822_v53, %v822_v53  ;;  %v833_v55 = vpack.c.bf16 %v825_v21, %v825_v21  ;;  %v1088_v22 = vpop.permute.xlu1 %1087  ;;  %1904 = vmatprep.subr.msk.bf16.mxu0 %vm379_vm6, %v831_v9  ;;  %883 = vmatprep.mubr.bf16.mxu0 %v3151_v48  ;;  %v972_v1 = vpack.c.bf16 %v964_v56, %v960_v35  ;;  %v3174_v56 = vld [vmem:[#allocation27_spill] sm:$0xff]  ;;  %v3176_v21 = vld [vmem:[#allocation30_spill] sm:$0xff] }
 0x1a6   :  { %924 = vmatprep.mubr.bf16.mxu1 %v3151_v48  ;;  %v1138_v47 = vrot.slane %v3169_v16, %v2331_v52  ;;  %v1117_v8 = vsel %vm1107_vm5, %v3171_v27, %v3170_v44  ;;  %v974_v0 = vpack.c.bf16 %v966_v18, %v962_v39  ;;  %v1118_v15 = vsel %vm1107_vm5, %v3173_v7, %v3172_v40  ;;  %v3175_v9 = vld [vmem:[#allocation23_spill] sm:$0xff]  ;;  %v3180_v18 = vld [vmem:[#allocation13_spill] sm:$0xff]  ;;  %v1909_v39 = vld [vmem:[%s3081_s1 + $0x10] sm:$0xf] }
 0x1a7   :  { %1906 = vmatprep.subr.msk.bf16.mxu1 %vm379_vm6, %v833_v55  ;;  %v840_v14 = vsel %vm379_vm6, %v830_v34, 0  ;;  %v977_v11 = vpack.c.bf16 %v969_v17, %v969_v17  ;;  %v976_v51 = vpack.c.bf16 %v968_v3, %v968_v3  ;;  %v1116_v58 = vsel %vm1107_vm5, %v1088_v22, %v2803_v2  ;;  %v3181_v3 = vld [vmem:[#allocation31_spill] sm:$0xff] }
 0x1a8   :  { %854 = vmatpush1.bf16.msra.mxu0 %v840_v14  ;;  %895 = vmatpush1.bf16.msra.mxu1 %v846_v19  ;;  %v979_v31 = vpack.c.bf16 %v971_v24, %v971_v24  ;;  %v978_v33 = vpack.c.bf16 %v970_v25, %v970_v25  ;;  %v1146_v36 = vmul.f32 %v1138_v47, %v1117_v8 }
 0x1a9   :  { %v2850_v23 = vpop.permute.xlu0 %1286  ;;  %v1100_v26 = vpop.permute.xlu1 %1099  ;;  %997 = vmatprep.subr.bf16.mxu0 %v973_v46  ;;  %1038 = vmatprep.subr.bf16.mxu1 %v975_v59  ;;  %v1119_v63 = vsel %vm1107_vm5, %v1106_v29, %v1088_v22  ;;  %v1150_v43 = vmul.f32 %v1138_v47, %v1118_v15  ;;  %v2873_v20 = vrot.slane %v1920_v28, %v2303_v42  ;;  %v3183_v59 = vld [vmem:[#allocation15_spill] sm:$0xff] }
 0x1aa   :  { %v1110_v6 = vsel %vm1107_vm5, %v1100_v26, %v1106_v29  ;;  %v1113_v57 = vsel %vm1107_vm5, %v2803_v2, %v1100_v26  ;;  %v1295_v53 = vsel %vm1290_vm8, %v3175_v9, %v3174_v56  ;;  %v1294_v60 = vsel %vm1290_vm8, %v3177_v50, %v3176_v21  ;;  %v3187_v26 = vld [vmem:[#allocation21_spill] sm:$0xff] }
 0x1ab   :  { %1905 = vmatmul.mubr.msk.bf16.vlgmr.msra.gmra.mrb[12].mxu0 %vm375_vm7, %v1903_v30  ;;  %1907 = vmatmul.mubr.msk.bf16.vlgmr.msra.gmra.mrb[12].mxu1 %vm375_vm7, %v1903_v30  ;;  %v1151_v10 = vmul.f32 %v3178_v54, %v1116_v58  ;;  %v986_v2 = vsel %vm379_vm6, %v976_v51, 0  ;;  %v1309_v5 = vrot.slane %v1920_v28, %v2314_v45  ;;  %v1154_v29 = vmul.f32 %v1138_v47, %v1119_v63  ;;  %v3189_v51 = vld [vmem:[#allocation25_spill] sm:$0xff]  ;;  %v3190_v58 = vld [vmem:[#allocation26_spill] sm:$0xff] }
 0x1ac   :  { %998 = vmatpush1.bf16.msra.mxu0 %v972_v1  ;;  %1039 = vmatpush1.bf16.msra.mxu1 %v974_v0  ;;  %v1153_v35 = vmul.f32 %v3179_v41, %v1110_v6  ;;  %v992_v49 = vsel %vm379_vm6, %v978_v33, 0  ;;  %v1152_v32 = vmul.f32 %v3180_v18, %v1113_v57  ;;  %v1317_v17 = vrot.slane %v1920_v28, %v2329_v4  ;;  %v3184_v1 = vld [vmem:[#allocation16_spill] sm:$0xff] }
 0x1ad   :  { %v1277_v37 = vpop.permute.xlu0 %1276  ;;  %v1285_v62 = vpop.permute.xlu1 %1284  ;;  %1910 = vmatprep.subr.msk.bf16.mxu0 %vm379_vm6, %v977_v11  ;;  %1912 = vmatprep.subr.msk.bf16.mxu1 %vm379_vm6, %v979_v31  ;;  %v1321_v34 = vrot.slane %v1920_v28, %v2331_v52  ;;  %v1158_v55 = vpack.c.bf16 %v1150_v43, %v1146_v36  ;;  %v1331_v22 = vmul.f32 %v2873_v20, %v1295_v53  ;;  %v3186_v28 = vld [vmem:[#allocation20_spill] sm:$0xff] }
 0x1ae   :  { %1029 = vmatprep.mubr.bf16.mxu0 %v3151_v48  ;;  %1070 = vmatprep.mubr.bf16.mxu1 %v3151_v48  ;;  %v1327_v61 = vmul.f32 %v2873_v20, %v1294_v60  ;;  %v1300_v46 = vsel %vm1290_vm8, %v1285_v62, %v3181_v3  ;;  %v1298_v24 = vsel %vm1290_vm8, %v3182_v12, %v3175_v9  ;;  %v1915_v41 = vld [vmem:[%s3081_s1 + $0x14] sm:$0xf] }
 0x1af   :  { %v1297_v25 = vsel %vm1290_vm8, %v3181_v3, %v3177_v50  ;;  %v1159_v14 = vpack.c.bf16 %v1151_v10, %v1151_v10  ;;  %v3185_v16 = vpack.c.bf16 %v3183_v59, %v3184_v1  ;;  %v1162_v47 = vpack.c.bf16 %v1154_v29, %v1154_v29 }
 0x1b0   :  { %1000 = vmatpush1.bf16.msra.mxu0 %v986_v2  ;;  %1041 = vmatpush1.bf16.msra.mxu1 %v992_v49  ;;  %v1161_v44 = vpack.c.bf16 %v1153_v35, %v1153_v35  ;;  %v1301_v27 = vsel %vm1290_vm8, %v2850_v23, %v3182_v12  ;;  %v1291_v8 = vsel %vm1290_vm8, %v3176_v21, %v1285_v62  ;;  %v1926_v62 = vld [vmem:[%s3079_s7 + $0x1c] sm:$0xf] }
 0x1b1   :  { %v1289_v13 = vpop.permute.xlu0 %1288  ;;  %v1271_v19 = vpop.permute.xlu1 %1270  ;;  %1180 = vmatprep.subr.bf16.mxu0 %v3185_v16  ;;  %1221 = vmatprep.subr.bf16.mxu1 %v1158_v55  ;;  %v1160_v30 = vpack.c.bf16 %v1152_v32, %v1152_v32  ;;  %v1329_v0 = vmul.f32 %v1321_v34, %v1300_v46  ;;  %v1326_v7 = vmul.f32 %v1309_v5, %v1297_v25  ;;  %v1169_v9 = vsel %vm379_vm6, %v1159_v14, 0 }
 0x1b2   :  { %v1299_v40 = vsel %vm1290_vm8, %v1271_v19, %v1277_v37  ;;  %v1302_v15 = vsel %vm1290_vm8, %v1289_v13, %v1271_v19  ;;  %v3188_v11 = vpack.c.bf16 %v3186_v28, %v3187_v26  ;;  %v3191_v31 = vpack.c.bf16 %v3189_v51, %v3190_v58  ;;  %v1921_v19 = vld [vmem:[%s3081_s1 + $0x18] sm:$0xf] }
 0x1b3   :  { %1911 = vmatmul.mubr.msk.bf16.vlgmr.msra.gmra.mrb[16].mxu0 %vm375_vm7, %v1909_v39  ;;  %1913 = vmatmul.mubr.msk.bf16.vlgmr.msra.gmra.mrb[16].mxu1 %vm375_vm7, %v1909_v39  ;;  %v1339_v36 = vpack.c.bf16 %v1331_v22, %v1327_v61  ;;  %v1292_v63 = vsel %vm1290_vm8, %v3174_v56, %v2850_v23  ;;  %v1333_v6 = vmul.f32 %v1321_v34, %v1301_v27  ;;  %v1175_v60 = vsel %vm379_vm6, %v1161_v44, 0 }
 0x1b4   :  { %1181 = vmatpush1.bf16.msra.mxu0 %v3188_v11  ;;  %1222 = vmatpush1.bf16.msra.mxu1 %v3191_v31  ;;  %v1328_v43 = vmul.f32 %v1317_v17, %v1291_v8  ;;  %v1334_v53 = vmul.f32 %v1309_v5, %v1299_v40  ;;  %v1337_v23 = vmul.f32 %v1321_v34, %v1302_v15 }
 0x1b5   :  { %v1458_v33 = vpop.permute.xlu0 %1457  ;;  %v1283_v57 = vpop.permute.xlu1 %1282  ;;  %1916 = vmatprep.subr.msk.bf16.mxu0 %vm379_vm6, %v1160_v30  ;;  %1918 = vmatprep.subr.msk.bf16.mxu1 %vm379_vm6, %v1162_v47  ;;  %v1341_v10 = vpack.c.bf16 %v1333_v6, %v1329_v0  ;;  %v1330_v2 = vmul.f32 %v1309_v5, %v1298_v24  ;;  %v1332_v29 = vmul.f32 %v1317_v17, %v1292_v63 }
 0x1b6   :  { %v1293_v21 = vsel %vm1290_vm8, %v1283_v57, %v1289_v13  ;;  %v1296_v50 = vsel %vm1290_vm8, %v1277_v37, %v1283_v57  ;;  %1212 = vmatprep.mubr.bf16.mxu0 %v3151_v48  ;;  %1253 = vmatprep.mubr.bf16.mxu1 %v3151_v48  ;;  %v1342_v18 = vpack.c.bf16 %v1334_v53, %v1334_v53 }
 0x1b7   :  { %v1335_v56 = vmul.f32 %v2873_v20, %v1296_v50  ;;  %v1336_v54 = vmul.f32 %v1317_v17, %v1293_v21  ;;  %v1338_v20 = vpack.c.bf16 %v1330_v2, %v1326_v7  ;;  %v1340_v49 = vpack.c.bf16 %v1332_v29, %v1328_v43  ;;  %v1932_v2 = vld [vmem:[%s3079_s7 + $0x20] sm:$0xf] }
 0x1b8   :  { %1183 = vmatpush1.bf16.msra.mxu0 %v1169_v9  ;;  %1224 = vmatpush1.bf16.msra.mxu1 %v1175_v60  ;;  %v2959_v32 = vrot.slane %v1926_v62, %v2303_v42  ;;  %v1345_v5 = vpack.c.bf16 %v1337_v23, %v1337_v23  ;;  %v1492_v46 = vrot.slane %v1926_v62, %v2314_v45  ;;  %v1352_v12 = vsel %vm379_vm6, %v1342_v18, 0 }
 0x1b9   :  { %v1464_v37 = vpop.permute.xlu0 %1463  ;;  %v1456_v35 = vpop.permute.xlu1 %1455  ;;  %1363 = vmatprep.subr.bf16.mxu0 %v1339_v36  ;;  %1404 = vmatprep.subr.bf16.mxu1 %v1341_v10  ;;  %v1343_v17 = vpack.c.bf16 %v1335_v56, %v1335_v56  ;;  %v1344_v34 = vpack.c.bf16 %v1336_v54, %v1336_v54  ;;  %v1500_v47 = vrot.slane %v1926_v62, %v2329_v4 }
 0x1ba   :  { %v1478_v55 = vsel %vm1473_vm9, %v1458_v33, %v1464_v37  ;;  %v1504_v8 = vrot.slane %v1926_v62, %v2331_v52 }
 0x1bb   :  { %1917 = vmatmul.mubr.msk.bf16.vlgmr.msra.gmra.mrb[20].mxu0 %vm375_vm7, %v1915_v41  ;;  %1919 = vmatmul.mubr.msk.bf16.vlgmr.msra.gmra.mrb[20].mxu1 %vm375_vm7, %v1915_v41  ;;  %v1514_v13 = vmul.f32 %v2959_v32, %v1478_v55  ;;  %v1358_v24 = vsel %vm379_vm6, %v1344_v34, 0 }
 0x1bc   :  { %1364 = vmatpush1.bf16.msra.mxu0 %v1338_v20  ;;  %1405 = vmatpush1.bf16.msra.mxu1 %v1340_v49  ;;  %v1679_v20 = vrot.slane %v1932_v2, %v2303_v42 }
 0x1bd   :  { %v1452_v22 = vpop.permute.xlu0 %1451  ;;  %v1462_v61 = vpop.permute.xlu1 %1461  ;;  %1922 = vmatprep.subr.msk.bf16.mxu0 %vm379_vm6, %v1343_v17  ;;  %1924 = vmatprep.subr.msk.bf16.mxu1 %vm379_vm6, %v1345_v5  ;;  %v1927_v17 = vld [vmem:[%s3081_s1 + $0x1c] sm:$0xf] }
 0x1be   :  { %v1477_v3 = vsel %vm1473_vm9, %v1456_v35, %v1462_v61  ;;  %1395 = vmatprep.mubr.bf16.mxu0 %v3151_v48  ;;  %1436 = vmatprep.mubr.bf16.mxu1 %v3151_v48  ;;  %v1481_v25 = vsel %vm1473_vm9, %v1452_v22, %v1458_v33 }
 0x1bf   :  { %v1510_v39 = vmul.f32 %v2959_v32, %v1477_v3  ;;  %v1513_v44 = vmul.f32 %v1492_v46, %v1481_v25 }
 0x1c0   :  { %1366 = vmatpush1.bf16.msra.mxu0 %v1352_v12  ;;  %1407 = vmatpush1.bf16.msra.mxu1 %v1358_v24 }
 0x1c1   :  { %v1470_v14 = vpop.permute.xlu0 %1469  ;;  %v1450_v59 = vpop.permute.xlu1 %1449  ;;  %v1522_v1 = vpack.c.bf16 %v1514_v13, %v1510_v39 }
 0x1c2   :  { %v1480_v16 = vsel %vm1473_vm9, %v1450_v59, %v1456_v35  ;;  %v1475_v30 = vsel %vm1473_vm9, %v1464_v37, %v1470_v14  ;;  %v1484_v0 = vsel %vm1473_vm9, %v1470_v14, %v1452_v22  ;;  %v1687_v14 = vrot.slane %v1932_v2, %v2331_v52 }
 0x1c3   :  { %v1509_v27 = vmul.f32 %v1492_v46, %v1480_v16  ;;  %1923 = vmatmul.mubr.msk.bf16.vlgmr.msra.gmra.mrb[24].mxu0 %vm375_vm7, %v1921_v19  ;;  %1925 = vmatmul.mubr.msk.bf16.vlgmr.msra.gmra.mrb[24].mxu1 %vm375_vm7, %v1921_v19  ;;  %v1515_v11 = vmul.f32 %v1500_v47, %v1475_v30  ;;  %v1516_v51 = vmul.f32 %v1504_v8, %v1484_v0 }
 0x1c4   :  { %1546 = vmatprep.subr.bf16.mxu0 %v1522_v1  ;;  %1578 = vmatprep.mubr.bf16.mxu0 %v3151_v48 }
 0x1c5   :  { %v1460_v40 = vpop.permute.xlu0 %1459  ;;  %v1521_v7 = vpack.c.bf16 %v1513_v44, %v1509_v27  ;;  %v1468_v15 = vpop.permute.xlu1 %1467  ;;  %1619 = vmatprep.mubr.bf16.mxu1 %v3151_v48 }
 0x1c6   :  { %v1474_v28 = vsel %vm1473_vm9, %v1462_v61, %v1468_v15  ;;  %v1483_v26 = vsel %vm1473_vm9, %v1468_v15, %v1450_v59  ;;  %v1675_v61 = vrot.slane %v1932_v2, %v2314_v45  ;;  %v1683_v45 = vrot.slane %v1932_v2, %v2329_v4 }
 0x1c7   :  { %v1511_v58 = vmul.f32 %v1500_v47, %v1474_v28  ;;  %v1512_v31 = vmul.f32 %v1504_v8, %v1483_v26  ;;  %1547 = vmatpush1.bf16.msra.mxu0 %v1521_v7 }
 0x1c9   :  { %v1472_v33 = vpop.permute.xlu0 %1471  ;;  %v1523_v36 = vpack.c.bf16 %v1515_v11, %v1511_v58  ;;  %v1454_v63 = vpop.permute.xlu1 %1453  ;;  %v1524_v6 = vpack.c.bf16 %v1516_v51, %v1512_v31 }
 0x1ca   :  { %v1482_v43 = vsel %vm1473_vm9, %v1454_v63, %v1460_v40  ;;  %v1485_v57 = vsel %vm1473_vm9, %v1472_v33, %v1454_v63 }
 0x1cb   :  { %v1517_v9 = vmul.f32 %v1492_v46, %v1482_v43  ;;  %v1520_v53 = vmul.f32 %v1504_v8, %v1485_v57  ;;  %1587 = vmatprep.subr.bf16.mxu1 %v1524_v6 }
 0x1cc   :  { %1588 = vmatpush1.bf16.msra.mxu1 %v1523_v36 }
 0x1cd   :  { %v1641_v21 = vpop.permute.xlu0 %1640  ;;  %v1528_v50 = vpack.c.bf16 %v1520_v53, %v1520_v53  ;;  %v1466_v60 = vpop.permute.xlu1 %1465  ;;  %v1525_v54 = vpack.c.bf16 %v1517_v9, %v1517_v9 }
 0x1ce   :  { %v1476_v23 = vsel %vm1473_vm9, %v1466_v60, %v1472_v33  ;;  %v1479_v56 = vsel %vm1473_vm9, %v1460_v40, %v1466_v60 }
 0x1cf   :  { %v1518_v10 = vmul.f32 %v2959_v32, %v1479_v56  ;;  %v1519_v62 = vmul.f32 %v1500_v47, %v1476_v23  ;;  %1930 = vmatprep.subr.msk.bf16.mxu1 %vm379_vm6, %v1528_v50  ;;  %v1535_v49 = vsel %vm379_vm6, %v1525_v54, 0 }
 0x1d1   :  { %v1647_v29 = vpop.permute.xlu0 %1646  ;;  %v1526_v37 = vpack.c.bf16 %v1518_v10, %v1518_v10  ;;  %v1527_v41 = vpack.c.bf16 %v1519_v62, %v1519_v62  ;;  %v1639_v35 = vpop.permute.xlu1 %1638 }
 0x1d2   :  { %v1661_v32 = vsel %vm1656_vm10, %v1641_v21, %v1647_v29 }
 0x1d3   :  { %1928 = vmatprep.subr.msk.bf16.mxu0 %vm379_vm6, %v1526_v37  ;;  %v1541_v18 = vsel %vm379_vm6, %v1527_v41, 0  ;;  %v1697_v55 = vmul.f32 %v1679_v20, %v1661_v32 }
 0x1d4   :  { %1549 = vmatpush1.bf16.msra.mxu0 %v1535_v49  ;;  %1590 = vmatpush1.bf16.msra.mxu1 %v1541_v18 }
 0x1d5   :  { %v1635_v5 = vpop.permute.xlu0 %1634  ;;  %v1645_v34 = vpop.permute.xlu1 %1644 }
 0x1d6   :  { %v1660_v42 = vsel %vm1656_vm10, %v1639_v35, %v1645_v34  ;;  %v1664_v3 = vsel %vm1656_vm10, %v1635_v5, %v1641_v21 }
 0x1d7   :  { %v1693_v22 = vmul.f32 %v1679_v20, %v1660_v42  ;;  %1929 = vmatmul.mubr.msk.bf16.vlgmr.msra.gmra.mrb[28].mxu0 %vm375_vm7, %v1927_v17  ;;  %1931 = vmatmul.mubr.msk.bf16.vlgmr.msra.gmra.mrb[28].mxu1 %vm375_vm7, %v1927_v17  ;;  %v1696_v24 = vmul.f32 %v1675_v61, %v1664_v3 }
 0x1d8   :  { %1761 = vmatprep.mubr.bf16.mxu0 %v3151_v48  ;;  %1802 = vmatprep.mubr.bf16.mxu1 %v3151_v48 }
 0x1d9   :  { %v1653_v46 = vpop.permute.xlu0 %1652  ;;  %v1633_v13 = vpop.permute.xlu1 %1632  ;;  %v1705_v39 = vpack.c.bf16 %v1697_v55, %v1693_v22 }
 0x1da   :  { %v1663_v12 = vsel %vm1656_vm10, %v1633_v13, %v1639_v35  ;;  %v1658_v19 = vsel %vm1656_vm10, %v1647_v29, %v1653_v46  ;;  %v1667_v59 = vsel %vm1656_vm10, %v1653_v46, %v1635_v5 }
 0x1db   :  { %v1692_v25 = vmul.f32 %v1675_v61, %v1663_v12  ;;  %1729 = vmatprep.subr.bf16.mxu0 %v1705_v39  ;;  %v1698_v27 = vmul.f32 %v1683_v45, %v1658_v19  ;;  %v1699_v4 = vmul.f32 %v1687_v14, %v1667_v59 }
 0x1dd   :  { %v1643_v1 = vpop.permute.xlu0 %1642  ;;  %v1704_v48 = vpack.c.bf16 %v1696_v24, %v1692_v25  ;;  %v1651_v16 = vpop.permute.xlu1 %1650 }
 0x1de   :  { %v1657_v47 = vsel %vm1656_vm10, %v1645_v34, %v1651_v16  ;;  %v1666_v44 = vsel %vm1656_vm10, %v1651_v16, %v1633_v13 }
 0x1df   :  { %v1694_v8 = vmul.f32 %v1683_v45, %v1657_v47  ;;  %v1695_v52 = vmul.f32 %v1687_v14, %v1666_v44  ;;  %1730 = vmatpush1.bf16.msra.mxu0 %v1704_v48 }
 0x1e1   :  { %v1655_v30 = vpop.permute.xlu0 %1654  ;;  %v1706_v0 = vpack.c.bf16 %v1698_v27, %v1694_v8  ;;  %v1637_v40 = vpop.permute.xlu1 %1636  ;;  %v1707_v7 = vpack.c.bf16 %v1699_v4, %v1695_v52 }
 0x1e2   :  { %v1665_v15 = vsel %vm1656_vm10, %v1637_v40, %v1643_v1  ;;  %v1668_v28 = vsel %vm1656_vm10, %v1655_v30, %v1637_v40 }
 0x1e3   :  { %v1700_v26 = vmul.f32 %v1675_v61, %v1665_v15  ;;  %v1703_v11 = vmul.f32 %v1687_v14, %v1668_v28  ;;  %1770 = vmatprep.subr.bf16.mxu1 %v1707_v7 }
 0x1e4   :  { %1771 = vmatpush1.bf16.msra.mxu1 %v1706_v0 }
 0x1e5   :  { %v1711_v51 = vpack.c.bf16 %v1703_v11, %v1703_v11  ;;  %v1649_v58 = vpop.permute.xlu1 %1648  ;;  %v1708_v36 = vpack.c.bf16 %v1700_v26, %v1700_v26 }
 0x1e6   :  { %v1659_v31 = vsel %vm1656_vm10, %v1649_v58, %v1655_v30  ;;  %v1662_v33 = vsel %vm1656_vm10, %v1643_v1, %v1649_v58 }
 0x1e7   :  { %v1701_v63 = vmul.f32 %v1679_v20, %v1662_v33  ;;  %v1702_v6 = vmul.f32 %v1683_v45, %v1659_v31  ;;  %1936 = vmatprep.subr.msk.bf16.mxu1 %vm379_vm6, %v1711_v51  ;;  %v1718_v9 = vsel %vm379_vm6, %v1708_v36, 0 }
 0x1e9   :  { %v1709_v43 = vpack.c.bf16 %v1701_v63, %v1701_v63  ;;  %v1710_v57 = vpack.c.bf16 %v1702_v6, %v1702_v6 }
 0x1eb   :  { %1934 = vmatprep.subr.msk.bf16.mxu0 %vm379_vm6, %v1709_v43  ;;  %v1724_v53 = vsel %vm379_vm6, %v1710_v57, 0 }
 0x1ec   :  { %1732 = vmatpush1.bf16.msra.mxu0 %v1718_v9  ;;  %1773 = vmatpush1.bf16.msra.mxu1 %v1724_v53 }
 0x1ef   :  { %1935 = vmatmul.mubr.msk.bf16.vlgmr.msra.gmra.mrb[32].mxu0 %vm375_vm7, %v1933_v38  ;;  %1937 = vmatmul.mubr.msk.bf16.vlgmr.msra.gmra.mrb[32].mxu1 %vm375_vm7, %v1933_v38 }
 0x266   :  { %v426_v21 = vpop.f32.mrb[0].mxu0  ;;  %v467_v50 = vpop.f32.mrb[0].mxu1 }
 0x267   :  { %v428_v60 = vpop.f32.mrb[1].mxu0  ;;  %v469_v23 = vpop.f32.mrb[1].mxu1 }
 0x268   :  { %v430_v56 = vpop.f32.mrb[2].mxu0  ;;  %v471_v54 = vpop.f32.mrb[2].mxu1 }
 0x269   :  { %v431_v10 = vpop.f32.mrb[3].mxu0  ;;  %v472_v62 = vpop.f32.mrb[3].mxu1 }
 0x26e   :  { %v523_v2 = vpop.f32.mrb[4].mxu0  ;;  %v564_v29 = vpop.f32.mrb[4].mxu1 }
 0x26f   :  { %v524_v37 = vadd.f32 %v523_v2, %v426_v21  ;;  %v525_v41 = vpop.f32.mrb[5].mxu0  ;;  %v565_v35 = vadd.f32 %v564_v29, %v467_v50  ;;  %v566_v20 = vpop.f32.mrb[5].mxu1 }
 0x270   :  { %v526_v49 = vadd.f32 %v525_v41, %v428_v60  ;;  %v527_v18 = vpop.f32.mrb[6].mxu0  ;;  %v567_v32 = vadd.f32 %v566_v20, %v469_v23  ;;  %v568_v5 = vpop.f32.mrb[6].mxu1 }
 0x271   :  { %v528_v17 = vpop.f32.mrb[7].mxu0  ;;  %v569_v34 = vpop.f32.mrb[7].mxu1 }
 0x276   :  { %v702_v42 = vpop.f32.mrb[8].mxu0  ;;  %v743_v55 = vpop.f32.mrb[8].mxu1 }
 0x277   :  { %v750_v22 = vadd.f32 %v702_v42, %v524_v37  ;;  %v704_v61 = vpop.f32.mrb[9].mxu0  ;;  %v752_v3 = vadd.f32 %v743_v55, %v565_v35  ;;  %v745_v46 = vpop.f32.mrb[9].mxu1 }
 0x278   :  { %v751_v13 = vadd.f32 %v704_v61, %v526_v49  ;;  %v706_v39 = vpop.f32.mrb[10].mxu0  ;;  %v753_v12 = vadd.f32 %v745_v46, %v567_v32  ;;  %v747_v24 = vpop.f32.mrb[10].mxu1 }
 0x279   :  { %v707_v25 = vpop.f32.mrb[11].mxu0  ;;  %v748_v45 = vpop.f32.mrb[11].mxu1 }
 0x27e   :  { %v885_v14 = vpop.f32.mrb[12].mxu0  ;;  %v926_v19 = vpop.f32.mrb[12].mxu1 }
 0x27f   :  { %v933_v59 = vadd.f32 %v885_v14, %v750_v22  ;;  %v887_v1 = vpop.f32.mrb[13].mxu0  ;;  %v935_v48 = vadd.f32 %v926_v19, %v752_v3  ;;  %v928_v16 = vpop.f32.mrb[13].mxu1 }
 0x280   :  { %v934_v47 = vadd.f32 %v887_v1, %v751_v13  ;;  %v889_v44 = vpop.f32.mrb[14].mxu0  ;;  %v936_v27 = vadd.f32 %v928_v16, %v753_v12  ;;  %v930_v4 = vpop.f32.mrb[14].mxu1 }
 0x281   :  { %v890_v8 = vpop.f32.mrb[15].mxu0  ;;  %v931_v52 = vpop.f32.mrb[15].mxu1 }
 0x282   :  { %v1819_v12 = vpop.permute.xlu1 %1818 }
 0x286   :  { %v1031_v30 = vpop.f32.mrb[16].mxu0  ;;  %v1072_v0 = vpop.f32.mrb[16].mxu1 }
 0x287   :  { %v1079_v40 = vadd.f32 %v1031_v30, %v933_v59  ;;  %v1033_v7 = vpop.f32.mrb[17].mxu0  ;;  %v1081_v15 = vadd.f32 %v1072_v0, %v935_v48  ;;  %v1074_v28 = vpop.f32.mrb[17].mxu1 }
 0x288   :  { %v1080_v26 = vadd.f32 %v1033_v7, %v934_v47  ;;  %v1082_v11 = vadd.f32 %v1074_v28, %v936_v27  ;;  %v1035_v51 = vpop.f32.mrb[18].mxu0  ;;  %v1076_v58 = vpop.f32.mrb[18].mxu1 }
 0x289   :  { %v1036_v31 = vpop.f32.mrb[19].mxu0  ;;  %v1077_v33 = vpop.f32.mrb[19].mxu1 }
 0x28a   :  { %v1826_v33 = vld [vmem:[%s3082_s6] sm:$0xff] }
 0x28e   :  { %v1214_v36 = vpop.f32.mrb[20].mxu0  ;;  %v1255_v63 = vpop.f32.mrb[20].mxu1 }
 0x28f   :  { %v1262_v6 = vadd.f32 %v1214_v36, %v1079_v40  ;;  %v1264_v43 = vadd.f32 %v1255_v63, %v1081_v15  ;;  %v1216_v57 = vpop.f32.mrb[21].mxu0  ;;  %v1257_v9 = vpop.f32.mrb[21].mxu1  ;;  %v1825_v36 = vld [vmem:[%s3083_s5] sm:$0xff] }
 0x290   :  { %v1263_v53 = vadd.f32 %v1216_v57, %v1080_v26  ;;  %v1265_v38 = vadd.f32 %v1257_v9, %v1082_v11  ;;  %v1218_v21 = vpop.f32.mrb[22].mxu0  ;;  %v1259_v50 = vpop.f32.mrb[22].mxu1 }
 0x291   :  { %v1219_v60 = vpop.f32.mrb[23].mxu0  ;;  %v1260_v23 = vpop.f32.mrb[23].mxu1 }
 0x296   :  { %v1397_v56 = vpop.f32.mrb[24].mxu0  ;;  %v1438_v54 = vpop.f32.mrb[24].mxu1 }
 0x297   :  { %v1445_v10 = vadd.f32 %v1397_v56, %v1262_v6  ;;  %v1447_v62 = vadd.f32 %v1438_v54, %v1264_v43  ;;  %v1399_v2 = vpop.f32.mrb[25].mxu0  ;;  %v1440_v29 = vpop.f32.mrb[25].mxu1 }
 0x298   :  { %v1446_v37 = vadd.f32 %v1399_v2, %v1263_v53  ;;  %v1448_v41 = vadd.f32 %v1440_v29, %v1265_v38  ;;  %v1401_v35 = vpop.f32.mrb[26].mxu0  ;;  %v1442_v20 = vpop.f32.mrb[26].mxu1 }
 0x299   :  { %v1402_v49 = vpop.f32.mrb[27].mxu0  ;;  %v1443_v18 = vpop.f32.mrb[27].mxu1 }
 0x2aa   :  { %v1580_v32 = vpop.f32.mrb[28].mxu0  ;;  %v1621_v5 = vpop.f32.mrb[28].mxu1 }
 0x2ab   :  { %v1628_v17 = vadd.f32 %v1580_v32, %v1445_v10  ;;  %v1630_v34 = vadd.f32 %v1621_v5, %v1447_v62  ;;  %v1582_v42 = vpop.f32.mrb[29].mxu0  ;;  %v1623_v55 = vpop.f32.mrb[29].mxu1 }
 0x2ac   :  { %v1629_v22 = vadd.f32 %v1582_v42, %v1446_v37  ;;  %v1631_v61 = vadd.f32 %v1623_v55, %v1448_v41  ;;  %v1584_v3 = vpop.f32.mrb[30].mxu0  ;;  %v1625_v46 = vpop.f32.mrb[30].mxu1 }
 0x2ad   :  { %v1585_v13 = vpop.f32.mrb[31].mxu0  ;;  %v1626_v39 = vpop.f32.mrb[31].mxu1 }
 0x2c2   :  { %v1763_v24 = vpop.f32.mrb[32].mxu0  ;;  %v1804_v25 = vpop.f32.mrb[32].mxu1 }
 0x2c3   :  { %v1811_v45 = vadd.f32 %v1763_v24, %v1628_v17  ;;  %v1813_v14 = vadd.f32 %v1804_v25, %v1630_v34  ;;  %v1765_v19 = vpop.f32.mrb[33].mxu0  ;;  %v1806_v59 = vpop.f32.mrb[33].mxu1 }
 0x2c4   :  { %v1812_v1 = vadd.f32 %v1765_v19, %v1629_v22  ;;  %v1814_v48 = vadd.f32 %v1806_v59, %v1631_v61  ;;  %v1767_v16 = vpop.f32.mrb[34].mxu0  ;;  %v1808_v47 = vpop.f32.mrb[34].mxu1 }
 0x2c5   :  { %v1821_v44 = vadd.f32 %v1819_v12, %v1811_v45  ;;  %v1768_v27 = vpop.f32.mrb[35].mxu0  ;;  %v1809_v4 = vpop.f32.mrb[35].mxu1  ;;  %v1823_v8 = vadd.f32 %v1819_v12, %v1813_v14 }
 0x2c6   :  { %v1822_v52 = vadd.f32 %v1819_v12, %v1812_v1  ;;  %v1824_v7 = vadd.f32 %v1819_v12, %v1814_v48 }
 0x2c7   :  { %v1833_v30 = vmul.f32 %v1821_v44, %v1821_v44  ;;  %v1835_v15 = vmul.f32 %v1823_v8, %v1823_v8 }
 0x2c8   :  { %v1827_v0 = vadd.f32 %v1822_v52, %v1821_v44  ;;  %v1834_v40 = vmul.f32 %v1822_v52, %v1822_v52  ;;  %v1836_v51 = vmul.f32 %v1824_v7, %v1824_v7 }
 0x2ca   :  { %v1828_v28 = vadd.f32 %v1827_v0, %v1823_v8  ;;  %v1837_v26 = vadd.f32 %v1834_v40, %v1833_v30 }
 0x2cc   :  { %v1829_v11 = vadd.f32 %v1828_v28, %v1824_v7  ;;  %v1838_v58 = vadd.f32 %v1837_v26, %v1835_v15 }
 0x2ce   :  { %1830 = vadd.xlane.f32.xlu0 %v1829_v11  ;;  %v1839_v31 = vadd.f32 %v1838_v58, %v1836_v51 }
 0x2d0   :  { %1840 = vadd.xlane.f32.xlu1 %v1839_v31 }
 0x2e1   :  { %1867 = vperm.xlu1 %1948, %v1826_v33  }
 0x2e4   :  { %1858 = vperm.xlu0 %1947, %v1825_v36  }
 0x35b   :  { %v1831_v63 = vpop.xlane.xlu0 %1830 }
 0x35c   :  { %v1832_v6 = vmul.f32 0.001953125, %v1831_v63 }
 0x35d   :  { %v1841_v43 = vpop.xlane.xlu1 %1840 }
 0x35e   :  { %v1842_v57 = vmul.f32 0.001953125, %v1841_v43  ;;  %v1843_v9 = vmul.f32 %v1832_v6, %v1832_v6  ;;  %v1846_v50 = vsub.f32 %v1821_v44, %v1832_v6  ;;  %v1847_v60 = vsub.f32 %v1822_v52, %v1832_v6 }
 0x35f   :  { %v1848_v23 = vsub.f32 %v1823_v8, %v1832_v6  ;;  %v1849_v56 = vsub.f32 %v1824_v7, %v1832_v6 }
 0x360   :  { %v1844_v53 = vsub.f32 %v1842_v57, %v1843_v9 }
 0x361   :  { %v1868_v18 = vpop.permute.xlu1 %1867 }
 0x362   :  { %v1845_v38 = vmax.f32 %v1844_v53, 0.0 }
 0x363   :  { %v1859_v37 = vpop.permute.xlu0 %1858 }
 0x364   :  { %v1850_v21 = vadd.f32 1e-05, %v1845_v38 }
 0x366   :  { %1955 = vrsqrt.f32 %v1850_v21 }
 0x370   :  { %v1956_v54 = vpop.eup %1955 }
 0x371   :  { %v1852_v10 = vmul.f32 %v1956_v54, %v1846_v50  ;;  %v1853_v62 = vmul.f32 %v1956_v54, %v1847_v60  ;;  %v1854_v2 = vmul.f32 %v1956_v54, %v1848_v23  ;;  %v1855_v29 = vmul.f32 %v1956_v54, %v1849_v56 }
 0x373   :  { %v1861_v41 = vmul.f32 %v1859_v37, %v1852_v10  ;;  %v1862_v35 = vmul.f32 %v1859_v37, %v1853_v62  ;;  %v1863_v20 = vmul.f32 %v1859_v37, %v1854_v2  ;;  %v1864_v49 = vmul.f32 %v1859_v37, %v1855_v29 }
 0x375   :  { %v1870_v32 = vadd.f32 %v1868_v18, %v1861_v41  ;;  %v1871_v5 = vadd.f32 %v1868_v18, %v1862_v35  ;;  %v1872_v17 = vadd.f32 %v1868_v18, %v1863_v20  ;;  %v1873_v34 = vadd.f32 %v1868_v18, %v1864_v49 }
 0x377   :  { %v1874_v42 = vmax.f32 %v1870_v32, 0.0  ;;  %v1875_v55 = vmax.f32 %v1871_v5, 0.0  ;;  %v1876_v22 = vmax.f32 %v1872_v17, 0.0  ;;  %v1877_v61 = vmax.f32 %v1873_v34, 0.0 }
 0x379   :  { %1878 = vst [vmem:[%s3084_s8] sm:$0xff] %v1874_v42  ;;  %1879 = vst [vmem:[%s3084_s8 + $0x8] sm:$0xff] %v1875_v55 }
 0x37a   :  { %1880 = vst [vmem:[%s3084_s8 + $0x10] sm:$0xff] %v1876_v22  ;;  %1881 = vst [vmem:[%s3084_s8 + $0x18] sm:$0xff] %v1877_v61 }

</bundles_post_ra>
